<compile_context>
chip_gen: v5e
topology: v5e:2x2
jax: 0.10.0
libtpu: 0.0.40
codegen_flags: <defaults>
</compile_context>

<pallas_src>
import jax
import jax.numpy as jnp
from jax import lax
from jax.experimental import pallas as pl
from jax.experimental.pallas import tpu as pltpu


# --------------------------------------------------------------------------- #
# Fused weight: one (16*Cin, 4*Cout) matrix computes all four pool quadrants.
# K layout = (du, dv, py, px, c): group offset (du,dv) in {0,1}^2, pixel (py,px)
# inside the 2x2 group, input channel c.  Column layout = (a*2+b)*Cout + o.
# --------------------------------------------------------------------------- #
def _build_wbig(w, cinp):
    _, _, cin, cout = w.shape
    wp = jnp.pad(w, ((0, 0), (0, 0), (0, cinp - cin), (0, 0)))
    cols = []
    for a in range(2):
        for b in range(2):
            # tap (ky,kx) lives at padded position (2du+py, 2dv+px) = (a+ky, b+kx)
            w4 = jnp.pad(wp, ((a, 1 - a), (b, 1 - b), (0, 0), (0, 0)))  # (4,4,ci,co)
            w6 = w4.reshape(2, 2, 2, 2, cinp, cout).transpose(0, 2, 1, 3, 4, 5)
            cols.append(w6.reshape(16 * cinp, cout))
    return jnp.concatenate(cols, axis=1).astype(jnp.bfloat16)  # (16*cinp, 4*cout)


def _pick_batch_block(n, r, k):
    """Images per grid step: fill MXU M (= B*R) but keep >=2 (ideally even) grid
    steps so both v7x TensorCores stay busy, and keep the scratch modest."""
    cands = []
    for b in range(1, n + 1):
        if n % b:
            continue
        if n >= 2 and n // b < 2:
            continue
        if b * r > 2048 or b * r * max(k, 1) * 2 > (4 << 20):
            continue
        cands.append(b)
    if not cands:
        return 1
    even = [b for b in cands if (n // b) % 2 == 0]
    return max(even) if even else max(cands)


def _vmem_limit(nbytes):
    return int(min(64 << 20, max(16 << 20, 2 * nbytes)))


# --------------------------------------------------------------------------- #
# Pass 1: conv (single matmul, all 4 quadrants) + masked sum / sum^2 stats.
# --------------------------------------------------------------------------- #
def _make_conv_kernel(B, R, C4, Cout4, offs, host_assembled):
    def kernel(x_ref, w_ref, mask_ref, conv_ref, stats_ref, *scratch):
        maskv = mask_ref[...]                                   # (R, 1) f32 validity
        s = jnp.zeros((1, Cout4), jnp.float32)
        s2 = jnp.zeros((1, Cout4), jnp.float32)

        if host_assembled:
            accs = [jnp.dot(x_ref[b], w_ref[...],
                            preferred_element_type=jnp.float32) for b in range(B)]
        else:
            lhs_ref, = scratch
            for b in range(B):
                for si, off in enumerate(offs):                 # 4 aligned slice copies
                    lhs_ref[b * R:(b + 1) * R, si * C4:(si + 1) * C4] = \
                        x_ref[b, off:off + R, :]
            acc = jnp.dot(lhs_ref[...], w_ref[...],
                          preferred_element_type=jnp.float32)   # (B*R, 4*Cout)
            accs = [acc[b * R:(b + 1) * R, :] for b in range(B)]

        for b in range(B):
            a = accs[b]
            conv_ref[b] = a.astype(jnp.bfloat16)                # 256-lane dense store
            am = a * maskv                                      # zero the junk rows
            s = s + jnp.sum(am, axis=0, keepdims=True)
            s2 = s2 + jnp.sum(am * am, axis=0, keepdims=True)
        stats_ref[0, 0:1, :] = s
        stats_ref[0, 1:2, :] = s2

    return kernel


# --------------------------------------------------------------------------- #
# Pass 2: elementwise BN FMA + 2x2 max-pool (over the 4 quadrant chunks) + ReLU.
# --------------------------------------------------------------------------- #
def _make_bnpool_kernel(B, Cout):
    def kernel(conv_ref, scale_ref, shift_ref, o_ref):
        sc = scale_ref[...]                                     # (1, Cout) f32
        sh = shift_ref[...]
        for b in range(B):
            p = None
            for q in range(4):
                yq = conv_ref[b, :, q * Cout:(q + 1) * Cout].astype(jnp.float32)
                yq = yq * sc + sh                               # BN folded into one FMA
                p = yq if p is None else jnp.maximum(p, yq)
            o_ref[b] = jnp.maximum(p, 0.0).astype(o_ref.dtype)  # ReLU after pool

    return kernel


# --------------------------------------------------------------------------- #
# One CNN4 block: conv3x3(pad=1, no bias) -> BN(batch stats) -> ReLU -> maxpool2.
# x: (N, H, W, Cin), H and W even.  Returns (N, H//2, W//2, Cout) bf16.
# --------------------------------------------------------------------------- #
def conv_block(x, w, gamma, beta, *, eps=1e-5):
    N, H, W, Cin = x.shape
    Cout = w.shape[-1]
    assert H % 2 == 0 and W % 2 == 0
    Ho, Wo = H // 2, W // 2
    Hg, Wg = Ho + 1, Wo + 1
    R = Ho * Wg                          # conv rows per image (1 junk col per group-row)
    offs = (0, 1, Wg, Wg + 1)            # the 4 neighbouring 2x2 groups of a pool pixel
    Cout4 = 4 * Cout

    host_assemble = Cin < 16             # block 1 (Cin=3): tiny im2col done in XLA
    Cinp = Cin if host_assemble else ((Cin + 31) // 32) * 32
    C4 = 4 * Cinp
    Rg = ((Hg * Wg + 1 + 7) // 8) * 8    # group rows per image (+1 slack for off=Wg+1)

    # padded space-to-depth: row u*Wg+v holds padded-input pixels (2u..2u+1, 2v..2v+1)
    xpad = jnp.pad(x.astype(jnp.bfloat16), ((0, 0), (1, 1), (1, 1), (0, Cinp - Cin)))
    g = xpad.reshape(N, Hg, 2, Wg, 2, Cinp).transpose(0, 1, 3, 2, 4, 5)
    g = g.reshape(N, Hg * Wg, C4)
    g = jnp.pad(g, ((0, 0), (0, Rg - Hg * Wg), (0, 0)))

    w_big = _build_wbig(w, Cinp)         # (16*Cinp, 4*Cout) bf16

    if host_assemble:
        k_raw = 16 * Cinp
        Kp = ((k_raw + 63) // 64) * 64
        lhs = jnp.concatenate([g[:, o:o + R, :] for o in offs], axis=-1)  # (N, R, 16*Cin)
        conv_in = jnp.pad(lhs, ((0, 0), (0, 0), (0, Kp - k_raw)))
        w_big = jnp.pad(w_big, ((0, Kp - k_raw), (0, 0)))
        in_rows, kin = R, Kp
    else:
        Kp = 16 * Cinp
        conv_in = g
        in_rows, kin = Rg, C4

    B = _pick_batch_block(N, R, Kp)
    steps = N // B
    rowmask = ((jnp.arange(R) % Wg) < Wo).astype(jnp.float32).reshape(R, 1)

    scratch = [] if host_assemble else [pltpu.VMEM((B * R, Kp), jnp.bfloat16)]
    p1_bytes = (2 * B * in_rows * kin * 2 + 2 * Kp * Cout4 * 2 + 2 * R * 4
                + 2 * B * R * Cout4 * 2 + 2 * 2 * Cout4 * 4
                + (0 if host_assemble else B * R * Kp * 2))

    conv_out, stats = pl.pallas_call(
        _make_conv_kernel(B, R, C4, Cout4, offs, host_assemble),
        grid=(steps,),
        in_specs=[
            pl.BlockSpec((B, in_rows, kin), lambda n: (n, 0, 0)),
            pl.BlockSpec((Kp, Cout4), lambda n: (0, 0)),
            pl.BlockSpec((R, 1), lambda n: (0, 0)),
        ],
        out_specs=[
            pl.BlockSpec((B, R, Cout4), lambda n: (n, 0, 0)),
            pl.BlockSpec((1, 2, Cout4), lambda n: (n, 0, 0)),
        ],
        out_shape=[
            jax.ShapeDtypeStruct((N, R, Cout4), jnp.bfloat16),
            jax.ShapeDtypeStruct((steps, 2, Cout4), jnp.float32),
        ],
        scratch_shapes=scratch,
        compiler_params=pltpu.CompilerParams(
            dimension_semantics=("parallel",),
            vmem_limit_bytes=_vmem_limit(p1_bytes)),
    )(conv_in, w_big, rowmask)

    # tiny cross-batch BN reduction + fold (done in XLA; 64-channel math)
    s_all = jnp.sum(stats, axis=0).reshape(2, 4, Cout).sum(axis=1)       # (2, Cout)
    count = N * H * W
    mean = s_all[0] / count
    var = jnp.maximum(s_all[1] / count - mean * mean, 0.0)
    scale = gamma * lax.rsqrt(var + eps)
    shift = beta - mean * scale
    scale = scale.reshape(1, Cout).astype(jnp.float32)
    shift = shift.reshape(1, Cout).astype(jnp.float32)

    p2_bytes = 2 * (B * R * Cout4 * 2 + 2 * Cout * 4 + B * R * Cout * 2)
    pooled = pl.pallas_call(
        _make_bnpool_kernel(B, Cout),
        grid=(steps,),
        in_specs=[
            pl.BlockSpec((B, R, Cout4), lambda n: (n, 0, 0)),
            pl.BlockSpec((1, Cout), lambda n: (0, 0)),
            pl.BlockSpec((1, Cout), lambda n: (0, 0)),
        ],
        out_specs=pl.BlockSpec((B, R, Cout), lambda n: (n, 0, 0)),
        out_shape=jax.ShapeDtypeStruct((N, R, Cout), jnp.bfloat16),
        compiler_params=pltpu.CompilerParams(
            dimension_semantics=("parallel",),
            vmem_limit_bytes=_vmem_limit(p2_bytes)),
    )(conv_out, scale, shift)

    # strip the single junk column per row-group introduced by the Wg = Wo+1 layout
    return pooled.reshape(N, Ho, Wg, Cout)[:, :, :Wo, :]


def convnet_forward(x_nchw, params):
    """Convnet.forward: 4 conv blocks, then flatten per sample in (C, H, W) order."""
    x = jnp.transpose(x_nchw, (0, 2, 3, 1))               # NCHW -> NHWC
    for (w, _b, gamma, beta) in params:                   # conv bias cancels under BN
        x = conv_block(x, w, gamma, beta)
    x = jnp.transpose(x, (0, 3, 1, 2)).astype(jnp.float32)
    return x.reshape(x.shape[0], -1)


# --------------------------------------------------------------------------- #
# Pure-JAX reference (f32, includes the conv bias) for a tolerance check.
# --------------------------------------------------------------------------- #
def reference_forward(x_nchw, params, eps=1e-5):
    x = jnp.transpose(x_nchw, (0, 2, 3, 1)).astype(jnp.float32)
    for (w, b, gamma, beta) in params:
        y = lax.conv_general_dilated(
            x, w, (1, 1), "SAME",
            dimension_numbers=("NHWC", "HWIO", "NHWC"),
            precision=lax.Precision.HIGHEST)
        y = y + b
        mean = jnp.mean(y, axis=(0, 1, 2))
        var = jnp.mean(jnp.square(y - mean), axis=(0, 1, 2))
        y = (y - mean) * lax.rsqrt(var + eps) * gamma + beta
        y = jnp.maximum(y, 0.0)
        n, hh, ww, c = y.shape
        y = y.reshape(n, hh // 2, 2, ww // 2, 2, c).max(axis=(2, 4))
        x = y
    x = jnp.transpose(x, (0, 3, 1, 2))
    return x.reshape(x.shape[0], -1)


if __name__ == "__main__":
    key = jax.random.PRNGKey(0)
    x_dim, hid_dim = 3, 64              # Convnet defaults: x_dim=3, hid_dim=64
    N, Hs, Ws = 2, 16, 16               # 16x16 -> 1x1 spatial after 4 pools

    kx, kp = jax.random.split(key)
    x = jax.random.normal(kx, (N, x_dim, Hs, Ws), jnp.float32)

    # Deterministic parameters (CNN4Backbone shapes: 4 blocks of
    # Conv2d(cin, 64, 3, pad=1, bias=True) + BatchNorm2d(64, affine=True)).
    params = []
    cin = x_dim
    for _ in range(4):
        kp, kw, kb, kg = jax.random.split(kp, 4)
        w = jax.random.normal(kw, (3, 3, cin, hid_dim), jnp.float32) * (2.0 / (9 * cin)) ** 0.5
        b = jax.random.normal(kb, (hid_dim,), jnp.float32) * 0.01
        gamma = jax.random.uniform(kg, (hid_dim,), jnp.float32)
        beta = jnp.zeros((hid_dim,), jnp.float32)
        params.append((w, b, gamma, beta))
        cin = hid_dim

    out = jax.jit(convnet_forward)(x, params)
    out = jax.block_until_ready(out)
    assert out.shape == (N, hid_dim * 1 * 1)          # (2, 64)
    assert bool(jnp.isfinite(out).all())

    # tolerance check vs f32 reference (kernel uses bf16 MXU inputs/activations)
    ref = reference_forward(x, params)
    max_err = float(jnp.max(jnp.abs(out - ref)))
    assert max_err < 0.3, f"mismatch vs reference: max abs err {max_err}"

    print("KERNEL_OK")
</pallas_src>

<mosaic_0001>
module attributes {stable_mosaic.version = 11 : i64} {
  func.func @kernel(%arg0: i32, %arg1: memref<1x72x64xbf16, #tpu.memory_space<vmem>>, %arg2: memref<64x256xbf16, #tpu.memory_space<vmem>>, %arg3: memref<72x1xf32, #tpu.memory_space<vmem>>, %arg4: memref<1x72x256xbf16, #tpu.memory_space<vmem>>, %arg5: memref<1x2x256xf32, #tpu.memory_space<vmem>>) attributes {dimension_semantics = [#tpu.dimension_semantics<parallel>], iteration_bounds = array<i64: 2>, scalar_prefetch = 0 : i64, scratch_operands = 0 : i64, tpu.core_type = #tpu.core_type<tc>, window_params = [{transform_indices = @transform_0, window_bounds = array<i64: 1, 72, 64>}, {pipeline_mode = #tpu.pipeline_mode<synchronous>, transform_indices = @transform_1, window_bounds = array<i64: 64, 256>}, {pipeline_mode = #tpu.pipeline_mode<synchronous>, transform_indices = @transform_2, window_bounds = array<i64: 72, 1>}, {transform_indices = @transform_3, window_bounds = array<i64: 1, 72, 256>}, {transform_indices = @transform_4, window_bounds = array<i64: 1, 2, 256>}]} {
    %c0 = arith.constant 0 : index
    %c0_0 = arith.constant 0 : index
    %0 = vector.load %arg3[%c0, %c0_0] : memref<72x1xf32, #tpu.memory_space<vmem>>, vector<72x1xf32>
    %cst = arith.constant 0.000000e+00 : f32
    %1 = vector.broadcast %cst : f32 to vector<1x256xf32>
    %cst_1 = arith.constant 0.000000e+00 : f32
    %2 = vector.broadcast %cst_1 : f32 to vector<1x256xf32>
    %c0_2 = arith.constant 0 : index
    %c0_3 = arith.constant 0 : index
    %c0_4 = arith.constant 0 : index
    %3 = vector.load %arg1[%c0_2, %c0_3, %c0_4] : memref<1x72x64xbf16, #tpu.memory_space<vmem>>, vector<1x72x64xbf16>
    %4 = vector.shape_cast %3 : vector<1x72x64xbf16> to vector<72x64xbf16>
    %c0_5 = arith.constant 0 : index
    %c0_6 = arith.constant 0 : index
    %5 = vector.load %arg2[%c0_5, %c0_6] : memref<64x256xbf16, #tpu.memory_space<vmem>>, vector<64x256xbf16>
    %cst_7 = arith.constant dense<0.000000e+00> : vector<72x256xf32>
    %6 = tpu.matmul %4, %5, %cst_7 {dimension_numbers = #tpu.dot_dimension_numbers<[1], [0], [0], [1], [0, 0, 1, 1], [], []>} : vector<72x64xbf16>, vector<64x256xbf16>, vector<72x256xf32> -> vector<72x256xf32>
    %7 = arith.truncf %6 : vector<72x256xf32> to vector<72x256xbf16>
    %c0_8 = arith.constant 0 : index
    %c0_9 = arith.constant 0 : index
    %c0_10 = arith.constant 0 : index
    %8 = vector.load %arg4[%c0_8, %c0_9, %c0_10] : memref<1x72x256xbf16, #tpu.memory_space<vmem>>, vector<1x72x256xbf16>
    %9 = vector.shape_cast %8 : vector<1x72x256xbf16> to vector<72x256xbf16>
    %10 = vector.shape_cast %7 : vector<72x256xbf16> to vector<1x72x256xbf16>
    tpu.vector_store %arg4[%c0_8, %c0_9, %c0_10], %10 {strides = array<i32>} : memref<1x72x256xbf16, #tpu.memory_space<vmem>>, vector<1x72x256xbf16>,
    %11 = vector.broadcast %0 : vector<72x1xf32> to vector<72x256xf32>
    %12 = arith.mulf %6, %11 : vector<72x256xf32>
    %cst_11 = arith.constant dense<0.000000e+00> : vector<256xf32>
    %13 = vector.multi_reduction <add>, %12, %cst_11 [0] : vector<72x256xf32> to vector<256xf32>
    %14 = vector.shape_cast %13 : vector<256xf32> to vector<1x256xf32>
    %15 = arith.addf %1, %14 : vector<1x256xf32>
    %16 = arith.mulf %12, %12 : vector<72x256xf32>
    %cst_12 = arith.constant dense<0.000000e+00> : vector<256xf32>
    %17 = vector.multi_reduction <add>, %16, %cst_12 [0] : vector<72x256xf32> to vector<256xf32>
    %18 = vector.shape_cast %17 : vector<256xf32> to vector<1x256xf32>
    %19 = arith.addf %2, %18 : vector<1x256xf32>
    %c0_13 = arith.constant 0 : index
    %c0_14 = arith.constant 0 : index
    %c0_15 = arith.constant 0 : index
    %20 = vector.load %arg5[%c0_13, %c0_14, %c0_15] : memref<1x2x256xf32, #tpu.memory_space<vmem>>, vector<1x1x256xf32>
    %21 = vector.shape_cast %20 : vector<1x1x256xf32> to vector<1x256xf32>
    %22 = vector.shape_cast %15 : vector<1x256xf32> to vector<1x1x256xf32>
    tpu.vector_store %arg5[%c0_13, %c0_14, %c0_15], %22 {strides = array<i32>} : memref<1x2x256xf32, #tpu.memory_space<vmem>>, vector<1x1x256xf32>,
    %c0_16 = arith.constant 0 : index
    %c1 = arith.constant 1 : index
    %c0_17 = arith.constant 0 : index
    %23 = vector.load %arg5[%c0_16, %c1, %c0_17] : memref<1x2x256xf32, #tpu.memory_space<vmem>>, vector<1x1x256xf32>
    %24 = vector.shape_cast %23 : vector<1x1x256xf32> to vector<1x256xf32>
    %25 = vector.shape_cast %19 : vector<1x256xf32> to vector<1x1x256xf32>
    tpu.vector_store %arg5[%c0_16, %c1, %c0_17], %25 {strides = array<i32>} : memref<1x2x256xf32, #tpu.memory_space<vmem>>, vector<1x1x256xf32>,
    return
  }
  func.func @transform_0(%arg0: i32) -> (i32, i32, i32) {
    %c0_i32 = arith.constant 0 : i32
    %c0_i32_0 = arith.constant 0 : i32
    %c0_i32_1 = arith.constant 0 : i32
    return %arg0, %c0_i32, %c0_i32_0 : i32, i32, i32
  }
  func.func @transform_1(%arg0: i32) -> (i32, i32) {
    %c0_i32 = arith.constant 0 : i32
    %c0_i32_0 = arith.constant 0 : i32
    %c0_i32_1 = arith.constant 0 : i32
    return %c0_i32, %c0_i32_0 : i32, i32
  }
  func.func @transform_2(%arg0: i32) -> (i32, i32) {
    %c0_i32 = arith.constant 0 : i32
    %c0_i32_0 = arith.constant 0 : i32
    %c0_i32_1 = arith.constant 0 : i32
    return %c0_i32, %c0_i32_0 : i32, i32
  }
  func.func @transform_3(%arg0: i32) -> (i32, i32, i32) {
    %c0_i32 = arith.constant 0 : i32
    %c0_i32_0 = arith.constant 0 : i32
    %c0_i32_1 = arith.constant 0 : i32
    return %arg0, %c0_i32, %c0_i32_0 : i32, i32, i32
  }
  func.func @transform_4(%arg0: i32) -> (i32, i32, i32) {
    %c0_i32 = arith.constant 0 : i32
    %c0_i32_0 = arith.constant 0 : i32
    %c0_i32_1 = arith.constant 0 : i32
    return %arg0, %c0_i32, %c0_i32_0 : i32, i32, i32
  }
}

module attributes {stable_mosaic.version = 11 : i64} {
  func.func @kernel(%arg0: i32, %arg1: memref<1x72x256xbf16, #tpu.memory_space<vmem>>, %arg2: memref<1x64xf32, #tpu.memory_space<vmem>>, %arg3: memref<1x64xf32, #tpu.memory_space<vmem>>, %arg4: memref<1x72x64xbf16, #tpu.memory_space<vmem>>) attributes {dimension_semantics = [#tpu.dimension_semantics<parallel>], iteration_bounds = array<i64: 2>, scalar_prefetch = 0 : i64, scratch_operands = 0 : i64, tpu.core_type = #tpu.core_type<tc>, window_params = [{transform_indices = @transform_0, window_bounds = array<i64: 1, 72, 256>}, {pipeline_mode = #tpu.pipeline_mode<synchronous>, transform_indices = @transform_1, window_bounds = array<i64: 1, 64>}, {pipeline_mode = #tpu.pipeline_mode<synchronous>, transform_indices = @transform_2, window_bounds = array<i64: 1, 64>}, {transform_indices = @transform_3, window_bounds = array<i64: 1, 72, 64>}]} {
    %c0 = arith.constant 0 : index
    %c0_0 = arith.constant 0 : index
    %0 = vector.load %arg2[%c0, %c0_0] : memref<1x64xf32, #tpu.memory_space<vmem>>, vector<1x64xf32>
    %c0_1 = arith.constant 0 : index
    %c0_2 = arith.constant 0 : index
    %1 = vector.load %arg3[%c0_1, %c0_2] : memref<1x64xf32, #tpu.memory_space<vmem>>, vector<1x64xf32>
    %c0_3 = arith.constant 0 : index
    %c0_4 = arith.constant 0 : index
    %c0_5 = arith.constant 0 : index
    %2 = vector.load %arg1[%c0_3, %c0_4, %c0_5] : memref<1x72x256xbf16, #tpu.memory_space<vmem>>, vector<1x72x64xbf16>
    %3 = vector.shape_cast %2 : vector<1x72x64xbf16> to vector<72x64xbf16>
    %4 = arith.extf %3 : vector<72x64xbf16> to vector<72x64xf32>
    %5 = vector.broadcast %0 : vector<1x64xf32> to vector<72x64xf32>
    %6 = arith.mulf %4, %5 : vector<72x64xf32>
    %7 = vector.broadcast %1 : vector<1x64xf32> to vector<72x64xf32>
    %8 = arith.addf %6, %7 : vector<72x64xf32>
    %c0_6 = arith.constant 0 : index
    %c0_7 = arith.constant 0 : index
    %c64 = arith.constant 64 : index
    %9 = vector.load %arg1[%c0_6, %c0_7, %c64] : memref<1x72x256xbf16, #tpu.memory_space<vmem>>, vector<1x72x64xbf16>
    %10 = vector.shape_cast %9 : vector<1x72x64xbf16> to vector<72x64xbf16>
    %11 = arith.extf %10 : vector<72x64xbf16> to vector<72x64xf32>
    %12 = vector.broadcast %0 : vector<1x64xf32> to vector<72x64xf32>
    %13 = arith.mulf %11, %12 : vector<72x64xf32>
    %14 = vector.broadcast %1 : vector<1x64xf32> to vector<72x64xf32>
    %15 = arith.addf %13, %14 : vector<72x64xf32>
    %16 = arith.maximumf %8, %15 : vector<72x64xf32>
    %c0_8 = arith.constant 0 : index
    %c0_9 = arith.constant 0 : index
    %c128 = arith.constant 128 : index
    %17 = vector.load %arg1[%c0_8, %c0_9, %c128] : memref<1x72x256xbf16, #tpu.memory_space<vmem>>, vector<1x72x64xbf16>
    %18 = vector.shape_cast %17 : vector<1x72x64xbf16> to vector<72x64xbf16>
    %19 = arith.extf %18 : vector<72x64xbf16> to vector<72x64xf32>
    %20 = vector.broadcast %0 : vector<1x64xf32> to vector<72x64xf32>
    %21 = arith.mulf %19, %20 : vector<72x64xf32>
    %22 = vector.broadcast %1 : vector<1x64xf32> to vector<72x64xf32>
    %23 = arith.addf %21, %22 : vector<72x64xf32>
    %24 = arith.maximumf %16, %23 : vector<72x64xf32>
    %c0_10 = arith.constant 0 : index
    %c0_11 = arith.constant 0 : index
    %c192 = arith.constant 192 : index
    %25 = vector.load %arg1[%c0_10, %c0_11, %c192] : memref<1x72x256xbf16, #tpu.memory_space<vmem>>, vector<1x72x64xbf16>
    %26 = vector.shape_cast %25 : vector<1x72x64xbf16> to vector<72x64xbf16>
    %27 = arith.extf %26 : vector<72x64xbf16> to vector<72x64xf32>
    %28 = vector.broadcast %0 : vector<1x64xf32> to vector<72x64xf32>
    %29 = arith.mulf %27, %28 : vector<72x64xf32>
    %30 = vector.broadcast %1 : vector<1x64xf32> to vector<72x64xf32>
    %31 = arith.addf %29, %30 : vector<72x64xf32>
    %32 = arith.maximumf %24, %31 : vector<72x64xf32>
    %cst = arith.constant 0.000000e+00 : f32
    %33 = vector.broadcast %cst : f32 to vector<72x64xf32>
    %34 = arith.maximumf %32, %33 : vector<72x64xf32>
    %35 = arith.truncf %34 : vector<72x64xf32> to vector<72x64xbf16>
    %c0_12 = arith.constant 0 : index
    %c0_13 = arith.constant 0 : index
    %c0_14 = arith.constant 0 : index
    %36 = vector.load %arg4[%c0_12, %c0_13, %c0_14] : memref<1x72x64xbf16, #tpu.memory_space<vmem>>, vector<1x72x64xbf16>
    %37 = vector.shape_cast %36 : vector<1x72x64xbf16> to vector<72x64xbf16>
    %38 = vector.shape_cast %35 : vector<72x64xbf16> to vector<1x72x64xbf16>
    tpu.vector_store %arg4[%c0_12, %c0_13, %c0_14], %38 {strides = array<i32>} : memref<1x72x64xbf16, #tpu.memory_space<vmem>>, vector<1x72x64xbf16>,
    return
  }
  func.func @transform_0(%arg0: i32) -> (i32, i32, i32) {
    %c0_i32 = arith.constant 0 : i32
    %c0_i32_0 = arith.constant 0 : i32
    %c0_i32_1 = arith.constant 0 : i32
    return %arg0, %c0_i32, %c0_i32_0 : i32, i32, i32
  }
  func.func @transform_1(%arg0: i32) -> (i32, i32) {
    %c0_i32 = arith.constant 0 : i32
    %c0_i32_0 = arith.constant 0 : i32
    %c0_i32_1 = arith.constant 0 : i32
    return %c0_i32, %c0_i32_0 : i32, i32
  }
  func.func @transform_2(%arg0: i32) -> (i32, i32) {
    %c0_i32 = arith.constant 0 : i32
    %c0_i32_0 = arith.constant 0 : i32
    %c0_i32_1 = arith.constant 0 : i32
    return %c0_i32, %c0_i32_0 : i32, i32
  }
  func.func @transform_3(%arg0: i32) -> (i32, i32, i32) {
    %c0_i32 = arith.constant 0 : i32
    %c0_i32_0 = arith.constant 0 : i32
    %c0_i32_1 = arith.constant 0 : i32
    return %arg0, %c0_i32, %c0_i32_0 : i32, i32, i32
  }
}

module attributes {stable_mosaic.version = 11 : i64} {
  func.func @kernel(%arg0: i32, %arg1: memref<1x32x256xbf16, #tpu.memory_space<vmem>>, %arg2: memref<1024x256xbf16, #tpu.memory_space<vmem>>, %arg3: memref<20x1xf32, #tpu.memory_space<vmem>>, %arg4: memref<1x20x256xbf16, #tpu.memory_space<vmem>>, %arg5: memref<1x2x256xf32, #tpu.memory_space<vmem>>, %arg6: memref<20x1024xbf16, #tpu.memory_space<vmem>>) attributes {dimension_semantics = [#tpu.dimension_semantics<parallel>], iteration_bounds = array<i64: 2>, scalar_prefetch = 0 : i64, scratch_operands = 1 : i64, tpu.core_type = #tpu.core_type<tc>, window_params = [{transform_indices = @transform_0, window_bounds = array<i64: 1, 32, 256>}, {pipeline_mode = #tpu.pipeline_mode<synchronous>, transform_indices = @transform_1, window_bounds = array<i64: 1024, 256>}, {pipeline_mode = #tpu.pipeline_mode<synchronous>, transform_indices = @transform_2, window_bounds = array<i64: 20, 1>}, {transform_indices = @transform_3, window_bounds = array<i64: 1, 20, 256>}, {transform_indices = @transform_4, window_bounds = array<i64: 1, 2, 256>}]} {
    %c0 = arith.constant 0 : index
    %c0_0 = arith.constant 0 : index
    %0 = vector.load %arg3[%c0, %c0_0] : memref<20x1xf32, #tpu.memory_space<vmem>>, vector<20x1xf32>
    %cst = arith.constant 0.000000e+00 : f32
    %1 = vector.broadcast %cst : f32 to vector<1x256xf32>
    %cst_1 = arith.constant 0.000000e+00 : f32
    %2 = vector.broadcast %cst_1 : f32 to vector<1x256xf32>
    %c0_2 = arith.constant 0 : index
    %c0_3 = arith.constant 0 : index
    %c0_4 = arith.constant 0 : index
    %3 = vector.load %arg1[%c0_2, %c0_3, %c0_4] : memref<1x32x256xbf16, #tpu.memory_space<vmem>>, vector<1x20x256xbf16>
    %4 = vector.shape_cast %3 : vector<1x20x256xbf16> to vector<20x256xbf16>
    %c0_5 = arith.constant 0 : index
    %c0_6 = arith.constant 0 : index
    %5 = vector.load %arg6[%c0_5, %c0_6] : memref<20x1024xbf16, #tpu.memory_space<vmem>>, vector<20x256xbf16>
    tpu.vector_store %arg6[%c0_5, %c0_6], %4 {strides = array<i32>} : memref<20x1024xbf16, #tpu.memory_space<vmem>>, vector<20x256xbf16>,
    %c0_7 = arith.constant 0 : index
    %c1 = arith.constant 1 : index
    %c0_8 = arith.constant 0 : index
    %6 = vector.load %arg1[%c0_7, %c1, %c0_8] : memref<1x32x256xbf16, #tpu.memory_space<vmem>>, vector<1x20x256xbf16>
    %7 = vector.shape_cast %6 : vector<1x20x256xbf16> to vector<20x256xbf16>
    %c0_9 = arith.constant 0 : index
    %c256 = arith.constant 256 : index
    %8 = vector.load %arg6[%c0_9, %c256] : memref<20x1024xbf16, #tpu.memory_space<vmem>>, vector<20x256xbf16>
    tpu.vector_store %arg6[%c0_9, %c256], %7 {strides = array<i32>} : memref<20x1024xbf16, #tpu.memory_space<vmem>>, vector<20x256xbf16>,
    %c0_10 = arith.constant 0 : index
    %c5 = arith.constant 5 : index
    %c0_11 = arith.constant 0 : index
    %9 = vector.load %arg1[%c0_10, %c5, %c0_11] : memref<1x32x256xbf16, #tpu.memory_space<vmem>>, vector<1x20x256xbf16>
    %10 = vector.shape_cast %9 : vector<1x20x256xbf16> to vector<20x256xbf16>
    %c0_12 = arith.constant 0 : index
    %c512 = arith.constant 512 : index
    %11 = vector.load %arg6[%c0_12, %c512] : memref<20x1024xbf16, #tpu.memory_space<vmem>>, vector<20x256xbf16>
    tpu.vector_store %arg6[%c0_12, %c512], %10 {strides = array<i32>} : memref<20x1024xbf16, #tpu.memory_space<vmem>>, vector<20x256xbf16>,
    %c0_13 = arith.constant 0 : index
    %c6 = arith.constant 6 : index
    %c0_14 = arith.constant 0 : index
    %12 = vector.load %arg1[%c0_13, %c6, %c0_14] : memref<1x32x256xbf16, #tpu.memory_space<vmem>>, vector<1x20x256xbf16>
    %13 = vector.shape_cast %12 : vector<1x20x256xbf16> to vector<20x256xbf16>
    %c0_15 = arith.constant 0 : index
    %c768 = arith.constant 768 : index
    %14 = vector.load %arg6[%c0_15, %c768] : memref<20x1024xbf16, #tpu.memory_space<vmem>>, vector<20x256xbf16>
    tpu.vector_store %arg6[%c0_15, %c768], %13 {strides = array<i32>} : memref<20x1024xbf16, #tpu.memory_space<vmem>>, vector<20x256xbf16>,
    %c0_16 = arith.constant 0 : index
    %c0_17 = arith.constant 0 : index
    %15 = vector.load %arg6[%c0_16, %c0_17] : memref<20x1024xbf16, #tpu.memory_space<vmem>>, vector<20x1024xbf16>
    %c0_18 = arith.constant 0 : index
    %c0_19 = arith.constant 0 : index
    %16 = vector.load %arg2[%c0_18, %c0_19] : memref<1024x256xbf16, #tpu.memory_space<vmem>>, vector<1024x256xbf16>
    %cst_20 = arith.constant dense<0.000000e+00> : vector<20x256xf32>
    %17 = tpu.matmul %15, %16, %cst_20 {dimension_numbers = #tpu.dot_dimension_numbers<[1], [0], [0], [1], [0, 0, 1, 1], [], []>} : vector<20x1024xbf16>, vector<1024x256xbf16>, vector<20x256xf32> -> vector<20x256xf32>
    %18 = arith.truncf %17 : vector<20x256xf32> to vector<20x256xbf16>
    %c0_21 = arith.constant 0 : index
    %c0_22 = arith.constant 0 : index
    %c0_23 = arith.constant 0 : index
    %19 = vector.load %arg4[%c0_21, %c0_22, %c0_23] : memref<1x20x256xbf16, #tpu.memory_space<vmem>>, vector<1x20x256xbf16>
    %20 = vector.shape_cast %19 : vector<1x20x256xbf16> to vector<20x256xbf16>
    %21 = vector.shape_cast %18 : vector<20x256xbf16> to vector<1x20x256xbf16>
    tpu.vector_store %arg4[%c0_21, %c0_22, %c0_23], %21 {strides = array<i32>} : memref<1x20x256xbf16, #tpu.memory_space<vmem>>, vector<1x20x256xbf16>,
    %22 = vector.broadcast %0 : vector<20x1xf32> to vector<20x256xf32>
    %23 = arith.mulf %17, %22 : vector<20x256xf32>
    %cst_24 = arith.constant dense<0.000000e+00> : vector<256xf32>
    %24 = vector.multi_reduction <add>, %23, %cst_24 [0] : vector<20x256xf32> to vector<256xf32>
    %25 = vector.shape_cast %24 : vector<256xf32> to vector<1x256xf32>
    %26 = arith.addf %1, %25 : vector<1x256xf32>
    %27 = arith.mulf %23, %23 : vector<20x256xf32>
    %cst_25 = arith.constant dense<0.000000e+00> : vector<256xf32>
    %28 = vector.multi_reduction <add>, %27, %cst_25 [0] : vector<20x256xf32> to vector<256xf32>
    %29 = vector.shape_cast %28 : vector<256xf32> to vector<1x256xf32>
    %30 = arith.addf %2, %29 : vector<1x256xf32>
    %c0_26 = arith.constant 0 : index
    %c0_27 = arith.constant 0 : index
    %c0_28 = arith.constant 0 : index
    %31 = vector.load %arg5[%c0_26, %c0_27, %c0_28] : memref<1x2x256xf32, #tpu.memory_space<vmem>>, vector<1x1x256xf32>
    %32 = vector.shape_cast %31 : vector<1x1x256xf32> to vector<1x256xf32>
    %33 = vector.shape_cast %26 : vector<1x256xf32> to vector<1x1x256xf32>
    tpu.vector_store %arg5[%c0_26, %c0_27, %c0_28], %33 {strides = array<i32>} : memref<1x2x256xf32, #tpu.memory_space<vmem>>, vector<1x1x256xf32>,
    %c0_29 = arith.constant 0 : index
    %c1_30 = arith.constant 1 : index
    %c0_31 = arith.constant 0 : index
    %34 = vector.load %arg5[%c0_29, %c1_30, %c0_31] : memref<1x2x256xf32, #tpu.memory_space<vmem>>, vector<1x1x256xf32>
    %35 = vector.shape_cast %34 : vector<1x1x256xf32> to vector<1x256xf32>
    %36 = vector.shape_cast %30 : vector<1x256xf32> to vector<1x1x256xf32>
    tpu.vector_store %arg5[%c0_29, %c1_30, %c0_31], %36 {strides = array<i32>} : memref<1x2x256xf32, #tpu.memory_space<vmem>>, vector<1x1x256xf32>,
    return
  }
  func.func @transform_0(%arg0: i32) -> (i32, i32, i32) {
    %c0_i32 = arith.constant 0 : i32
    %c0_i32_0 = arith.constant 0 : i32
    %c0_i32_1 = arith.constant 0 : i32
    return %arg0, %c0_i32, %c0_i32_0 : i32, i32, i32
  }
  func.func @transform_1(%arg0: i32) -> (i32, i32) {
    %c0_i32 = arith.constant 0 : i32
    %c0_i32_0 = arith.constant 0 : i32
    %c0_i32_1 = arith.constant 0 : i32
    return %c0_i32, %c0_i32_0 : i32, i32
  }
  func.func @transform_2(%arg0: i32) -> (i32, i32) {
    %c0_i32 = arith.constant 0 : i32
    %c0_i32_0 = arith.constant 0 : i32
    %c0_i32_1 = arith.constant 0 : i32
    return %c0_i32, %c0_i32_0 : i32, i32
  }
  func.func @transform_3(%arg0: i32) -> (i32, i32, i32) {
    %c0_i32 = arith.constant 0 : i32
    %c0_i32_0 = arith.constant 0 : i32
    %c0_i32_1 = arith.constant 0 : i32
    return %arg0, %c0_i32, %c0_i32_0 : i32, i32, i32
  }
  func.func @transform_4(%arg0: i32) -> (i32, i32, i32) {
    %c0_i32 = arith.constant 0 : i32
    %c0_i32_0 = arith.constant 0 : i32
    %c0_i32_1 = arith.constant 0 : i32
    return %arg0, %c0_i32, %c0_i32_0 : i32, i32, i32
  }
}

module attributes {stable_mosaic.version = 11 : i64} {
  func.func @kernel(%arg0: i32, %arg1: memref<1x20x256xbf16, #tpu.memory_space<vmem>>, %arg2: memref<1x64xf32, #tpu.memory_space<vmem>>, %arg3: memref<1x64xf32, #tpu.memory_space<vmem>>, %arg4: memref<1x20x64xbf16, #tpu.memory_space<vmem>>) attributes {dimension_semantics = [#tpu.dimension_semantics<parallel>], iteration_bounds = array<i64: 2>, scalar_prefetch = 0 : i64, scratch_operands = 0 : i64, tpu.core_type = #tpu.core_type<tc>, window_params = [{transform_indices = @transform_0, window_bounds = array<i64: 1, 20, 256>}, {pipeline_mode = #tpu.pipeline_mode<synchronous>, transform_indices = @transform_1, window_bounds = array<i64: 1, 64>}, {pipeline_mode = #tpu.pipeline_mode<synchronous>, transform_indices = @transform_2, window_bounds = array<i64: 1, 64>}, {transform_indices = @transform_3, window_bounds = array<i64: 1, 20, 64>}]} {
    %c0 = arith.constant 0 : index
    %c0_0 = arith.constant 0 : index
    %0 = vector.load %arg2[%c0, %c0_0] : memref<1x64xf32, #tpu.memory_space<vmem>>, vector<1x64xf32>
    %c0_1 = arith.constant 0 : index
    %c0_2 = arith.constant 0 : index
    %1 = vector.load %arg3[%c0_1, %c0_2] : memref<1x64xf32, #tpu.memory_space<vmem>>, vector<1x64xf32>
    %c0_3 = arith.constant 0 : index
    %c0_4 = arith.constant 0 : index
    %c0_5 = arith.constant 0 : index
    %2 = vector.load %arg1[%c0_3, %c0_4, %c0_5] : memref<1x20x256xbf16, #tpu.memory_space<vmem>>, vector<1x20x64xbf16>
    %3 = vector.shape_cast %2 : vector<1x20x64xbf16> to vector<20x64xbf16>
    %4 = arith.extf %3 : vector<20x64xbf16> to vector<20x64xf32>
    %5 = vector.broadcast %0 : vector<1x64xf32> to vector<20x64xf32>
    %6 = arith.mulf %4, %5 : vector<20x64xf32>
    %7 = vector.broadcast %1 : vector<1x64xf32> to vector<20x64xf32>
    %8 = arith.addf %6, %7 : vector<20x64xf32>
    %c0_6 = arith.constant 0 : index
    %c0_7 = arith.constant 0 : index
    %c64 = arith.constant 64 : index
    %9 = vector.load %arg1[%c0_6, %c0_7, %c64] : memref<1x20x256xbf16, #tpu.memory_space<vmem>>, vector<1x20x64xbf16>
    %10 = vector.shape_cast %9 : vector<1x20x64xbf16> to vector<20x64xbf16>
    %11 = arith.extf %10 : vector<20x64xbf16> to vector<20x64xf32>
    %12 = vector.broadcast %0 : vector<1x64xf32> to vector<20x64xf32>
    %13 = arith.mulf %11, %12 : vector<20x64xf32>
    %14 = vector.broadcast %1 : vector<1x64xf32> to vector<20x64xf32>
    %15 = arith.addf %13, %14 : vector<20x64xf32>
    %16 = arith.maximumf %8, %15 : vector<20x64xf32>
    %c0_8 = arith.constant 0 : index
    %c0_9 = arith.constant 0 : index
    %c128 = arith.constant 128 : index
    %17 = vector.load %arg1[%c0_8, %c0_9, %c128] : memref<1x20x256xbf16, #tpu.memory_space<vmem>>, vector<1x20x64xbf16>
    %18 = vector.shape_cast %17 : vector<1x20x64xbf16> to vector<20x64xbf16>
    %19 = arith.extf %18 : vector<20x64xbf16> to vector<20x64xf32>
    %20 = vector.broadcast %0 : vector<1x64xf32> to vector<20x64xf32>
    %21 = arith.mulf %19, %20 : vector<20x64xf32>
    %22 = vector.broadcast %1 : vector<1x64xf32> to vector<20x64xf32>
    %23 = arith.addf %21, %22 : vector<20x64xf32>
    %24 = arith.maximumf %16, %23 : vector<20x64xf32>
    %c0_10 = arith.constant 0 : index
    %c0_11 = arith.constant 0 : index
    %c192 = arith.constant 192 : index
    %25 = vector.load %arg1[%c0_10, %c0_11, %c192] : memref<1x20x256xbf16, #tpu.memory_space<vmem>>, vector<1x20x64xbf16>
    %26 = vector.shape_cast %25 : vector<1x20x64xbf16> to vector<20x64xbf16>
    %27 = arith.extf %26 : vector<20x64xbf16> to vector<20x64xf32>
    %28 = vector.broadcast %0 : vector<1x64xf32> to vector<20x64xf32>
    %29 = arith.mulf %27, %28 : vector<20x64xf32>
    %30 = vector.broadcast %1 : vector<1x64xf32> to vector<20x64xf32>
    %31 = arith.addf %29, %30 : vector<20x64xf32>
    %32 = arith.maximumf %24, %31 : vector<20x64xf32>
    %cst = arith.constant 0.000000e+00 : f32
    %33 = vector.broadcast %cst : f32 to vector<20x64xf32>
    %34 = arith.maximumf %32, %33 : vector<20x64xf32>
    %35 = arith.truncf %34 : vector<20x64xf32> to vector<20x64xbf16>
    %c0_12 = arith.constant 0 : index
    %c0_13 = arith.constant 0 : index
    %c0_14 = arith.constant 0 : index
    %36 = vector.load %arg4[%c0_12, %c0_13, %c0_14] : memref<1x20x64xbf16, #tpu.memory_space<vmem>>, vector<1x20x64xbf16>
    %37 = vector.shape_cast %36 : vector<1x20x64xbf16> to vector<20x64xbf16>
    %38 = vector.shape_cast %35 : vector<20x64xbf16> to vector<1x20x64xbf16>
    tpu.vector_store %arg4[%c0_12, %c0_13, %c0_14], %38 {strides = array<i32>} : memref<1x20x64xbf16, #tpu.memory_space<vmem>>, vector<1x20x64xbf16>,
    return
  }
  func.func @transform_0(%arg0: i32) -> (i32, i32, i32) {
    %c0_i32 = arith.constant 0 : i32
    %c0_i32_0 = arith.constant 0 : i32
    %c0_i32_1 = arith.constant 0 : i32
    return %arg0, %c0_i32, %c0_i32_0 : i32, i32, i32
  }
  func.func @transform_1(%arg0: i32) -> (i32, i32) {
    %c0_i32 = arith.constant 0 : i32
    %c0_i32_0 = arith.constant 0 : i32
    %c0_i32_1 = arith.constant 0 : i32
    return %c0_i32, %c0_i32_0 : i32, i32
  }
  func.func @transform_2(%arg0: i32) -> (i32, i32) {
    %c0_i32 = arith.constant 0 : i32
    %c0_i32_0 = arith.constant 0 : i32
    %c0_i32_1 = arith.constant 0 : i32
    return %c0_i32, %c0_i32_0 : i32, i32
  }
  func.func @transform_3(%arg0: i32) -> (i32, i32, i32) {
    %c0_i32 = arith.constant 0 : i32
    %c0_i32_0 = arith.constant 0 : i32
    %c0_i32_1 = arith.constant 0 : i32
    return %arg0, %c0_i32, %c0_i32_0 : i32, i32, i32
  }
}

module attributes {stable_mosaic.version = 11 : i64} {
  func.func @kernel(%arg0: i32, %arg1: memref<1x16x256xbf16, #tpu.memory_space<vmem>>, %arg2: memref<1024x256xbf16, #tpu.memory_space<vmem>>, %arg3: memref<6x1xf32, #tpu.memory_space<vmem>>, %arg4: memref<1x6x256xbf16, #tpu.memory_space<vmem>>, %arg5: memref<1x2x256xf32, #tpu.memory_space<vmem>>, %arg6: memref<6x1024xbf16, #tpu.memory_space<vmem>>) attributes {dimension_semantics = [#tpu.dimension_semantics<parallel>], iteration_bounds = array<i64: 2>, scalar_prefetch = 0 : i64, scratch_operands = 1 : i64, tpu.core_type = #tpu.core_type<tc>, window_params = [{transform_indices = @transform_0, window_bounds = array<i64: 1, 16, 256>}, {pipeline_mode = #tpu.pipeline_mode<synchronous>, transform_indices = @transform_1, window_bounds = array<i64: 1024, 256>}, {pipeline_mode = #tpu.pipeline_mode<synchronous>, transform_indices = @transform_2, window_bounds = array<i64: 6, 1>}, {transform_indices = @transform_3, window_bounds = array<i64: 1, 6, 256>}, {transform_indices = @transform_4, window_bounds = array<i64: 1, 2, 256>}]} {
    %c0 = arith.constant 0 : index
    %c0_0 = arith.constant 0 : index
    %0 = vector.load %arg3[%c0, %c0_0] : memref<6x1xf32, #tpu.memory_space<vmem>>, vector<6x1xf32>
    %cst = arith.constant 0.000000e+00 : f32
    %1 = vector.broadcast %cst : f32 to vector<1x256xf32>
    %cst_1 = arith.constant 0.000000e+00 : f32
    %2 = vector.broadcast %cst_1 : f32 to vector<1x256xf32>
    %c0_2 = arith.constant 0 : index
    %c0_3 = arith.constant 0 : index
    %c0_4 = arith.constant 0 : index
    %3 = vector.load %arg1[%c0_2, %c0_3, %c0_4] : memref<1x16x256xbf16, #tpu.memory_space<vmem>>, vector<1x6x256xbf16>
    %4 = vector.shape_cast %3 : vector<1x6x256xbf16> to vector<6x256xbf16>
    %c0_5 = arith.constant 0 : index
    %c0_6 = arith.constant 0 : index
    %5 = vector.load %arg6[%c0_5, %c0_6] : memref<6x1024xbf16, #tpu.memory_space<vmem>>, vector<6x256xbf16>
    tpu.vector_store %arg6[%c0_5, %c0_6], %4 {strides = array<i32>} : memref<6x1024xbf16, #tpu.memory_space<vmem>>, vector<6x256xbf16>,
    %c0_7 = arith.constant 0 : index
    %c1 = arith.constant 1 : index
    %c0_8 = arith.constant 0 : index
    %6 = vector.load %arg1[%c0_7, %c1, %c0_8] : memref<1x16x256xbf16, #tpu.memory_space<vmem>>, vector<1x6x256xbf16>
    %7 = vector.shape_cast %6 : vector<1x6x256xbf16> to vector<6x256xbf16>
    %c0_9 = arith.constant 0 : index
    %c256 = arith.constant 256 : index
    %8 = vector.load %arg6[%c0_9, %c256] : memref<6x1024xbf16, #tpu.memory_space<vmem>>, vector<6x256xbf16>
    tpu.vector_store %arg6[%c0_9, %c256], %7 {strides = array<i32>} : memref<6x1024xbf16, #tpu.memory_space<vmem>>, vector<6x256xbf16>,
    %c0_10 = arith.constant 0 : index
    %c3 = arith.constant 3 : index
    %c0_11 = arith.constant 0 : index
    %9 = vector.load %arg1[%c0_10, %c3, %c0_11] : memref<1x16x256xbf16, #tpu.memory_space<vmem>>, vector<1x6x256xbf16>
    %10 = vector.shape_cast %9 : vector<1x6x256xbf16> to vector<6x256xbf16>
    %c0_12 = arith.constant 0 : index
    %c512 = arith.constant 512 : index
    %11 = vector.load %arg6[%c0_12, %c512] : memref<6x1024xbf16, #tpu.memory_space<vmem>>, vector<6x256xbf16>
    tpu.vector_store %arg6[%c0_12, %c512], %10 {strides = array<i32>} : memref<6x1024xbf16, #tpu.memory_space<vmem>>, vector<6x256xbf16>,
    %c0_13 = arith.constant 0 : index
    %c4 = arith.constant 4 : index
    %c0_14 = arith.constant 0 : index
    %12 = vector.load %arg1[%c0_13, %c4, %c0_14] : memref<1x16x256xbf16, #tpu.memory_space<vmem>>, vector<1x6x256xbf16>
    %13 = vector.shape_cast %12 : vector<1x6x256xbf16> to vector<6x256xbf16>
    %c0_15 = arith.constant 0 : index
    %c768 = arith.constant 768 : index
    %14 = vector.load %arg6[%c0_15, %c768] : memref<6x1024xbf16, #tpu.memory_space<vmem>>, vector<6x256xbf16>
    tpu.vector_store %arg6[%c0_15, %c768], %13 {strides = array<i32>} : memref<6x1024xbf16, #tpu.memory_space<vmem>>, vector<6x256xbf16>,
    %c0_16 = arith.constant 0 : index
    %c0_17 = arith.constant 0 : index
    %15 = vector.load %arg6[%c0_16, %c0_17] : memref<6x1024xbf16, #tpu.memory_space<vmem>>, vector<6x1024xbf16>
    %c0_18 = arith.constant 0 : index
    %c0_19 = arith.constant 0 : index
    %16 = vector.load %arg2[%c0_18, %c0_19] : memref<1024x256xbf16, #tpu.memory_space<vmem>>, vector<1024x256xbf16>
    %cst_20 = arith.constant dense<0.000000e+00> : vector<6x256xf32>
    %17 = tpu.matmul %15, %16, %cst_20 {dimension_numbers = #tpu.dot_dimension_numbers<[1], [0], [0], [1], [0, 0, 1, 1], [], []>} : vector<6x1024xbf16>, vector<1024x256xbf16>, vector<6x256xf32> -> vector<6x256xf32>
    %18 = arith.truncf %17 : vector<6x256xf32> to vector<6x256xbf16>
    %c0_21 = arith.constant 0 : index
    %c0_22 = arith.constant 0 : index
    %c0_23 = arith.constant 0 : index
    %19 = vector.load %arg4[%c0_21, %c0_22, %c0_23] : memref<1x6x256xbf16, #tpu.memory_space<vmem>>, vector<1x6x256xbf16>
    %20 = vector.shape_cast %19 : vector<1x6x256xbf16> to vector<6x256xbf16>
    %21 = vector.shape_cast %18 : vector<6x256xbf16> to vector<1x6x256xbf16>
    tpu.vector_store %arg4[%c0_21, %c0_22, %c0_23], %21 {strides = array<i32>} : memref<1x6x256xbf16, #tpu.memory_space<vmem>>, vector<1x6x256xbf16>,
    %22 = vector.broadcast %0 : vector<6x1xf32> to vector<6x256xf32>
    %23 = arith.mulf %17, %22 : vector<6x256xf32>
    %cst_24 = arith.constant dense<0.000000e+00> : vector<256xf32>
    %24 = vector.multi_reduction <add>, %23, %cst_24 [0] : vector<6x256xf32> to vector<256xf32>
    %25 = vector.shape_cast %24 : vector<256xf32> to vector<1x256xf32>
    %26 = arith.addf %1, %25 : vector<1x256xf32>
    %27 = arith.mulf %23, %23 : vector<6x256xf32>
    %cst_25 = arith.constant dense<0.000000e+00> : vector<256xf32>
    %28 = vector.multi_reduction <add>, %27, %cst_25 [0] : vector<6x256xf32> to vector<256xf32>
    %29 = vector.shape_cast %28 : vector<256xf32> to vector<1x256xf32>
    %30 = arith.addf %2, %29 : vector<1x256xf32>
    %c0_26 = arith.constant 0 : index
    %c0_27 = arith.constant 0 : index
    %c0_28 = arith.constant 0 : index
    %31 = vector.load %arg5[%c0_26, %c0_27, %c0_28] : memref<1x2x256xf32, #tpu.memory_space<vmem>>, vector<1x1x256xf32>
    %32 = vector.shape_cast %31 : vector<1x1x256xf32> to vector<1x256xf32>
    %33 = vector.shape_cast %26 : vector<1x256xf32> to vector<1x1x256xf32>
    tpu.vector_store %arg5[%c0_26, %c0_27, %c0_28], %33 {strides = array<i32>} : memref<1x2x256xf32, #tpu.memory_space<vmem>>, vector<1x1x256xf32>,
    %c0_29 = arith.constant 0 : index
    %c1_30 = arith.constant 1 : index
    %c0_31 = arith.constant 0 : index
    %34 = vector.load %arg5[%c0_29, %c1_30, %c0_31] : memref<1x2x256xf32, #tpu.memory_space<vmem>>, vector<1x1x256xf32>
    %35 = vector.shape_cast %34 : vector<1x1x256xf32> to vector<1x256xf32>
    %36 = vector.shape_cast %30 : vector<1x256xf32> to vector<1x1x256xf32>
    tpu.vector_store %arg5[%c0_29, %c1_30, %c0_31], %36 {strides = array<i32>} : memref<1x2x256xf32, #tpu.memory_space<vmem>>, vector<1x1x256xf32>,
    return
  }
  func.func @transform_0(%arg0: i32) -> (i32, i32, i32) {
    %c0_i32 = arith.constant 0 : i32
    %c0_i32_0 = arith.constant 0 : i32
    %c0_i32_1 = arith.constant 0 : i32
    return %arg0, %c0_i32, %c0_i32_0 : i32, i32, i32
  }
  func.func @transform_1(%arg0: i32) -> (i32, i32) {
    %c0_i32 = arith.constant 0 : i32
    %c0_i32_0 = arith.constant 0 : i32
    %c0_i32_1 = arith.constant 0 : i32
    return %c0_i32, %c0_i32_0 : i32, i32
  }
  func.func @transform_2(%arg0: i32) -> (i32, i32) {
    %c0_i32 = arith.constant 0 : i32
    %c0_i32_0 = arith.constant 0 : i32
    %c0_i32_1 = arith.constant 0 : i32
    return %c0_i32, %c0_i32_0 : i32, i32
  }
  func.func @transform_3(%arg0: i32) -> (i32, i32, i32) {
    %c0_i32 = arith.constant 0 : i32
    %c0_i32_0 = arith.constant 0 : i32
    %c0_i32_1 = arith.constant 0 : i32
    return %arg0, %c0_i32, %c0_i32_0 : i32, i32, i32
  }
  func.func @transform_4(%arg0: i32) -> (i32, i32, i32) {
    %c0_i32 = arith.constant 0 : i32
    %c0_i32_0 = arith.constant 0 : i32
    %c0_i32_1 = arith.constant 0 : i32
    return %arg0, %c0_i32, %c0_i32_0 : i32, i32, i32
  }
}

module attributes {stable_mosaic.version = 11 : i64} {
  func.func @kernel(%arg0: i32, %arg1: memref<1x6x256xbf16, #tpu.memory_space<vmem>>, %arg2: memref<1x64xf32, #tpu.memory_space<vmem>>, %arg3: memref<1x64xf32, #tpu.memory_space<vmem>>, %arg4: memref<1x6x64xbf16, #tpu.memory_space<vmem>>) attributes {dimension_semantics = [#tpu.dimension_semantics<parallel>], iteration_bounds = array<i64: 2>, scalar_prefetch = 0 : i64, scratch_operands = 0 : i64, tpu.core_type = #tpu.core_type<tc>, window_params = [{transform_indices = @transform_0, window_bounds = array<i64: 1, 6, 256>}, {pipeline_mode = #tpu.pipeline_mode<synchronous>, transform_indices = @transform_1, window_bounds = array<i64: 1, 64>}, {pipeline_mode = #tpu.pipeline_mode<synchronous>, transform_indices = @transform_2, window_bounds = array<i64: 1, 64>}, {transform_indices = @transform_3, window_bounds = array<i64: 1, 6, 64>}]} {
    %c0 = arith.constant 0 : index
    %c0_0 = arith.constant 0 : index
    %0 = vector.load %arg2[%c0, %c0_0] : memref<1x64xf32, #tpu.memory_space<vmem>>, vector<1x64xf32>
    %c0_1 = arith.constant 0 : index
    %c0_2 = arith.constant 0 : index
    %1 = vector.load %arg3[%c0_1, %c0_2] : memref<1x64xf32, #tpu.memory_space<vmem>>, vector<1x64xf32>
    %c0_3 = arith.constant 0 : index
    %c0_4 = arith.constant 0 : index
    %c0_5 = arith.constant 0 : index
    %2 = vector.load %arg1[%c0_3, %c0_4, %c0_5] : memref<1x6x256xbf16, #tpu.memory_space<vmem>>, vector<1x6x64xbf16>
    %3 = vector.shape_cast %2 : vector<1x6x64xbf16> to vector<6x64xbf16>
    %4 = arith.extf %3 : vector<6x64xbf16> to vector<6x64xf32>
    %5 = vector.broadcast %0 : vector<1x64xf32> to vector<6x64xf32>
    %6 = arith.mulf %4, %5 : vector<6x64xf32>
    %7 = vector.broadcast %1 : vector<1x64xf32> to vector<6x64xf32>
    %8 = arith.addf %6, %7 : vector<6x64xf32>
    %c0_6 = arith.constant 0 : index
    %c0_7 = arith.constant 0 : index
    %c64 = arith.constant 64 : index
    %9 = vector.load %arg1[%c0_6, %c0_7, %c64] : memref<1x6x256xbf16, #tpu.memory_space<vmem>>, vector<1x6x64xbf16>
    %10 = vector.shape_cast %9 : vector<1x6x64xbf16> to vector<6x64xbf16>
    %11 = arith.extf %10 : vector<6x64xbf16> to vector<6x64xf32>
    %12 = vector.broadcast %0 : vector<1x64xf32> to vector<6x64xf32>
    %13 = arith.mulf %11, %12 : vector<6x64xf32>
    %14 = vector.broadcast %1 : vector<1x64xf32> to vector<6x64xf32>
    %15 = arith.addf %13, %14 : vector<6x64xf32>
    %16 = arith.maximumf %8, %15 : vector<6x64xf32>
    %c0_8 = arith.constant 0 : index
    %c0_9 = arith.constant 0 : index
    %c128 = arith.constant 128 : index
    %17 = vector.load %arg1[%c0_8, %c0_9, %c128] : memref<1x6x256xbf16, #tpu.memory_space<vmem>>, vector<1x6x64xbf16>
    %18 = vector.shape_cast %17 : vector<1x6x64xbf16> to vector<6x64xbf16>
    %19 = arith.extf %18 : vector<6x64xbf16> to vector<6x64xf32>
    %20 = vector.broadcast %0 : vector<1x64xf32> to vector<6x64xf32>
    %21 = arith.mulf %19, %20 : vector<6x64xf32>
    %22 = vector.broadcast %1 : vector<1x64xf32> to vector<6x64xf32>
    %23 = arith.addf %21, %22 : vector<6x64xf32>
    %24 = arith.maximumf %16, %23 : vector<6x64xf32>
    %c0_10 = arith.constant 0 : index
    %c0_11 = arith.constant 0 : index
    %c192 = arith.constant 192 : index
    %25 = vector.load %arg1[%c0_10, %c0_11, %c192] : memref<1x6x256xbf16, #tpu.memory_space<vmem>>, vector<1x6x64xbf16>
    %26 = vector.shape_cast %25 : vector<1x6x64xbf16> to vector<6x64xbf16>
    %27 = arith.extf %26 : vector<6x64xbf16> to vector<6x64xf32>
    %28 = vector.broadcast %0 : vector<1x64xf32> to vector<6x64xf32>
    %29 = arith.mulf %27, %28 : vector<6x64xf32>
    %30 = vector.broadcast %1 : vector<1x64xf32> to vector<6x64xf32>
    %31 = arith.addf %29, %30 : vector<6x64xf32>
    %32 = arith.maximumf %24, %31 : vector<6x64xf32>
    %cst = arith.constant 0.000000e+00 : f32
    %33 = vector.broadcast %cst : f32 to vector<6x64xf32>
    %34 = arith.maximumf %32, %33 : vector<6x64xf32>
    %35 = arith.truncf %34 : vector<6x64xf32> to vector<6x64xbf16>
    %c0_12 = arith.constant 0 : index
    %c0_13 = arith.constant 0 : index
    %c0_14 = arith.constant 0 : index
    %36 = vector.load %arg4[%c0_12, %c0_13, %c0_14] : memref<1x6x64xbf16, #tpu.memory_space<vmem>>, vector<1x6x64xbf16>
    %37 = vector.shape_cast %36 : vector<1x6x64xbf16> to vector<6x64xbf16>
    %38 = vector.shape_cast %35 : vector<6x64xbf16> to vector<1x6x64xbf16>
    tpu.vector_store %arg4[%c0_12, %c0_13, %c0_14], %38 {strides = array<i32>} : memref<1x6x64xbf16, #tpu.memory_space<vmem>>, vector<1x6x64xbf16>,
    return
  }
  func.func @transform_0(%arg0: i32) -> (i32, i32, i32) {
    %c0_i32 = arith.constant 0 : i32
    %c0_i32_0 = arith.constant 0 : i32
    %c0_i32_1 = arith.constant 0 : i32
    return %arg0, %c0_i32, %c0_i32_0 : i32, i32, i32
  }
  func.func @transform_1(%arg0: i32) -> (i32, i32) {
    %c0_i32 = arith.constant 0 : i32
    %c0_i32_0 = arith.constant 0 : i32
    %c0_i32_1 = arith.constant 0 : i32
    return %c0_i32, %c0_i32_0 : i32, i32
  }
  func.func @transform_2(%arg0: i32) -> (i32, i32) {
    %c0_i32 = arith.constant 0 : i32
    %c0_i32_0 = arith.constant 0 : i32
    %c0_i32_1 = arith.constant 0 : i32
    return %c0_i32, %c0_i32_0 : i32, i32
  }
  func.func @transform_3(%arg0: i32) -> (i32, i32, i32) {
    %c0_i32 = arith.constant 0 : i32
    %c0_i32_0 = arith.constant 0 : i32
    %c0_i32_1 = arith.constant 0 : i32
    return %arg0, %c0_i32, %c0_i32_0 : i32, i32, i32
  }
}

module attributes {stable_mosaic.version = 11 : i64} {
  func.func @kernel(%arg0: i32, %arg1: memref<1x2x256xbf16, #tpu.memory_space<vmem>>, %arg2: memref<1x64xf32, #tpu.memory_space<vmem>>, %arg3: memref<1x64xf32, #tpu.memory_space<vmem>>, %arg4: memref<1x2x64xbf16, #tpu.memory_space<vmem>>) attributes {dimension_semantics = [#tpu.dimension_semantics<parallel>], iteration_bounds = array<i64: 2>, scalar_prefetch = 0 : i64, scratch_operands = 0 : i64, tpu.core_type = #tpu.core_type<tc>, window_params = [{transform_indices = @transform_0, window_bounds = array<i64: 1, 2, 256>}, {pipeline_mode = #tpu.pipeline_mode<synchronous>, transform_indices = @transform_1, window_bounds = array<i64: 1, 64>}, {pipeline_mode = #tpu.pipeline_mode<synchronous>, transform_indices = @transform_2, window_bounds = array<i64: 1, 64>}, {transform_indices = @transform_3, window_bounds = array<i64: 1, 2, 64>}]} {
    %c0 = arith.constant 0 : index
    %c0_0 = arith.constant 0 : index
    %0 = vector.load %arg2[%c0, %c0_0] : memref<1x64xf32, #tpu.memory_space<vmem>>, vector<1x64xf32>
    %c0_1 = arith.constant 0 : index
    %c0_2 = arith.constant 0 : index
    %1 = vector.load %arg3[%c0_1, %c0_2] : memref<1x64xf32, #tpu.memory_space<vmem>>, vector<1x64xf32>
    %c0_3 = arith.constant 0 : index
    %c0_4 = arith.constant 0 : index
    %c0_5 = arith.constant 0 : index
    %2 = vector.load %arg1[%c0_3, %c0_4, %c0_5] : memref<1x2x256xbf16, #tpu.memory_space<vmem>>, vector<1x2x64xbf16>
    %3 = vector.shape_cast %2 : vector<1x2x64xbf16> to vector<2x64xbf16>
    %4 = arith.extf %3 : vector<2x64xbf16> to vector<2x64xf32>
    %5 = vector.broadcast %0 : vector<1x64xf32> to vector<2x64xf32>
    %6 = arith.mulf %4, %5 : vector<2x64xf32>
    %7 = vector.broadcast %1 : vector<1x64xf32> to vector<2x64xf32>
    %8 = arith.addf %6, %7 : vector<2x64xf32>
    %c0_6 = arith.constant 0 : index
    %c0_7 = arith.constant 0 : index
    %c64 = arith.constant 64 : index
    %9 = vector.load %arg1[%c0_6, %c0_7, %c64] : memref<1x2x256xbf16, #tpu.memory_space<vmem>>, vector<1x2x64xbf16>
    %10 = vector.shape_cast %9 : vector<1x2x64xbf16> to vector<2x64xbf16>
    %11 = arith.extf %10 : vector<2x64xbf16> to vector<2x64xf32>
    %12 = vector.broadcast %0 : vector<1x64xf32> to vector<2x64xf32>
    %13 = arith.mulf %11, %12 : vector<2x64xf32>
    %14 = vector.broadcast %1 : vector<1x64xf32> to vector<2x64xf32>
    %15 = arith.addf %13, %14 : vector<2x64xf32>
    %16 = arith.maximumf %8, %15 : vector<2x64xf32>
    %c0_8 = arith.constant 0 : index
    %c0_9 = arith.constant 0 : index
    %c128 = arith.constant 128 : index
    %17 = vector.load %arg1[%c0_8, %c0_9, %c128] : memref<1x2x256xbf16, #tpu.memory_space<vmem>>, vector<1x2x64xbf16>
    %18 = vector.shape_cast %17 : vector<1x2x64xbf16> to vector<2x64xbf16>
    %19 = arith.extf %18 : vector<2x64xbf16> to vector<2x64xf32>
    %20 = vector.broadcast %0 : vector<1x64xf32> to vector<2x64xf32>
    %21 = arith.mulf %19, %20 : vector<2x64xf32>
    %22 = vector.broadcast %1 : vector<1x64xf32> to vector<2x64xf32>
    %23 = arith.addf %21, %22 : vector<2x64xf32>
    %24 = arith.maximumf %16, %23 : vector<2x64xf32>
    %c0_10 = arith.constant 0 : index
    %c0_11 = arith.constant 0 : index
    %c192 = arith.constant 192 : index
    %25 = vector.load %arg1[%c0_10, %c0_11, %c192] : memref<1x2x256xbf16, #tpu.memory_space<vmem>>, vector<1x2x64xbf16>
    %26 = vector.shape_cast %25 : vector<1x2x64xbf16> to vector<2x64xbf16>
    %27 = arith.extf %26 : vector<2x64xbf16> to vector<2x64xf32>
    %28 = vector.broadcast %0 : vector<1x64xf32> to vector<2x64xf32>
    %29 = arith.mulf %27, %28 : vector<2x64xf32>
    %30 = vector.broadcast %1 : vector<1x64xf32> to vector<2x64xf32>
    %31 = arith.addf %29, %30 : vector<2x64xf32>
    %32 = arith.maximumf %24, %31 : vector<2x64xf32>
    %cst = arith.constant 0.000000e+00 : f32
    %33 = vector.broadcast %cst : f32 to vector<2x64xf32>
    %34 = arith.maximumf %32, %33 : vector<2x64xf32>
    %35 = arith.truncf %34 : vector<2x64xf32> to vector<2x64xbf16>
    %c0_12 = arith.constant 0 : index
    %c0_13 = arith.constant 0 : index
    %c0_14 = arith.constant 0 : index
    %36 = vector.load %arg4[%c0_12, %c0_13, %c0_14] : memref<1x2x64xbf16, #tpu.memory_space<vmem>>, vector<1x2x64xbf16>
    %37 = vector.shape_cast %36 : vector<1x2x64xbf16> to vector<2x64xbf16>
    %38 = vector.shape_cast %35 : vector<2x64xbf16> to vector<1x2x64xbf16>
    tpu.vector_store %arg4[%c0_12, %c0_13, %c0_14], %38 {strides = array<i32>} : memref<1x2x64xbf16, #tpu.memory_space<vmem>>, vector<1x2x64xbf16>,
    return
  }
  func.func @transform_0(%arg0: i32) -> (i32, i32, i32) {
    %c0_i32 = arith.constant 0 : i32
    %c0_i32_0 = arith.constant 0 : i32
    %c0_i32_1 = arith.constant 0 : i32
    return %arg0, %c0_i32, %c0_i32_0 : i32, i32, i32
  }
  func.func @transform_1(%arg0: i32) -> (i32, i32) {
    %c0_i32 = arith.constant 0 : i32
    %c0_i32_0 = arith.constant 0 : i32
    %c0_i32_1 = arith.constant 0 : i32
    return %c0_i32, %c0_i32_0 : i32, i32
  }
  func.func @transform_2(%arg0: i32) -> (i32, i32) {
    %c0_i32 = arith.constant 0 : i32
    %c0_i32_0 = arith.constant 0 : i32
    %c0_i32_1 = arith.constant 0 : i32
    return %c0_i32, %c0_i32_0 : i32, i32
  }
  func.func @transform_3(%arg0: i32) -> (i32, i32, i32) {
    %c0_i32 = arith.constant 0 : i32
    %c0_i32_0 = arith.constant 0 : i32
    %c0_i32_1 = arith.constant 0 : i32
    return %arg0, %c0_i32, %c0_i32_0 : i32, i32, i32
  }
}

module attributes {stable_mosaic.version = 11 : i64} {
  func.func @kernel(%arg0: i32, %arg1: memref<1x8x256xbf16, #tpu.memory_space<vmem>>, %arg2: memref<1024x256xbf16, #tpu.memory_space<vmem>>, %arg3: memref<2x1xf32, #tpu.memory_space<vmem>>, %arg4: memref<1x2x256xbf16, #tpu.memory_space<vmem>>, %arg5: memref<1x2x256xf32, #tpu.memory_space<vmem>>, %arg6: memref<2x1024xbf16, #tpu.memory_space<vmem>>) attributes {dimension_semantics = [#tpu.dimension_semantics<parallel>], iteration_bounds = array<i64: 2>, scalar_prefetch = 0 : i64, scratch_operands = 1 : i64, tpu.core_type = #tpu.core_type<tc>, window_params = [{transform_indices = @transform_0, window_bounds = array<i64: 1, 8, 256>}, {pipeline_mode = #tpu.pipeline_mode<synchronous>, transform_indices = @transform_1, window_bounds = array<i64: 1024, 256>}, {pipeline_mode = #tpu.pipeline_mode<synchronous>, transform_indices = @transform_2, window_bounds = array<i64: 2, 1>}, {transform_indices = @transform_3, window_bounds = array<i64: 1, 2, 256>}, {transform_indices = @transform_4, window_bounds = array<i64: 1, 2, 256>}]} {
    %c0 = arith.constant 0 : index
    %c0_0 = arith.constant 0 : index
    %0 = vector.load %arg3[%c0, %c0_0] : memref<2x1xf32, #tpu.memory_space<vmem>>, vector<2x1xf32>
    %cst = arith.constant 0.000000e+00 : f32
    %1 = vector.broadcast %cst : f32 to vector<1x256xf32>
    %cst_1 = arith.constant 0.000000e+00 : f32
    %2 = vector.broadcast %cst_1 : f32 to vector<1x256xf32>
    %c0_2 = arith.constant 0 : index
    %c0_3 = arith.constant 0 : index
    %c0_4 = arith.constant 0 : index
    %3 = vector.load %arg1[%c0_2, %c0_3, %c0_4] : memref<1x8x256xbf16, #tpu.memory_space<vmem>>, vector<1x2x256xbf16>
    %4 = vector.shape_cast %3 : vector<1x2x256xbf16> to vector<2x256xbf16>
    %c0_5 = arith.constant 0 : index
    %c0_6 = arith.constant 0 : index
    %5 = vector.load %arg6[%c0_5, %c0_6] : memref<2x1024xbf16, #tpu.memory_space<vmem>>, vector<2x256xbf16>
    tpu.vector_store %arg6[%c0_5, %c0_6], %4 {strides = array<i32>} : memref<2x1024xbf16, #tpu.memory_space<vmem>>, vector<2x256xbf16>,
    %c0_7 = arith.constant 0 : index
    %c1 = arith.constant 1 : index
    %c0_8 = arith.constant 0 : index
    %6 = vector.load %arg1[%c0_7, %c1, %c0_8] : memref<1x8x256xbf16, #tpu.memory_space<vmem>>, vector<1x2x256xbf16>
    %7 = vector.shape_cast %6 : vector<1x2x256xbf16> to vector<2x256xbf16>
    %c0_9 = arith.constant 0 : index
    %c256 = arith.constant 256 : index
    %8 = vector.load %arg6[%c0_9, %c256] : memref<2x1024xbf16, #tpu.memory_space<vmem>>, vector<2x256xbf16>
    tpu.vector_store %arg6[%c0_9, %c256], %7 {strides = array<i32>} : memref<2x1024xbf16, #tpu.memory_space<vmem>>, vector<2x256xbf16>,
    %c0_10 = arith.constant 0 : index
    %c2 = arith.constant 2 : index
    %c0_11 = arith.constant 0 : index
    %9 = vector.load %arg1[%c0_10, %c2, %c0_11] : memref<1x8x256xbf16, #tpu.memory_space<vmem>>, vector<1x2x256xbf16>
    %10 = vector.shape_cast %9 : vector<1x2x256xbf16> to vector<2x256xbf16>
    %c0_12 = arith.constant 0 : index
    %c512 = arith.constant 512 : index
    %11 = vector.load %arg6[%c0_12, %c512] : memref<2x1024xbf16, #tpu.memory_space<vmem>>, vector<2x256xbf16>
    tpu.vector_store %arg6[%c0_12, %c512], %10 {strides = array<i32>} : memref<2x1024xbf16, #tpu.memory_space<vmem>>, vector<2x256xbf16>,
    %c0_13 = arith.constant 0 : index
    %c3 = arith.constant 3 : index
    %c0_14 = arith.constant 0 : index
    %12 = vector.load %arg1[%c0_13, %c3, %c0_14] : memref<1x8x256xbf16, #tpu.memory_space<vmem>>, vector<1x2x256xbf16>
    %13 = vector.shape_cast %12 : vector<1x2x256xbf16> to vector<2x256xbf16>
    %c0_15 = arith.constant 0 : index
    %c768 = arith.constant 768 : index
    %14 = vector.load %arg6[%c0_15, %c768] : memref<2x1024xbf16, #tpu.memory_space<vmem>>, vector<2x256xbf16>
    tpu.vector_store %arg6[%c0_15, %c768], %13 {strides = array<i32>} : memref<2x1024xbf16, #tpu.memory_space<vmem>>, vector<2x256xbf16>,
    %c0_16 = arith.constant 0 : index
    %c0_17 = arith.constant 0 : index
    %15 = vector.load %arg6[%c0_16, %c0_17] : memref<2x1024xbf16, #tpu.memory_space<vmem>>, vector<2x1024xbf16>
    %c0_18 = arith.constant 0 : index
    %c0_19 = arith.constant 0 : index
    %16 = vector.load %arg2[%c0_18, %c0_19] : memref<1024x256xbf16, #tpu.memory_space<vmem>>, vector<1024x256xbf16>
    %cst_20 = arith.constant dense<0.000000e+00> : vector<2x256xf32>
    %17 = tpu.matmul %15, %16, %cst_20 {dimension_numbers = #tpu.dot_dimension_numbers<[1], [0], [0], [1], [0, 0, 1, 1], [], []>} : vector<2x1024xbf16>, vector<1024x256xbf16>, vector<2x256xf32> -> vector<2x256xf32>
    %18 = arith.truncf %17 : vector<2x256xf32> to vector<2x256xbf16>
    %c0_21 = arith.constant 0 : index
    %c0_22 = arith.constant 0 : index
    %c0_23 = arith.constant 0 : index
    %19 = vector.load %arg4[%c0_21, %c0_22, %c0_23] : memref<1x2x256xbf16, #tpu.memory_space<vmem>>, vector<1x2x256xbf16>
    %20 = vector.shape_cast %19 : vector<1x2x256xbf16> to vector<2x256xbf16>
    %21 = vector.shape_cast %18 : vector<2x256xbf16> to vector<1x2x256xbf16>
    tpu.vector_store %arg4[%c0_21, %c0_22, %c0_23], %21 {strides = array<i32>} : memref<1x2x256xbf16, #tpu.memory_space<vmem>>, vector<1x2x256xbf16>,
    %22 = vector.broadcast %0 : vector<2x1xf32> to vector<2x256xf32>
    %23 = arith.mulf %17, %22 : vector<2x256xf32>
    %cst_24 = arith.constant dense<0.000000e+00> : vector<256xf32>
    %24 = vector.multi_reduction <add>, %23, %cst_24 [0] : vector<2x256xf32> to vector<256xf32>
    %25 = vector.shape_cast %24 : vector<256xf32> to vector<1x256xf32>
    %26 = arith.addf %1, %25 : vector<1x256xf32>
    %27 = arith.mulf %23, %23 : vector<2x256xf32>
    %cst_25 = arith.constant dense<0.000000e+00> : vector<256xf32>
    %28 = vector.multi_reduction <add>, %27, %cst_25 [0] : vector<2x256xf32> to vector<256xf32>
    %29 = vector.shape_cast %28 : vector<256xf32> to vector<1x256xf32>
    %30 = arith.addf %2, %29 : vector<1x256xf32>
    %c0_26 = arith.constant 0 : index
    %c0_27 = arith.constant 0 : index
    %c0_28 = arith.constant 0 : index
    %31 = vector.load %arg5[%c0_26, %c0_27, %c0_28] : memref<1x2x256xf32, #tpu.memory_space<vmem>>, vector<1x1x256xf32>
    %32 = vector.shape_cast %31 : vector<1x1x256xf32> to vector<1x256xf32>
    %33 = vector.shape_cast %26 : vector<1x256xf32> to vector<1x1x256xf32>
    tpu.vector_store %arg5[%c0_26, %c0_27, %c0_28], %33 {strides = array<i32>} : memref<1x2x256xf32, #tpu.memory_space<vmem>>, vector<1x1x256xf32>,
    %c0_29 = arith.constant 0 : index
    %c1_30 = arith.constant 1 : index
    %c0_31 = arith.constant 0 : index
    %34 = vector.load %arg5[%c0_29, %c1_30, %c0_31] : memref<1x2x256xf32, #tpu.memory_space<vmem>>, vector<1x1x256xf32>
    %35 = vector.shape_cast %34 : vector<1x1x256xf32> to vector<1x256xf32>
    %36 = vector.shape_cast %30 : vector<1x256xf32> to vector<1x1x256xf32>
    tpu.vector_store %arg5[%c0_29, %c1_30, %c0_31], %36 {strides = array<i32>} : memref<1x2x256xf32, #tpu.memory_space<vmem>>, vector<1x1x256xf32>,
    return
  }
  func.func @transform_0(%arg0: i32) -> (i32, i32, i32) {
    %c0_i32 = arith.constant 0 : i32
    %c0_i32_0 = arith.constant 0 : i32
    %c0_i32_1 = arith.constant 0 : i32
    return %arg0, %c0_i32, %c0_i32_0 : i32, i32, i32
  }
  func.func @transform_1(%arg0: i32) -> (i32, i32) {
    %c0_i32 = arith.constant 0 : i32
    %c0_i32_0 = arith.constant 0 : i32
    %c0_i32_1 = arith.constant 0 : i32
    return %c0_i32, %c0_i32_0 : i32, i32
  }
  func.func @transform_2(%arg0: i32) -> (i32, i32) {
    %c0_i32 = arith.constant 0 : i32
    %c0_i32_0 = arith.constant 0 : i32
    %c0_i32_1 = arith.constant 0 : i32
    return %c0_i32, %c0_i32_0 : i32, i32
  }
  func.func @transform_3(%arg0: i32) -> (i32, i32, i32) {
    %c0_i32 = arith.constant 0 : i32
    %c0_i32_0 = arith.constant 0 : i32
    %c0_i32_1 = arith.constant 0 : i32
    return %arg0, %c0_i32, %c0_i32_0 : i32, i32, i32
  }
  func.func @transform_4(%arg0: i32) -> (i32, i32, i32) {
    %c0_i32 = arith.constant 0 : i32
    %c0_i32_0 = arith.constant 0 : i32
    %c0_i32_1 = arith.constant 0 : i32
    return %arg0, %c0_i32, %c0_i32_0 : i32, i32, i32
  }
}

</mosaic_0001>

<bundles_post_ra>
// kernel: convnet_forward.9
= control target key start
LH: loop header
LB: loop body
LE: loop exit
PB: predicated region body
PF: predicated region fallthrough
CT: control target
= control target key end

     0   :  { %s571_s12 = smov 0   ;;  %s824_s0 = inlined_call_operand.vmem [shape: bf16[2,72,256], index: 0, kind: input, shape index: {}]   ;;  %s825_s1 = inlined_call_operand.vmem [shape: f32[1,64], index: 1, kind: input, shape index: {}]   ;;  %s826_s2 = inlined_call_operand.vmem [shape: f32[1,64], index: 2, kind: input, shape index: {}]   ;;  %s827_s3 = inlined_call_operand.vmem [shape: bf16[2,72,64], index: 3, kind: output, shape index: {}]  }
   0x1 LB: > { %s475_s13 = sadd.s32 4294967295, %s548_s12   ;;  %p479_p0 = scmp.ge.s32.totalorder %s548_s12, 1  ;;  %s548_s12 = sphi %s571_s12, %s13_s12  }
   0x2   : > { %p137_p1 = scmp.lt.s32.totalorder %s548_s12, 3 }
   0x4   : > { %p138_p2 = pnand %p479_p0, %p137_p1 }
   0x5   : > { %s550_s16 = smov (!%p138_p2), 64   ;;  %p161_p3 = scmp.lt.s32.totalorder (!%p138_p2), %s475_s13, 1 }
   0x6   : > { %141 = sbr.rel (%p138_p2) target bundleno = 289 (0x121), region = 32 }
   0xb   : > { %v582_v0 = vld [vmem:[%s825_s1] ss:$0 sm:$0xff]  ;;  %s829_s13 = smov (!%p161_p3, %s475_s13), 1  ;;  %vm410_vm0 = vcmask 519168  }
   0xc   : > { %215 = vrot.lane.b32.xlu0 %v582_v0, %s550_s16  ;;  %v589_v1 = vld [vmem:[%s826_s2] ss:$0 sm:$0xff]  ;;  %s484_s19 = smul.u32 72, %s829_s13 }
   0xd   : > { %s485_s23 = smul.u32 36, %s829_s13 }
   0xe   : > { %s599_s22 = scalar_lea.vmem %s824_s0, %s484_s19 }
   0xf   : > { %v602_v2 = vld [vmem:[%s599_s22 + $0x40] sm:$0xff]   ;;  %v613_v6 = vld [vmem:[%s599_s22 + $0x28] sm:$0xff]   ;;  %v623_v12 = vld [vmem:[%s599_s22 + $0x34] sm:$0xff]   ;;  %s739_s26 = scalar_lea.vmem %s827_s3, %s485_s23 }
  0x10   : > { %v607_v4 = vld [vmem:[%s599_s22 + $0x4] sm:$0xff]   ;;  %v616_v7 = vld [vmem:[%s599_s22] sm:$0xf]  ;;  %v190_v8 = vunpack.c.l.bf16 %v602_v2  ;;  %v187_v11 = vunpack.c.l.bf16 %v613_v6  ;;  %v628_v15 = vld [vmem:[%s599_s22 + $0x30] sm:$0xf]  ;;  %v298_v16 = vunpack.c.h.bf16 %v613_v6  ;;  %v299_v17 = vunpack.c.l.bf16 %v623_v12 }
  0x11   : > { %v610_v5 = vld [vmem:[%s599_s22 + $0x20] sm:$0xff]   ;;  %v293_v9 = vunpack.c.l.bf16 %v607_v4  ;;  %v182_v13 = vunpack.c.l.bf16 %v616_v7  ;;  %v183_v14 = vunpack.c.h.bf16 %v607_v4  ;;  %v645_v22 = vld [vmem:[%s599_s22 + $0x10] sm:$0xff]   ;;  %v648_v23 = vld [vmem:[%s599_s22 + $0x18] sm:$0xff]   ;;  %v188_v27 = vunpack.c.l.bf16 %v628_v15 }
  0x12   : > { %v186_v10 = vunpack.c.l.bf16 %v610_v5  ;;  %v189_v28 = vunpack.c.h.bf16 %v623_v12  ;;  %v184_v35 = vunpack.c.l.bf16 %v645_v22  ;;  %v185_v36 = vunpack.c.l.bf16 %v648_v23  ;;  %v682_v50 = vld [vmem:[%s599_s22 + $0xc] sm:$0xf] }
  0x13   : > { %v296_v53 = vunpack.c.h.bf16 %v648_v23  ;;  %v297_v54 = vunpack.c.h.bf16 %v610_v5  ;;  %v294_v55 = vunpack.c.l.bf16 %v682_v50  ;;  %v295_v56 = vunpack.c.h.bf16 %v645_v22 }
  0x14   : > { %227 = vrot.lane.b32.xlu0 %v589_v1, %s550_s16  ;;  %v199_v5 = vmul.f32 %v582_v0, %v187_v11  ;;  %v307_v15 = vmul.f32 %v582_v0, %v298_v16  ;;  %v202_v22 = vmul.f32 %v582_v0, %v190_v8 }
  0x15   : > { %v305_v4 = vmul.f32 %v582_v0, %v296_v53 }
  0x16   : > { %v211_v7 = vadd.f32 %v589_v1, %v199_v5 }
  0x17   : > { %v314_v50 = vadd.f32 %v589_v1, %v305_v4 }
  0x7e   : > { %v604_v3 = vpop.permute.xlu0 %215 }
  0x7f   : > { %v226_v18 = vmul.f32 %v604_v3, %v190_v8  ;;  %v329_v19 = vmul.f32 %v293_v9, %v604_v3  ;;  %v222_v20 = vmul.f32 %v604_v3, %v186_v10  ;;  %v223_v21 = vmul.f32 %v604_v3, %v187_v11 }
  0x80   : > { %v218_v25 = vmul.f32 %v604_v3, %v182_v13  ;;  %v219_v26 = vmul.f32 %v604_v3, %v183_v14  ;;  %v334_v40 = vmul.f32 %v298_v16, %v604_v3  ;;  %v335_v41 = vmul.f32 %v299_v17, %v604_v3 }
  0x81   : > { %v224_v42 = vmul.f32 %v604_v3, %v188_v27  ;;  %v225_v43 = vmul.f32 %v604_v3, %v189_v28  ;;  %v220_v44 = vmul.f32 %v604_v3, %v184_v35  ;;  %v221_v45 = vmul.f32 %v604_v3, %v185_v36 }
  0x82   : > { %v332_v60 = vmul.f32 %v296_v53, %v604_v3  ;;  %v333_v61 = vmul.f32 %v297_v54, %v604_v3  ;;  %v330_v62 = vmul.f32 %v294_v55, %v604_v3  ;;  %v331_v63 = vmul.f32 %v295_v56, %v604_v3 }
  0x83   : > { %v302_v11 = vmul.f32 %v582_v0, %v293_v9  ;;  %v308_v9 = vmul.f32 %v582_v0, %v299_v17  ;;  %v195_v16 = vmul.f32 %v582_v0, %v183_v14 }
  0x85   : > { %v207_v14 = vadd.f32 %v589_v1, %v195_v16 }
  0x86   : > { %v228_v24 = vpop.permute.xlu0 %227 }
  0x87   : > { %v238_v29 = vadd.f32 %v228_v24, %v226_v18  ;;  %v338_v30 = vadd.f32 %v329_v19, %v228_v24  ;;  %v234_v31 = vadd.f32 %v228_v24, %v222_v20  ;;  %v235_v32 = vadd.f32 %v228_v24, %v223_v21  ;;  %v702_v20 = vld [vmem:[%s599_s22 + $0x3c] sm:$0xf] }
  0x88   : > { %v230_v33 = vadd.f32 %v228_v24, %v218_v25  ;;  %v231_v34 = vadd.f32 %v228_v24, %v219_v26  ;;  %v343_v46 = vadd.f32 %v334_v40, %v228_v24  ;;  %v344_v47 = vadd.f32 %v335_v41, %v228_v24 }
  0x89   : > { %v515_v37 = vpack.i.bf16 %v338_v30, %v238_v29  ;;  %v505_v38 = vpack.i.bf16 %v235_v32, %v234_v31  ;;  %v236_v48 = vadd.f32 %v228_v24, %v224_v42  ;;  %v237_v49 = vadd.f32 %v228_v24, %v225_v43 }
  0x8a   : > { %v495_v39 = vpack.i.bf16 %v231_v34, %v230_v33  ;;  %v232_v51 = vadd.f32 %v228_v24, %v220_v44  ;;  %v233_v52 = vadd.f32 %v228_v24, %v221_v45  ;;  %v530_v57 = vpack.i.bf16 %v344_v47, %v343_v46 }
  0x8b   : > { %516 = vrot.lane.b32.xlu0 %v515_v37, %s550_s16  ;;  %506 = vrot.lane.b32.xlu2 %v505_v38, %s550_s16  ;;  %v510_v58 = vpack.i.bf16 %v237_v49, %v236_v48  ;;  %v341_v18 = vadd.f32 %v332_v60, %v228_v24  ;;  %v342_v19 = vadd.f32 %v333_v61, %v228_v24  ;;  %v300_v26 = vunpack.c.l.bf16 %v702_v20 }
  0x8c   : > { %496 = vrot.lane.b32.xlu1 %v495_v39, %s550_s16  ;;  %v500_v59 = vpack.i.bf16 %v233_v52, %v232_v51  ;;  %v339_v21 = vadd.f32 %v330_v62, %v228_v24  ;;  %v340_v25 = vadd.f32 %v331_v63, %v228_v24  ;;  %v301_v29 = vunpack.c.h.bf16 %v602_v2 }
  0x8d   : > { %v525_v30 = vpack.i.bf16 %v342_v19, %v341_v18  ;;  %v336_v32 = vmul.f32 %v300_v26, %v604_v3  ;;  %v198_v40 = vmul.f32 %v582_v0, %v186_v10  ;;  %v306_v44 = vmul.f32 %v582_v0, %v297_v54 }
  0x8e   : > { %v520_v31 = vpack.i.bf16 %v340_v25, %v339_v21  ;;  %v337_v33 = vmul.f32 %v301_v29, %v604_v3  ;;  %v194_v48 = vmul.f32 %v582_v0, %v182_v13  ;;  %v200_v49 = vmul.f32 %v582_v0, %v188_v27 }
  0x8f   : > { %v345_v34 = vadd.f32 %v336_v32, %v228_v24  ;;  %v210_v43 = vadd.f32 %v589_v1, %v198_v40  ;;  %v315_v3 = vadd.f32 %v589_v1, %v306_v44  ;;  %v311_v60 = vadd.f32 %v589_v1, %v302_v11 }
  0x90   : > { %v346_v37 = vadd.f32 %v337_v33, %v228_v24  ;;  %v206_v54 = vadd.f32 %v589_v1, %v194_v48  ;;  %v316_v62 = vadd.f32 %v589_v1, %v307_v15  ;;  %v196_v18 = vmul.f32 %v582_v0, %v184_v35 }
  0x91   : > { %v197_v19 = vmul.f32 %v582_v0, %v185_v36  ;;  %v317_v21 = vadd.f32 %v589_v1, %v308_v9  ;;  %v303_v35 = vmul.f32 %v582_v0, %v294_v55  ;;  %v309_v15 = vmul.f32 %v582_v0, %v300_v26 }
  0x92   : > { %v535_v38 = vpack.i.bf16 %v346_v37, %v345_v34  ;;  %v208_v36 = vadd.f32 %v589_v1, %v196_v18  ;;  %v304_v37 = vmul.f32 %v582_v0, %v295_v56 }
  0x93   : > { %531 = vrot.lane.b32.xlu0 %v530_v57, %s550_s16  ;;  %511 = vrot.lane.b32.xlu2 %v510_v58, %s550_s16  ;;  %v212_v57 = vadd.f32 %v589_v1, %v200_v49  ;;  %v209_v34 = vadd.f32 %v589_v1, %v197_v19  ;;  %v312_v48 = vadd.f32 %v589_v1, %v303_v35 }
  0x94   : > { %501 = vrot.lane.b32.xlu1 %v500_v59, %s550_s16 }
  0x9b   : > { %526 = vrot.lane.b32.xlu2 %v525_v30, %s550_s16 }
  0x9c   : > { %521 = vrot.lane.b32.xlu1 %v520_v31, %s550_s16 }
  0xa4   : > { %536 = vrot.lane.b32.xlu1 %v535_v38, %s550_s16 }
  0xe5   : > { %v507_v39 = vpop.permute.xlu2 %506 }
  0xe6   : > { %v508_v42 = vunpack.i.l.bf16 %v507_v39  ;;  %v509_v52 = vunpack.i.h.bf16 %v507_v39 }
  0xe8   : > { %v279_v45 = vmax.f32 %v210_v43, %v508_v42  ;;  %v280_v61 = vmax.f32 %v211_v7, %v509_v52  ;;  %v214_v52 = vadd.f32 %v589_v1, %v202_v22 }
  0xea   : > { %v324_v47 = vmax.f32 %v279_v45, %v315_v3  ;;  %v325_v31 = vmax.f32 %v280_v61, %v316_v62  ;;  %v201_v3 = vmul.f32 %v582_v0, %v189_v28  ;;  %v313_v28 = vadd.f32 %v589_v1, %v304_v37 }
  0xec   : > { %v213_v8 = vadd.f32 %v589_v1, %v201_v3 }
  0xed   : > { %v718_v41 = vpop.permute.xlu2 %511 }
  0xee   : > { %v513_v58 = vunpack.i.l.bf16 %v718_v41 }
  0xf0   : > { %v281_v17 = vmax.f32 %v212_v57, %v513_v58 }
  0xf2   : > { %v326_v39 = vmax.f32 %v281_v17, %v317_v21 }
  0xf5   : > { %v723_v46 = vpop.permute.xlu2 %526 }
  0xf6   : > { %v529_v24 = vunpack.i.h.bf16 %v723_v46  ;;  %v528_v49 = vunpack.i.l.bf16 %v723_v46  ;;  %v514_v46 = vunpack.i.h.bf16 %v718_v41 }
  0xf8   : > { %v387_v10 = vmax.f32 %v324_v47, %v529_v24  ;;  %v282_v62 = vmax.f32 %v213_v8, %v514_v46 }
  0xfa   : > { %v396_v51 = vmax.f32 %v387_v10, 0.0 }
  0xfc   : > { %v405_v13 = vpack.c.bf16 %v396_v51, %v396_v51 }
  0xfd   : > { %v748_v27 = vpop.permute.xlu0 %516 }
  0xfe   : > { %415 = vst.msk [vmem:[%s739_s26 + $0x10] sm:$0xf] %vm410_vm0, %v405_v13  ;;  %v497_v59 = vpop.permute.xlu1 %496  ;;  %v519_v25 = vunpack.i.h.bf16 %v748_v27 }
  0xff   : > { %v498_v6 = vunpack.i.l.bf16 %v497_v59  ;;  %v499_v23 = vunpack.i.h.bf16 %v497_v59  ;;  %v310_v59 = vmul.f32 %v582_v0, %v301_v29 }
 0x101   : > { %v275_v63 = vmax.f32 %v206_v54, %v498_v6  ;;  %v276_v47 = vmax.f32 %v207_v14, %v499_v23  ;;  %v518_v54 = vunpack.i.l.bf16 %v748_v27  ;;  %v318_v27 = vadd.f32 %v589_v1, %v309_v15 }
 0x102   : > { %v319_v16 = vadd.f32 %v589_v1, %v310_v59 }
 0x103   : > { %v320_v30 = vmax.f32 %v275_v63, %v311_v60  ;;  %v321_v58 = vmax.f32 %v276_v47, %v312_v48  ;;  %v283_v63 = vmax.f32 %v214_v52, %v518_v54  ;;  %v327_v17 = vmax.f32 %v282_v62, %v318_v27 }
 0x105   : > { %v383_v32 = vmax.f32 %v320_v30, %v519_v25  ;;  %v532_v33 = vpop.permute.xlu0 %531  ;;  %v328_v21 = vmax.f32 %v283_v63, %v319_v16 }
 0x106   : > { %v534_v38 = vunpack.i.h.bf16 %v532_v33  ;;  %v533_v53 = vunpack.i.l.bf16 %v532_v33  ;;  %v502_v40 = vpop.permute.xlu1 %501 }
 0x107   : > { %v392_v42 = vmax.f32 %v383_v32, 0.0  ;;  %v504_v55 = vunpack.i.h.bf16 %v502_v40  ;;  %v503_v43 = vunpack.i.l.bf16 %v502_v40 }
 0x108   : > { %v388_v44 = vmax.f32 %v325_v31, %v533_v53  ;;  %v389_v45 = vmax.f32 %v326_v39, %v534_v38 }
 0x109   : > { %v401_v56 = vpack.c.bf16 %v392_v42, %v392_v42  ;;  %v278_v24 = vmax.f32 %v209_v34, %v504_v55  ;;  %v277_v51 = vmax.f32 %v208_v36, %v503_v43 }
 0x10a   : > { %v397_v5 = vmax.f32 %v388_v44, 0.0  ;;  %v398_v10 = vmax.f32 %v389_v45, 0.0 }
 0x10b   : > { %411 = vst.msk [vmem:[%s739_s26] sm:$0xf] %vm410_vm0, %v401_v56  ;;  %v323_v12 = vmax.f32 %v278_v24, %v314_v50  ;;  %v322_v26 = vmax.f32 %v277_v51, %v313_v28 }
 0x10c   : > { %v406_v11 = vpack.c.bf16 %v397_v5, %v397_v5  ;;  %v407_v7 = vpack.c.bf16 %v398_v10, %v398_v10 }
 0x10d   : > { %v386_v13 = vmax.f32 %v323_v12, %v528_v49 }
 0x10e   : > { %416 = vst.msk [vmem:[%s739_s26 + $0x14] sm:$0xf] %vm410_vm0, %v406_v11  ;;  %v522_v57 = vpop.permute.xlu1 %521 }
 0x10f   : > { %417 = vst.msk [vmem:[%s739_s26 + $0x18] sm:$0xf] %vm410_vm0, %v407_v7  ;;  %v395_v9 = vmax.f32 %v386_v13, 0.0  ;;  %v524_v60 = vunpack.i.h.bf16 %v522_v57  ;;  %v523_v20 = vunpack.i.l.bf16 %v522_v57 }
 0x111   : > { %v404_v6 = vpack.c.bf16 %v395_v9, %v395_v9  ;;  %v384_v41 = vmax.f32 %v321_v58, %v523_v20  ;;  %v385_v61 = vmax.f32 %v322_v26, %v524_v60 }
 0x113   : > { %414 = vst.msk [vmem:[%s739_s26 + $0xc] sm:$0xf] %vm410_vm0, %v404_v6  ;;  %v393_v0 = vmax.f32 %v384_v41, 0.0  ;;  %v394_v2 = vmax.f32 %v385_v61, 0.0 }
 0x115   : > { %v402_v29 = vpack.c.bf16 %v393_v0, %v393_v0  ;;  %v403_v18 = vpack.c.bf16 %v394_v2, %v394_v2 }
 0x116   : > { %v537_v19 = vpop.permute.xlu1 %536 }
 0x117   : > { %412 = vst.msk [vmem:[%s739_s26 + $0x4] sm:$0xf] %vm410_vm0, %v402_v29  ;;  %v539_v25 = vunpack.i.h.bf16 %v537_v19  ;;  %v538_v30 = vunpack.i.l.bf16 %v537_v19 }
 0x118   : > { %413 = vst.msk [vmem:[%s739_s26 + $0x8] sm:$0xf] %vm410_vm0, %v403_v18 }
 0x119   : > { %v391_v1 = vmax.f32 %v328_v21, %v539_v25  ;;  %v390_v4 = vmax.f32 %v327_v17, %v538_v30 }
 0x11b   : > { %v400_v14 = vmax.f32 %v391_v1, 0.0  ;;  %v399_v31 = vmax.f32 %v390_v4, 0.0 }
 0x11d   : > { %v409_v35 = vpack.c.bf16 %v400_v14, %v400_v14  ;;  %v408_v32 = vpack.c.bf16 %v399_v31, %v399_v31 }
 0x11f   : > { %419 = vst.msk [vmem:[%s739_s26 + $0x20] sm:$0xf] %vm410_vm0, %v409_v35 }
 0x120   : > { %418 = vst.msk [vmem:[%s739_s26 + $0x1c] sm:$0xf] %vm410_vm0, %v408_v32 }
 0x121 PF: > { %s13_s12 = sadd.s32 1, %s548_s12  }
 0x122   : > { %p10_p4 = scmp.ge.s32.totalorder %s13_s12, 4  }
 0x124   :  { %12 = sbr.rel (!%p10_p4) target bundleno = 1 (0x1), region = 62 }

// kernel: convnet_forward.8
= control target key start
LH: loop header
LB: loop body
LE: loop exit
PB: predicated region body
PF: predicated region fallthrough
CT: control target
= control target key end

     0   :  { %s787_s15 = smov 0   ;;  %s943_s0 = inlined_call_operand.vmem [shape: bf16[2,72,64], index: 0, kind: input, shape index: {}]   ;;  %s944_s1 = inlined_call_operand.vmem [shape: bf16[64,256], index: 1, kind: input, shape index: {}]   ;;  %s945_s2 = inlined_call_operand.vmem [shape: f32[72,1], index: 2, kind: input, shape index: {}]   ;;  %s946_s3 = inlined_call_operand.vmem [shape: bf16[2,72,256], index: 3, kind: output, shape index: {0}]   ;;  %s947_s4 = inlined_call_operand.vmem [shape: f32[2,2,256], index: 4, kind: output, shape index: {1}]  }
   0x1 LB: > { %s648_s16 = sadd.s32 4294967295, %s759_s15   ;;  %p652_p0 = scmp.ge.s32.totalorder %s759_s15, 1  ;;  %s759_s15 = sphi %s787_s15, %s15_s15  }
   0x2   : > { %p165_p1 = scmp.lt.s32.totalorder %s759_s15, 3 }
   0x4   : > { %p166_p2 = pnand %p652_p0, %p165_p1 }
   0x5   : > { %p196_p3 = scmp.lt.s32.totalorder (!%p166_p2), %s648_s16, 1 }
   0x6   : > { %169 = sbr.rel (%p166_p2) target bundleno = 224 (0xe0), region = 32 }
   0xb   : > { %v699_v0 = vld [vmem:[%s944_s1 + $0x30] sm:$0xf]  ;;  %v730_v1 = vld [vmem:[%s944_s1 + $0x34] sm:$0xf0]  ;;  %v729_v2 = vld [vmem:[%s944_s1 + $0x34] sm:$0xf] }
   0xc   : > { %v700_v3 = vor.u32 %v730_v1, %v699_v0  ;;  %v701_v4 = vld [vmem:[%s944_s1 + $0x38] sm:$0xf0]  ;;  %v691_v5 = vld [vmem:[%s944_s1 + $0x20] sm:$0xf]  ;;  %v728_v6 = vld [vmem:[%s944_s1 + $0x24] sm:$0xf0] }
   0xd   : > { %v704_v7 = vor.u32 %v729_v2, %v701_v4  ;;  %v727_v8 = vld [vmem:[%s944_s1 + $0x24] sm:$0xf]  ;;  %v693_v9 = vld [vmem:[%s944_s1 + $0x28] sm:$0xf0]  ;;  %v692_v10 = vor.u32 %v728_v6, %v691_v5  ;;  %v683_v12 = vld [vmem:[%s944_s1 + $0x10] sm:$0xf] }
   0xe   : > { %321 = vmatpush.bf16.msra.mxu0 %v700_v3  ;;  %731 = vmatpush.bf16.msra.mxu2 %v700_v3  ;;  %v696_v11 = vor.u32 %v727_v8, %v693_v9  ;;  %v726_v13 = vld [vmem:[%s944_s1 + $0x14] sm:$0xf0]  ;;  %v725_v14 = vld [vmem:[%s944_s1 + $0x14] sm:$0xf]  ;;  %v685_v15 = vld [vmem:[%s944_s1 + $0x18] sm:$0xf0] }
   0xf   : > { %354 = vmatpush.bf16.msra.mxu1 %v704_v7  ;;  %735 = vmatpush.bf16.msra.mxu3 %v704_v7  ;;  %v761_v16 = vmov 0   ;;  %v212_v17 = vld [vmem:[%s945_s2] sm:$0xff]  ;;  %v214_v18 = vld [vmem:[%s945_s2 + $0x10] sm:$0xff]  ;;  %v684_v19 = vor.u32 %v726_v13, %v683_v12  ;;  %s949_s16 = smov (!%p196_p3, %s648_s16), 1  ;;  %v688_v20 = vor.u32 %v725_v14, %v685_v15  ;;  %v724_v22 = vld [vmem:[%s944_s1 + $0x4] sm:$0xf0] }
  0x10   : > { %750 = vset.pattern.permute.xlu0 %v761_v16  ;;  %751 = vset.pattern.permute.xlu1 %v761_v16  ;;  %v675_v21 = vld [vmem:[%s944_s1] sm:$0xf]  ;;  %v723_v23 = vld [vmem:[%s944_s1 + $0x4] sm:$0xf]  ;;  %v677_v24 = vld [vmem:[%s944_s1 + $0x8] sm:$0xf0] }
  0x11   : > { %s739_s29 = smul.u32 36, %s949_s16  ;;  %403 = vperm.xlu0 %750, %v212_v17   ;;  %413 = vperm.xlu1 %751, %v214_v18   ;;  %v676_v25 = vor.u32 %v724_v22, %v675_v21  ;;  %v680_v26 = vor.u32 %v723_v23, %v677_v24  ;;  %v213_v27 = vld [vmem:[%s945_s2 + $0x8] sm:$0xff]  ;;  %v215_v30 = vld [vmem:[%s945_s2 + $0x18] sm:$0xff]  ;;  %vm301_vm0 = vcmask 523264   ;;  %v216_v31 = vld [vmem:[%s945_s2 + $0x20] sm:$0xff]  ;;  %s718_s27 = sshll.u32 %s949_s16, 2 }
  0x12   : > { %322 = vmatpush.bf16.msra.mxu0 %v692_v10  ;;  %732 = vmatpush.bf16.msra.mxu2 %v692_v10  ;;  %v218_v32 = vld [vmem:[%s945_s2 + $0x30] sm:$0xff]  ;;  %v219_v33 = vld [vmem:[%s945_s2 + $0x38] sm:$0xff]  ;;  %v217_v35 = vld [vmem:[%s945_s2 + $0x28] sm:$0xff]  ;;  %s740_s23 = smul.u32 72, %s949_s16  ;;  %vm545_vm1 = vcmask 1040384   ;;  %s210_s30 = scalar_lea.vmem %s947_s4, %s718_s27 }
  0x13   : > { %355 = vmatpush.bf16.msra.mxu1 %v696_v11  ;;  %736 = vmatpush.bf16.msra.mxu3 %v696_v11  ;;  %s859_s6 = scalar_lea.vmem %s943_s0, %s739_s29  ;;  %v220_v39 = vld [vmem:[%s945_s2 + $0x40] sm:$0xff] }
  0x14   : > { %752 = vset.pattern.permute.xlu2 %v761_v16  ;;  %v719_v28 = vld [vmem:[%s859_s6] sm:$0xff]  ;;  %v722_v29 = vld [vmem:[%s859_s6 + $0x18] sm:$0xff]  ;;  %v720_v37 = vld [vmem:[%s859_s6 + $0x8] sm:$0xff]  ;;  %s901_s26 = scalar_lea.vmem %s946_s3, %s740_s23 }
  0x15   : > { %423 = vperm.xlu2 %752, %v216_v31   ;;  %v229_v34 = vld [vmem:[%s859_s6 + $0x20] sm:$0xf]  ;;  %v721_v40 = vld [vmem:[%s859_s6 + $0x10] sm:$0xff] }
  0x16   : > { %323 = vmatpush.bf16.msra.mxu0 %v684_v19  ;;  %733 = vmatpush.bf16.msra.mxu2 %v684_v19  ;;  %v255_v36 = vunpack.c.l.b16 %v229_v34 }
  0x17   : > { %356 = vmatpush.bf16.msra.mxu1 %v688_v20  ;;  %737 = vmatpush.bf16.msra.mxu3 %v688_v20 }
  0x18   : > { %v260_v38 = vpack.c.b16 %v255_v36, %v255_v36 }
  0x19   : > { %408 = vperm.xlu0 %750, %v213_v27   ;;  %418 = vperm.xlu1 %751, %v215_v30  }
  0x1a   : > { %324 = vmatpush.bf16.msra.mxu0 %v676_v25  ;;  %734 = vmatpush.bf16.msra.mxu2 %v676_v25 }
  0x1b   : > { %357 = vmatpush.bf16.msra.mxu1 %v680_v26  ;;  %738 = vmatpush.bf16.msra.mxu3 %v680_v26 }
  0x1d   : > { %705 = vmatmul.msk.bf16.vlgmr.msra.gmra.mxu0 %vm301_vm0, %v719_v28  ;;  %708 = vmatmul.msk.bf16.vlgmr.msra.gmra.mxu2 %vm301_vm0, %v722_v29 }
  0x1e   : > { %710 = vmatmul.msk.bf16.vlgmr.msra.gmra.mxu1 %vm301_vm0, %v719_v28  ;;  %713 = vmatmul.msk.bf16.vlgmr.msra.gmra.mxu3 %vm301_vm0, %v722_v29 }
  0x1f   : > { %428 = vperm.xlu2 %752, %v217_v35  }
  0x21   : > { %433 = vperm.xlu0 %750, %v218_v32   ;;  %438 = vperm.xlu1 %751, %v219_v33  }
  0x27   : > { %443 = vperm.xlu2 %752, %v220_v39  }
  0x2d   : > { %706 = vmatmul.msk.bf16.gmra.mxu0 %vm301_vm0, %v720_v37  ;;  %709 = vmatmul.msk.bf16.gmra.mxu2 %vm301_vm0, %v260_v38 }
  0x2e   : > { %711 = vmatmul.msk.bf16.gmra.mxu1 %vm301_vm0, %v720_v37  ;;  %714 = vmatmul.msk.bf16.gmra.mxu3 %vm301_vm0, %v260_v38 }
  0x3d   : > { %707 = vmatmul.msk.bf16.gmra.mxu0 %vm301_vm0, %v721_v40 }
  0x3e   : > { %712 = vmatmul.msk.bf16.gmra.mxu1 %vm301_vm0, %v721_v40 }
  0x6f   : > { %v424_v58 = vpop.permute.xlu2 %423 }
  0x79   : > { %v429_v11 = vpop.permute.xlu2 %428 }
  0x83   : > { %v404_v52 = vpop.permute.xlu0 %403  ;;  %v414_v57 = vpop.permute.xlu1 %413 }
  0x8b   : > { %v409_v0 = vpop.permute.xlu0 %408  ;;  %v419_v4 = vpop.permute.xlu1 %418 }
  0x93   : > { %v434_v29 = vpop.permute.xlu0 %433  ;;  %v439_v40 = vpop.permute.xlu1 %438 }
  0x9a   : > { %v326_v41 = vpop.f32.mrf.mxu0 }
  0x9b   : > { %v359_v42 = vpop.f32.mrf.mxu1  ;;  %v446_v6 = vmul.f32 %v404_v52, %v326_v41 }
  0x9c   : > { %v383_v43 = vpack.c.bf16 %v359_v42, %v326_v41  ;;  %v447_v9 = vmul.f32 %v404_v52, %v359_v42 }
  0x9d   : > { %v494_v19 = vmul.f32 %v446_v6, %v446_v6 }
  0x9e   : > { %392 = vst [vmem:[%s901_s26] sm:$0xff] %v383_v43  ;;  %v495_v23 = vmul.f32 %v447_v9, %v447_v9 }
  0xa0   : > { %v904_v44 = vpop.f32.mrf.mxu2 }
  0xa1   : > { %v906_v45 = vpop.f32.mrf.mxu3  ;;  %v458_v38 = vmul.f32 %v434_v29, %v904_v44 }
  0xa2   : > { %v328_v46 = vpop.f32.mrf.mxu0  ;;  %v389_v47 = vpack.c.bf16 %v906_v45, %v904_v44  ;;  %v459_v43 = vmul.f32 %v434_v29, %v906_v45 }
  0xa3   : > { %v361_v48 = vpop.f32.mrf.mxu1  ;;  %v448_v2 = vmul.f32 %v409_v0, %v328_v46 }
  0xa4   : > { %v384_v49 = vpack.c.bf16 %v361_v48, %v328_v46  ;;  %398 = vst [vmem:[%s901_s26 + $0x30] sm:$0xff] %v389_v47  ;;  %v449_v3 = vmul.f32 %v409_v0, %v361_v48 }
  0xa5   : > { %v496_v13 = vmul.f32 %v448_v2, %v448_v2  ;;  %v464_v20 = vadd.f32 %v448_v2, %v446_v6 }
  0xa6   : > { %393 = vst [vmem:[%s901_s26 + $0x8] sm:$0xff] %v384_v49  ;;  %v497_v16 = vmul.f32 %v449_v3, %v449_v3  ;;  %v478_v24 = vadd.f32 %v449_v3, %v447_v9 }
  0xa7   : > { %v512_v27 = vadd.f32 %v496_v13, %v494_v19 }
  0xa8   : > { %v912_v50 = vpop.f32.mrf.mxu2  ;;  %v526_v31 = vadd.f32 %v497_v16, %v495_v23 }
  0xa9   : > { %v914_v51 = vpop.f32.mrf.mxu3 }
  0xaa   : > { %v331_v53 = vpop.f32.mrf.mxu0  ;;  %v390_v54 = vpack.c.bf16 %v914_v51, %v912_v50 }
  0xab   : > { %v364_v55 = vpop.f32.mrf.mxu1  ;;  %v450_v7 = vmul.f32 %v414_v57, %v331_v53 }
  0xac   : > { %v385_v56 = vpack.c.bf16 %v364_v55, %v331_v53  ;;  %399 = vst [vmem:[%s901_s26 + $0x38] sm:$0xff] %v390_v54  ;;  %v451_v10 = vmul.f32 %v414_v57, %v364_v55  ;;  %v444_v53 = vpop.permute.xlu2 %443  ;;  %v460_v57 = vmul.f32 %v439_v40, %v912_v50 }
  0xad   : > { %v498_v21 = vmul.f32 %v450_v7, %v450_v7  ;;  %v465_v28 = vadd.f32 %v464_v20, %v450_v7 }
  0xae   : > { %394 = vst [vmem:[%s901_s26 + $0x10] sm:$0xff] %v385_v56  ;;  %v499_v25 = vmul.f32 %v451_v10, %v451_v10  ;;  %v479_v32 = vadd.f32 %v478_v24, %v451_v10  ;;  %v508_v50 = vmul.f32 %v460_v57, %v460_v57 }
  0xaf   : > { %v513_v34 = vadd.f32 %v512_v27, %v498_v21 }
  0xb0   : > { %v920_v59 = vpop.f32.mrf.mxu2  ;;  %v527_v37 = vadd.f32 %v526_v31, %v499_v25 }
  0xb1   : > { %v922_v60 = vpop.f32.mrf.mxu3  ;;  %v462_v2 = vmul.f32 %v444_v53, %v920_v59 }
  0xb2   : > { %v333_v61 = vpop.f32.mrf.mxu0  ;;  %v391_v62 = vpack.c.bf16 %v922_v60, %v920_v59  ;;  %v463_v6 = vmul.f32 %v444_v53, %v922_v60 }
  0xb3   : > { %v366_v63 = vpop.f32.mrf.mxu1  ;;  %v452_v14 = vmul.f32 %v419_v4, %v333_v61  ;;  %v510_v13 = vmul.f32 %v462_v2, %v462_v2 }
  0xb4   : > { %v386_v1 = vpack.c.bf16 %v366_v63, %v333_v61  ;;  %400 = vst [vmem:[%s901_s26 + $0x40] sm:$0xff] %v391_v62  ;;  %v453_v17 = vmul.f32 %v419_v4, %v366_v63  ;;  %v461_v62 = vmul.f32 %v439_v40, %v914_v51  ;;  %v511_v16 = vmul.f32 %v463_v6, %v463_v6 }
  0xb5   : > { %v500_v30 = vmul.f32 %v452_v14, %v452_v14  ;;  %v466_v35 = vadd.f32 %v465_v28, %v452_v14 }
  0xb6   : > { %395 = vst [vmem:[%s901_s26 + $0x18] sm:$0xff] %v386_v1  ;;  %v501_v33 = vmul.f32 %v453_v17, %v453_v17  ;;  %v480_v39 = vadd.f32 %v479_v32, %v453_v17  ;;  %v506_v1 = vmul.f32 %v458_v38, %v458_v38 }
  0xb7   : > { %v514_v46 = vadd.f32 %v513_v34, %v500_v30 }
  0xb8   : > { %v348_v5 = vpop.f32.mrf.mxu2  ;;  %v528_v52 = vadd.f32 %v527_v37, %v501_v33  ;;  %v548_v37 = vlaneseq }
  0xb9   : > { %v381_v8 = vpop.f32.mrf.mxu3  ;;  %v507_v5 = vmul.f32 %v459_v43, %v459_v43 }
  0xba   : > { %v336_v12 = vpop.f32.mrf.mxu0  ;;  %vm550_vm2 = vcmp.lt.s32.totalorder %v548_v37, 256 }
  0xbb   : > { %v369_v15 = vpop.f32.mrf.mxu1  ;;  %v454_v22 = vmul.f32 %v424_v58, %v336_v12 }
  0xbc   : > { %v387_v18 = vpack.c.bf16 %v369_v15, %v336_v12  ;;  %v455_v26 = vmul.f32 %v424_v58, %v369_v15 }
  0xbd   : > { %v502_v36 = vmul.f32 %v454_v22, %v454_v22  ;;  %v467_v47 = vadd.f32 %v466_v35, %v454_v22 }
  0xbe   : > { %396 = vst [vmem:[%s901_s26 + $0x20] sm:$0xff] %v387_v18  ;;  %v503_v41 = vmul.f32 %v455_v26, %v455_v26  ;;  %v481_v54 = vadd.f32 %v480_v39, %v455_v26 }
  0xbf   : > { %v515_v58 = vadd.f32 %v514_v46, %v502_v36 }
  0xc0   : > { %v529_v63 = vadd.f32 %v528_v52, %v503_v41 }
  0xc2   : > { %v338_v42 = vpop.f32.mrf.mxu0 }
  0xc3   : > { %v456_v48 = vmul.f32 %v429_v11, %v338_v42  ;;  %v371_v49 = vpop.f32.mrf.mxu1 }
  0xc4   : > { %v388_v55 = vpack.c.bf16 %v371_v49, %v338_v42  ;;  %v457_v56 = vmul.f32 %v429_v11, %v371_v49  ;;  %v509_v11 = vmul.f32 %v461_v62, %v461_v62 }
  0xc5   : > { %v468_v44 = vadd.f32 %v467_v47, %v456_v48  ;;  %v504_v61 = vmul.f32 %v456_v48, %v456_v48 }
  0xc6   : > { %397 = vst [vmem:[%s901_s26 + $0x28] sm:$0xff] %v388_v55  ;;  %v482_v45 = vadd.f32 %v481_v54, %v457_v56  ;;  %v505_v0 = vmul.f32 %v457_v56, %v457_v56 }
  0xc7   : > { %v469_v3 = vadd.f32 %v468_v44, %v458_v38  ;;  %v516_v4 = vadd.f32 %v515_v58, %v504_v61 }
  0xc8   : > { %v483_v7 = vadd.f32 %v482_v45, %v459_v43  ;;  %v530_v8 = vadd.f32 %v529_v63, %v505_v0 }
  0xc9   : > { %v470_v9 = vadd.f32 %v469_v3, %v460_v57  ;;  %v517_v10 = vadd.f32 %v516_v4, %v506_v1 }
  0xca   : > { %v484_v12 = vadd.f32 %v483_v7, %v461_v62  ;;  %v531_v51 = vadd.f32 %v530_v8, %v507_v5 }
  0xcb   : > { %v471_v14 = vadd.f32 %v470_v9, %v462_v2  ;;  %v518_v15 = vadd.f32 %v517_v10, %v508_v50 }
  0xcc   : > { %v485_v17 = vadd.f32 %v484_v12, %v463_v6  ;;  %v532_v18 = vadd.f32 %v531_v51, %v509_v11 }
  0xcd   : > { %v472_v59 = vrot.slane %v471_v14, 4  ;;  %v519_v19 = vadd.f32 %v518_v15, %v510_v13 }
  0xce   : > { %v486_v20 = vrot.slane %v485_v17, 4  ;;  %v533_v21 = vadd.f32 %v532_v18, %v511_v16 }
  0xcf   : > { %v473_v22 = vadd.f32 %v472_v59, %v471_v14  ;;  %v520_v60 = vrot.slane %v519_v19, 4 }
  0xd0   : > { %v487_v23 = vadd.f32 %v486_v20, %v485_v17  ;;  %v534_v24 = vrot.slane %v533_v21, 4 }
  0xd1   : > { %v474_v25 = vrot.slane %v473_v22, 2  ;;  %v521_v26 = vadd.f32 %v520_v60, %v519_v19 }
  0xd2   : > { %v488_v27 = vrot.slane %v487_v23, 2  ;;  %v535_v28 = vadd.f32 %v534_v24, %v533_v21 }
  0xd3   : > { %v475_v29 = vadd.f32 %v474_v25, %v473_v22  ;;  %v522_v30 = vrot.slane %v521_v26, 2 }
  0xd4   : > { %v489_v31 = vadd.f32 %v488_v27, %v487_v23  ;;  %v536_v32 = vrot.slane %v535_v28, 2 }
  0xd5   : > { %v523_v33 = vadd.f32 %v522_v30, %v521_v26  ;;  %v476_v34 = vrot.slane %v475_v29, 1 }
  0xd6   : > { %v490_v35 = vrot.slane %v489_v31, 1  ;;  %v537_v36 = vadd.f32 %v536_v32, %v535_v28 }
  0xd7   : > { %v524_v38 = vrot.slane %v523_v33, 1  ;;  %v477_v41 = vadd.f32 %v476_v34, %v475_v29 }
  0xd8   : > { %v491_v39 = vadd.f32 %v490_v35, %v489_v31  ;;  %v538_v40 = vrot.slane %v537_v36, 1 }
  0xd9   : > { %v525_v46 = vadd.f32 %v524_v38, %v523_v33 }
  0xda   : > { %v539_v42 = vadd.f32 %v538_v40, %v537_v36  ;;  %v544_v43 = vrot.slane %v491_v39, 7 }
  0xdc   : > { %v546_v47 = vsel %vm545_vm1, %v477_v41, %v544_v43  ;;  %v555_v48 = vrot.slane %v539_v42, 7 }
  0xdd   : > { %552 = vst.msk [vmem:[%s210_s30] ss:$2 sm:$0x3] %vm550_vm2, %v546_v47 }
  0xde   : > { %v556_v49 = vsel %vm545_vm1, %v525_v46, %v555_v48 }
  0xdf   : > { %715 = vst.msk [vmem:[%s210_s30 + $0x1] ss:$2 sm:$0x3] %vm550_vm2, %v556_v49 }
  0xe0 PF: > { %s15_s15 = sadd.s32 1, %s759_s15  }
  0xe1   : > { %p12_p4 = scmp.ge.s32.totalorder %s15_s15, 4  }
  0xe3   :  { %14 = sbr.rel (!%p12_p4) target bundleno = 1 (0x1), region = 75 }

// kernel: convnet_forward.11
= control target key start
LH: loop header
LB: loop body
LE: loop exit
PB: predicated region body
PF: predicated region fallthrough
CT: control target
= control target key end

     0   :  { %s386_s12 = smov 0   ;;  %s418_s0 = inlined_call_operand.vmem [shape: bf16[2,20,256], index: 0, kind: input, shape index: {}]   ;;  %s419_s1 = inlined_call_operand.vmem [shape: f32[1,64], index: 1, kind: input, shape index: {}]   ;;  %s420_s2 = inlined_call_operand.vmem [shape: f32[1,64], index: 2, kind: input, shape index: {}]   ;;  %s421_s3 = inlined_call_operand.vmem [shape: bf16[2,20,64], index: 3, kind: output, shape index: {}]  }
   0x1 LB: > { %s320_s13 = sadd.s32 4294967295, %s363_s12   ;;  %p324_p0 = scmp.ge.s32.totalorder %s363_s12, 1  ;;  %s363_s12 = sphi %s386_s12, %s13_s12  }
   0x2   : > { %p137_p1 = scmp.lt.s32.totalorder %s363_s12, 3 }
   0x4   : > { %p138_p2 = pnand %p324_p0, %p137_p1 }
   0x5   : > { %s365_s16 = smov (!%p138_p2), 64   ;;  %p161_p3 = scmp.lt.s32.totalorder (!%p138_p2), %s320_s13, 1 }
   0x6   : > { %141 = sbr.rel (%p138_p2) target bundleno = 275 (0x113), region = 32 }
   0xb   : > { %v355_v0 = vld [vmem:[%s419_s1] ss:$0 sm:$0xff]  ;;  %s423_s13 = smov (!%p161_p3, %s320_s13), 1  ;;  %vm260_vm0 = vcmask 519168   ;;  %vm263_vm1 = vcmask 517120  }
   0xc   : > { %191 = vrot.lane.b32.xlu0 %v355_v0, %s365_s16  ;;  %v356_v1 = vld [vmem:[%s420_s2] ss:$0 sm:$0xff]  ;;  %s329_s19 = smul.u32 24, %s423_s13 }
   0xd   : > { %s330_s23 = smul.u32 12, %s423_s13 }
   0xe   : > { %s165_s22 = scalar_lea.vmem %s418_s0, %s329_s19 }
   0xf   : > { %v219_v3 = vld [vmem:[%s165_s22 + $0x8] sm:$0xff]   ;;  %v220_v4 = vld [vmem:[%s165_s22 + $0x14] sm:$0x3]  ;;  %v173_v5 = vld [vmem:[%s165_s22] sm:$0xff]   ;;  %s170_s26 = scalar_lea.vmem %s421_s3, %s330_s23 }
  0x10   : > { %v222_v6 = vunpack.c.h.bf16 %v219_v3  ;;  %v223_v7 = vunpack.c.l.bf16 %v220_v4  ;;  %v176_v8 = vunpack.c.l.bf16 %v173_v5  ;;  %v177_v9 = vunpack.c.l.bf16 %v219_v3  ;;  %v175_v10 = vld [vmem:[%s165_s22 + $0x10] sm:$0x3] }
  0x11   : > { %v178_v16 = vunpack.c.l.bf16 %v175_v10  ;;  %v221_v17 = vunpack.c.h.bf16 %v173_v5 }
  0x12   : > { %v183_v29 = vmul.f32 %v355_v0, %v177_v9  ;;  %v225_v30 = vmul.f32 %v355_v0, %v222_v6  ;;  %v182_v31 = vmul.f32 %v355_v0, %v176_v8  ;;  %v226_v42 = vmul.f32 %v355_v0, %v223_v7 }
  0x13   : > { %v224_v38 = vmul.f32 %v355_v0, %v221_v17  ;;  %v184_v41 = vmul.f32 %v355_v0, %v178_v16 }
  0x14   : > { %197 = vrot.lane.b32.xlu0 %v356_v1, %s365_s16  ;;  %v189_v32 = vadd.f32 %v356_v1, %v183_v29  ;;  %v228_v33 = vadd.f32 %v356_v1, %v225_v30  ;;  %v188_v37 = vadd.f32 %v356_v1, %v182_v31  ;;  %v229_v49 = vadd.f32 %v356_v1, %v226_v42 }
  0x15   : > { %v227_v46 = vadd.f32 %v356_v1, %v224_v38  ;;  %v190_v48 = vadd.f32 %v356_v1, %v184_v41 }
  0x7e   : > { %v192_v2 = vpop.permute.xlu0 %191 }
  0x7f   : > { %v234_v11 = vmul.f32 %v222_v6, %v192_v2  ;;  %v235_v12 = vmul.f32 %v223_v7, %v192_v2  ;;  %v194_v13 = vmul.f32 %v192_v2, %v176_v8  ;;  %v195_v14 = vmul.f32 %v192_v2, %v177_v9 }
  0x80   : > { %v196_v24 = vmul.f32 %v192_v2, %v178_v16  ;;  %v233_v25 = vmul.f32 %v221_v17, %v192_v2 }
  0x86   : > { %v198_v15 = vpop.permute.xlu0 %197 }
  0x87   : > { %v237_v18 = vadd.f32 %v234_v11, %v198_v15  ;;  %v238_v19 = vadd.f32 %v235_v12, %v198_v15  ;;  %v200_v20 = vadd.f32 %v198_v15, %v194_v13  ;;  %v201_v21 = vadd.f32 %v198_v15, %v195_v14 }
  0x88   : > { %v202_v26 = vadd.f32 %v198_v15, %v196_v24  ;;  %v236_v27 = vadd.f32 %v233_v25, %v198_v15 }
  0x89   : > { %v350_v22 = vpack.i.bf16 %v238_v19, %v237_v18  ;;  %v340_v23 = vpack.i.bf16 %v201_v21, %v200_v20 }
  0x8a   : > { %v345_v28 = vpack.i.bf16 %v236_v27, %v202_v26 }
  0x8b   : > { %351 = vrot.lane.b32.xlu2 %v350_v22, %s365_s16  ;;  %341 = vrot.lane.b32.xlu1 %v340_v23, %s365_s16 }
  0x93   : > { %346 = vrot.lane.b32.xlu1 %v345_v28, %s365_s16 }
  0xe5   : > { %v352_v39 = vpop.permute.xlu2 %351 }
  0xe6   : > { %v353_v43 = vunpack.i.l.bf16 %v352_v39  ;;  %v354_v58 = vunpack.i.h.bf16 %v352_v39 }
  0xfd   : > { %v342_v34 = vpop.permute.xlu1 %341 }
  0xfe   : > { %v344_v35 = vunpack.i.h.bf16 %v342_v34  ;;  %v343_v36 = vunpack.i.l.bf16 %v342_v34 }
 0x100   : > { %v216_v40 = vmax.f32 %v189_v32, %v344_v35  ;;  %v215_v45 = vmax.f32 %v188_v37, %v343_v36 }
 0x102   : > { %v231_v44 = vmax.f32 %v216_v40, %v228_v33  ;;  %v230_v54 = vmax.f32 %v215_v45, %v227_v46 }
 0x104   : > { %v252_v47 = vmax.f32 %v231_v44, %v353_v43 }
 0x105   : > { %v347_v50 = vpop.permute.xlu1 %346 }
 0x106   : > { %v255_v51 = vmax.f32 %v252_v47, 0.0  ;;  %v349_v52 = vunpack.i.h.bf16 %v347_v50  ;;  %v348_v53 = vunpack.i.l.bf16 %v347_v50 }
 0x108   : > { %v258_v55 = vpack.c.bf16 %v255_v51, %v255_v51  ;;  %v217_v56 = vmax.f32 %v190_v48, %v348_v53  ;;  %v251_v57 = vmax.f32 %v230_v54, %v349_v52 }
 0x10a   : > { %v232_v59 = vmax.f32 %v217_v56, %v229_v49  ;;  %v254_v60 = vmax.f32 %v251_v57, 0.0  ;;  %262 = vst.msk [vmem:[%s170_s26 + $0x4] sm:$0xf] %vm260_vm0, %v258_v55 }
 0x10c   : > { %v253_v61 = vmax.f32 %v232_v59, %v354_v58  ;;  %v257_v62 = vpack.c.bf16 %v254_v60, %v254_v60 }
 0x10e   : > { %v256_v63 = vmax.f32 %v253_v61, 0.0  ;;  %261 = vst.msk [vmem:[%s170_s26] sm:$0xf] %vm260_vm0, %v257_v62 }
 0x110   : > { %v259_v0 = vpack.c.bf16 %v256_v63, %v256_v63 }
 0x112   : > { %264 = vst.msk [vmem:[%s170_s26 + $0x8] sm:$0x3] %vm263_vm1, %v259_v0 }
 0x113 PF: > { %s13_s12 = sadd.s32 1, %s363_s12  }
 0x114   : > { %p10_p4 = scmp.ge.s32.totalorder %s13_s12, 4  }
 0x116   :  { %12 = sbr.rel (!%p10_p4) target bundleno = 1 (0x1), region = 62 }

// kernel: convnet_forward.10
= control target key start
LH: loop header
LB: loop body
LE: loop exit
PB: predicated region body
PF: predicated region fallthrough
CT: control target
= control target key end

     0   :  { %s2393_s15 = smov 0   ;;  %s3440_s0 = inlined_call_operand.vmem [shape: bf16[2,32,256], index: 0, kind: input, shape index: {}]   ;;  %s3441_s1 = inlined_call_operand.vmem [shape: bf16[1024,256], index: 1, kind: input, shape index: {}]   ;;  %s3442_s2 = inlined_call_operand.vmem [shape: f32[20,1], index: 2, kind: input, shape index: {}]   ;;  %s3443_s3 = inlined_call_operand.vmem [shape: bf16[2,20,256], index: 3, kind: output, shape index: {0}]   ;;  %s3444_s4 = inlined_call_operand.vmem [shape: f32[2,2,256], index: 4, kind: output, shape index: {1}]  }
   0x1 LB: > { %s1651_s16 = sadd.s32 4294967295, %s2365_s15   ;;  %p1655_p0 = scmp.ge.s32.totalorder %s2365_s15, 1  ;;  %s2365_s15 = sphi %s2393_s15, %s15_s15  }
   0x2   : > { %p165_p1 = scmp.lt.s32.totalorder %s2365_s15, 3 }
   0x4   : > { %p166_p2 = pnand %p1655_p0, %p165_p1 }
   0x5   : > { %p196_p3 = scmp.lt.s32.totalorder (!%p166_p2), %s1651_s16, 1 }
   0x6   : > { %169 = sbr.rel (%p166_p2) target bundleno = 329 (0x149), region = 32 }
   0xb   : > { %v1752_v0 = vld [vmem:[%s3441_s1 + $0x70] sm:$0xf]  ;;  %v2234_v1 = vld [vmem:[%s3441_s1 + $0x74] sm:$0xf0]  ;;  %v1744_v11 = vld [vmem:[%s3441_s1 + $0x60] sm:$0xf] }
   0xc   : > { %v1816_v2 = vld [vmem:[%s3441_s1 + $0xf0] sm:$0xf]  ;;  %v1753_v3 = vor.u32 %v2234_v1, %v1752_v0  ;;  %v2250_v4 = vld [vmem:[%s3441_s1 + $0xf4] sm:$0xf0]  ;;  %v2232_v13 = vld [vmem:[%s3441_s1 + $0x64] sm:$0xf0] }
   0xd   : > { %v1880_v5 = vld [vmem:[%s3441_s1 + $0x170] sm:$0xf]  ;;  %v2266_v6 = vld [vmem:[%s3441_s1 + $0x174] sm:$0xf0]  ;;  %v1817_v7 = vor.u32 %v2250_v4, %v1816_v2  ;;  %v1808_v14 = vld [vmem:[%s3441_s1 + $0xe0] sm:$0xf]  ;;  %v1745_v16 = vor.u32 %v2232_v13, %v1744_v11 }
   0xe   : > { %v1881_v8 = vor.u32 %v2266_v6, %v1880_v5  ;;  %v1944_v9 = vld [vmem:[%s3441_s1 + $0x1f0] sm:$0xf]  ;;  %v2282_v10 = vld [vmem:[%s3441_s1 + $0x1f4] sm:$0xf0]  ;;  %1183 = vmatpush.bf16.msra.mxu0 %v1753_v3  ;;  %v2248_v15 = vld [vmem:[%s3441_s1 + $0xe4] sm:$0xf0] }
   0xf   : > { %v1945_v12 = vor.u32 %v2282_v10, %v1944_v9  ;;  %1201 = vmatpush.bf16.msra.mxu1 %v1817_v7  ;;  %v1809_v17 = vor.u32 %v2248_v15, %v1808_v14  ;;  %v1872_v18 = vld [vmem:[%s3441_s1 + $0x160] sm:$0xf]  ;;  %v2264_v19 = vld [vmem:[%s3441_s1 + $0x164] sm:$0xf0]  ;;  %v1736_v23 = vld [vmem:[%s3441_s1 + $0x50] sm:$0xf] }
  0x10   : > { %1219 = vmatpush.bf16.msra.mxu2 %v1881_v8  ;;  %v1936_v20 = vld [vmem:[%s3441_s1 + $0x1e0] sm:$0xf]  ;;  %v1873_v21 = vor.u32 %v2264_v19, %v1872_v18  ;;  %v2280_v22 = vld [vmem:[%s3441_s1 + $0x1e4] sm:$0xf0]  ;;  %v2230_v24 = vld [vmem:[%s3441_s1 + $0x54] sm:$0xf0] }
  0x11   : > { %1237 = vmatpush.bf16.msra.mxu3 %v1945_v12  ;;  %v1937_v25 = vor.u32 %v2280_v22, %v1936_v20  ;;  %v1800_v26 = vld [vmem:[%s3441_s1 + $0xd0] sm:$0xf]  ;;  %v2246_v27 = vld [vmem:[%s3441_s1 + $0xd4] sm:$0xf0]  ;;  %v1737_v29 = vor.u32 %v2230_v24, %v1736_v23  ;;  %v1728_v35 = vld [vmem:[%s3441_s1 + $0x40] sm:$0xf] }
  0x12   : > { %v1864_v28 = vld [vmem:[%s3441_s1 + $0x150] sm:$0xf]  ;;  %1184 = vmatpush.bf16.msra.mxu0 %v1745_v16  ;;  %v2262_v30 = vld [vmem:[%s3441_s1 + $0x154] sm:$0xf0]  ;;  %v1801_v33 = vor.u32 %v2246_v27, %v1800_v26  ;;  %v2228_v36 = vld [vmem:[%s3441_s1 + $0x44] sm:$0xf0] }
  0x13   : > { %v1928_v31 = vld [vmem:[%s3441_s1 + $0x1d0] sm:$0xf]  ;;  %v2278_v32 = vld [vmem:[%s3441_s1 + $0x1d4] sm:$0xf0]  ;;  %1202 = vmatpush.bf16.msra.mxu1 %v1809_v17  ;;  %v1865_v34 = vor.u32 %v2262_v30, %v1864_v28  ;;  %v1792_v37 = vld [vmem:[%s3441_s1 + $0xc0] sm:$0xf]  ;;  %v1729_v44 = vor.u32 %v2228_v36, %v1728_v35 }
  0x14   : > { %1220 = vmatpush.bf16.msra.mxu2 %v1873_v21  ;;  %v1929_v38 = vor.u32 %v2278_v32, %v1928_v31  ;;  %v2244_v39 = vld [vmem:[%s3441_s1 + $0xc4] sm:$0xf0]  ;;  %v1856_v40 = vld [vmem:[%s3441_s1 + $0x140] sm:$0xf]  ;;  %v1720_v47 = vld [vmem:[%s3441_s1 + $0x30] sm:$0xf] }
  0x15   : > { %1238 = vmatpush.bf16.msra.mxu3 %v1937_v25  ;;  %v2260_v41 = vld [vmem:[%s3441_s1 + $0x144] sm:$0xf0]  ;;  %v1920_v42 = vld [vmem:[%s3441_s1 + $0x1c0] sm:$0xf]  ;;  %v1793_v45 = vor.u32 %v2244_v39, %v1792_v37  ;;  %v2226_v48 = vld [vmem:[%s3441_s1 + $0x34] sm:$0xf0] }
  0x16   : > { %v2276_v43 = vld [vmem:[%s3441_s1 + $0x1c4] sm:$0xf0]  ;;  %1185 = vmatpush.bf16.msra.mxu0 %v1737_v29  ;;  %v1857_v46 = vor.u32 %v2260_v41, %v1856_v40  ;;  %v1784_v49 = vld [vmem:[%s3441_s1 + $0xb0] sm:$0xf]  ;;  %v2242_v51 = vld [vmem:[%s3441_s1 + $0xb4] sm:$0xf0]  ;;  %v1721_v56 = vor.u32 %v2226_v48, %v1720_v47 }
  0x17   : > { %1203 = vmatpush.bf16.msra.mxu1 %v1801_v33  ;;  %v1921_v50 = vor.u32 %v2276_v43, %v1920_v42  ;;  %v1848_v52 = vld [vmem:[%s3441_s1 + $0x130] sm:$0xf]  ;;  %v2258_v53 = vld [vmem:[%s3441_s1 + $0x134] sm:$0xf0]  ;;  %v1712_v57 = vld [vmem:[%s3441_s1 + $0x20] sm:$0xf]  ;;  %v1785_v58 = vor.u32 %v2242_v51, %v1784_v49 }
  0x18   : > { %1221 = vmatpush.bf16.msra.mxu2 %v1865_v34  ;;  %v1912_v54 = vld [vmem:[%s3441_s1 + $0x1b0] sm:$0xf]  ;;  %v2274_v55 = vld [vmem:[%s3441_s1 + $0x1b4] sm:$0xf0]  ;;  %v1849_v59 = vor.u32 %v2258_v53, %v1848_v52  ;;  %v2224_v60 = vld [vmem:[%s3441_s1 + $0x24] sm:$0xf0] }
  0x19   : > { %1239 = vmatpush.bf16.msra.mxu3 %v1929_v38  ;;  %v1776_v61 = vld [vmem:[%s3441_s1 + $0xa0] sm:$0xf]  ;;  %v2240_v62 = vld [vmem:[%s3441_s1 + $0xa4] sm:$0xf0]  ;;  %v1913_v63 = vor.u32 %v2274_v55, %v1912_v54  ;;  %v1704_v4 = vld [vmem:[%s3441_s1 + $0x10] sm:$0xf]  ;;  %v1713_v6 = vor.u32 %v2224_v60, %v1712_v57 }
  0x1a   : > { %1186 = vmatpush.bf16.msra.mxu0 %v1729_v44  ;;  %v1840_v0 = vld [vmem:[%s3441_s1 + $0x120] sm:$0xf]  ;;  %v2256_v1 = vld [vmem:[%s3441_s1 + $0x124] sm:$0xf0]  ;;  %v2222_v5 = vld [vmem:[%s3441_s1 + $0x14] sm:$0xf0]  ;;  %v1777_v10 = vor.u32 %v2240_v62, %v1776_v61 }
  0x1b   : > { %1204 = vmatpush.bf16.msra.mxu1 %v1793_v45  ;;  %v1904_v2 = vld [vmem:[%s3441_s1 + $0x1a0] sm:$0xf]  ;;  %v2272_v3 = vld [vmem:[%s3441_s1 + $0x1a4] sm:$0xf0]  ;;  %v1768_v7 = vld [vmem:[%s3441_s1 + $0x90] sm:$0xf]  ;;  %v1841_v11 = vor.u32 %v2256_v1, %v1840_v0  ;;  %v1705_v23 = vor.u32 %v2222_v5, %v1704_v4 }
  0x1c   : > { %1222 = vmatpush.bf16.msra.mxu2 %v1857_v46  ;;  %v2238_v8 = vld [vmem:[%s3441_s1 + $0x94] sm:$0xf0]  ;;  %v1832_v9 = vld [vmem:[%s3441_s1 + $0x110] sm:$0xf]  ;;  %v1905_v15 = vor.u32 %v2272_v3, %v1904_v2  ;;  %v1696_v16 = vld [vmem:[%s3441_s1] sm:$0xf] }
  0x1d   : > { %1240 = vmatpush.bf16.msra.mxu3 %v1921_v50  ;;  %v2254_v12 = vld [vmem:[%s3441_s1 + $0x114] sm:$0xf0]  ;;  %v1896_v13 = vld [vmem:[%s3441_s1 + $0x190] sm:$0xf]  ;;  %v2220_v17 = vld [vmem:[%s3441_s1 + $0x4] sm:$0xf0]  ;;  %v1769_v25 = vor.u32 %v2238_v8, %v1768_v7 }
  0x1e   : > { %1187 = vmatpush.bf16.msra.mxu0 %v1721_v56  ;;  %v2270_v14 = vld [vmem:[%s3441_s1 + $0x194] sm:$0xf0]  ;;  %v1760_v18 = vld [vmem:[%s3441_s1 + $0x80] sm:$0xf]  ;;  %v2236_v19 = vld [vmem:[%s3441_s1 + $0x84] sm:$0xf0]  ;;  %v1833_v26 = vor.u32 %v2254_v12, %v1832_v9  ;;  %v1697_v33 = vor.u32 %v2220_v17, %v1696_v16 }
  0x1f   : > { %1205 = vmatpush.bf16.msra.mxu1 %v1785_v58  ;;  %v1824_v20 = vld [vmem:[%s3441_s1 + $0x100] sm:$0xf]  ;;  %v2252_v21 = vld [vmem:[%s3441_s1 + $0x104] sm:$0xf0]  ;;  %s3452_s16 = smov (!%p196_p3, %s1651_s16), 1  ;;  %v1897_v30 = vor.u32 %v2270_v14, %v1896_v13  ;;  %v1761_v37 = vor.u32 %v2236_v19, %v1760_v18  ;;  %vm316_vm5 = vcmask 1040384  }
  0x20   : > { %1223 = vmatpush.bf16.msra.mxu2 %v1849_v59  ;;  %v2592_v22 = vld [vmem:[%s3441_s1 + $0x180] sm:$0xf]  ;;  %v2597_v24 = vld [vmem:[%s3441_s1 + $0x184] sm:$0xf0]  ;;  %vm223_vm0 = vsmask.f32 3328  ;;  %v1825_v38 = vor.u32 %v2252_v21, %v1824_v20 }
  0x21   : > { %1241 = vmatpush.bf16.msra.mxu3 %v1913_v63  ;;  %v2136_v27 = vld [vmem:[%s3441_s1 + $0x370] sm:$0xf]  ;;  %v2330_v28 = vld [vmem:[%s3441_s1 + $0x374] sm:$0xf0]  ;;  %s2209_s5 = sshll.u32 %s3452_s16, 5  ;;  %v1889_v39 = vor.u32 %v2597_v24, %v2592_v22  ;;  %vm317_vm6 = vcmask 1044484  }
  0x22   : > { %1188 = vmatpush.bf16.msra.mxu0 %v1713_v6  ;;  %v2008_v29 = vld [vmem:[%s3441_s1 + $0x270] sm:$0xf]  ;;  %v2298_v31 = vld [vmem:[%s3441_s1 + $0x274] sm:$0xf0]  ;;  %s2622_s12 = scalar_lea.vmem %s3440_s0, %s2209_s5  ;;  %vm224_vm1 = vsmask.f32 7440  ;;  %v2137_v49 = vor.u32 %v2330_v28, %v2136_v27  ;;  %vm2916_vm7 = vmor %vm316_vm5, %vm317_vm6 }
  0x23   : > { %1206 = vmatpush.bf16.msra.mxu1 %v1777_v10  ;;  %v2072_v32 = vld [vmem:[%s3441_s1 + $0x2f0] sm:$0xf]  ;;  %v2314_v34 = vld [vmem:[%s3441_s1 + $0x2f4] sm:$0xf0]  ;;  %v214_v40 = vld [vmem:[%s2622_s12] sm:$0xff]  ;;  %v2009_v50 = vor.u32 %v2298_v31, %v2008_v29  ;;  %vm1499_vm9 = vcmask 1043456  }
  0x24   : > { %1224 = vmatpush.bf16.msra.mxu2 %v1841_v11  ;;  %v2200_v35 = vld [vmem:[%s3441_s1 + $0x3f0] sm:$0xf]  ;;  %v2346_v36 = vld [vmem:[%s3441_s1 + $0x3f4] sm:$0xf0]  ;;  %v2637_v41 = vld [vmem:[%s2622_s12 + $0x8] sm:$0xff]  ;;  %217 = vst [vmem:[#allocation2] sm:$0xff] %v214_v40  ;;  %v2073_v51 = vor.u32 %v2314_v34, %v2072_v32 }
  0x25   : > { %1242 = vmatpush.bf16.msra.mxu3 %v1905_v15  ;;  %v2640_v42 = vld [vmem:[%s2622_s12 + $0x10] sm:$0x77]  ;;  %v227_v43 = vshrl.u32 %v214_v40, 16  ;;  %v230_v44 = vshll.u32 %v214_v40, 16  ;;  %v236_v45 = vshll.u32 %v2637_v41, 16  ;;  %v240_v46 = vshrl.u32 %v2637_v41, 16  ;;  %vm2673_vm2 = vmor %vm223_vm0, %vm224_vm1 }
  0x26   : > { %1189 = vmatpush.bf16.msra.mxu0 %v1705_v23  ;;  %v2128_v47 = vld [vmem:[%s3441_s1 + $0x360] sm:$0xf]  ;;  %218 = vst [vmem:[#allocation2 + $0x20] sm:$0xff] %v2637_v41  ;;  %v246_v48 = vshll.u32 %v2640_v42, 16  ;;  %v2328_v52 = vld [vmem:[%s3441_s1 + $0x364] sm:$0xf0]  ;;  %v2201_v59 = vor.u32 %v2346_v36, %v2200_v35 }
  0x27   : > { %1207 = vmatpush.bf16.msra.mxu1 %v1769_v25  ;;  %v2000_v53 = vld [vmem:[%s3441_s1 + $0x260] sm:$0xf]  ;;  %v229_v54 = vrot.slane %v227_v43, 4  ;;  %v232_v55 = vrot.slane %v230_v44, 5  ;;  %v238_v56 = vrot.slane %v236_v45, 5  ;;  %v242_v57 = vrot.slane %v240_v46, 4 }
  0x28   : > { %1225 = vmatpush.bf16.msra.mxu2 %v1833_v26  ;;  %v2296_v58 = vld [vmem:[%s3441_s1 + $0x264] sm:$0xf0]  ;;  %v2064_v60 = vld [vmem:[%s3441_s1 + $0x2e0] sm:$0xf]  ;;  %v248_v2 = vrot.slane %v246_v48, 5  ;;  %v250_v5 = vshrl.u32 %v2640_v42, 16  ;;  %v2129_v6 = vor.u32 %v2328_v52, %v2128_v47 }
  0x29   : > { %1243 = vmatpush.bf16.msra.mxu3 %v1897_v30  ;;  %v2312_v61 = vld [vmem:[%s3441_s1 + $0x2e4] sm:$0xf0]  ;;  %v2192_v62 = vld [vmem:[%s3441_s1 + $0x3e0] sm:$0xf]  ;;  %v233_v0 = vor.u32 %v232_v55, %v229_v54  ;;  %v243_v1 = vor.u32 %v242_v57, %v238_v56  ;;  %v2120_v4 = vld [vmem:[%s3441_s1 + $0x350] sm:$0xf]  ;;  %v2001_v12 = vor.u32 %v2296_v58, %v2000_v53 }
  0x2a   : > { %1190 = vmatpush.bf16.msra.mxu0 %v1697_v33  ;;  %v2344_v3 = vld [vmem:[%s3441_s1 + $0x3e4] sm:$0xf0]  ;;  %v2326_v7 = vld [vmem:[%s3441_s1 + $0x354] sm:$0xf0]  ;;  %v1992_v8 = vld [vmem:[%s3441_s1 + $0x250] sm:$0xf]  ;;  %v2065_v13 = vor.u32 %v2312_v61, %v2064_v60 }
  0x2b   : > { %1208 = vmatpush.bf16.msra.mxu1 %v1761_v37  ;;  %v2294_v9 = vld [vmem:[%s3441_s1 + $0x254] sm:$0xf0]  ;;  %v234_v10 = vrot.slane %v233_v0, 4  ;;  %v244_v11 = vrot.slane %v243_v1, 4  ;;  %v2056_v14 = vld [vmem:[%s3441_s1 + $0x2d0] sm:$0xf]  ;;  %v2193_v23 = vor.u32 %v2344_v3, %v2192_v62  ;;  %v2121_v27 = vor.u32 %v2326_v7, %v2120_v4 }
  0x2c   : > { %1226 = vmatpush.bf16.msra.mxu2 %v1825_v38  ;;  %v2310_v15 = vld [vmem:[%s3441_s1 + $0x2d4] sm:$0xf0]  ;;  %v1664_v16 = vld [vmem:[#allocation2] sm:$0xf]  ;;  %v2211_v17 = vld [vmem:[#allocation2 + $0x4] sm:$0xf]  ;;  %v1993_v31 = vor.u32 %v2294_v9, %v1992_v8 }
  0x2d   : > { %1244 = vmatpush.bf16.msra.mxu3 %v1889_v39  ;;  %v2184_v18 = vld [vmem:[%s3441_s1 + $0x3d0] sm:$0xf]  ;;  %v2215_v19 = vld [vmem:[#allocation2 + $0x1c] sm:$0xf0]  ;;  %v1666_v20 = vld [vmem:[#allocation2 + $0x20] sm:$0xf0]  ;;  %v239_v21 = vsel %vm2673_vm2, %v234_v10, %v238_v56  ;;  %v249_v22 = vsel %vm2673_vm2, %v244_v11, %v248_v2  ;;  %v2057_v32 = vor.u32 %v2310_v15, %v2056_v14 }
  0x2e   : > { %1255 = vmatpush.bf16.msrb.mxu0 %v2009_v50  ;;  %v2342_v24 = vld [vmem:[%s3441_s1 + $0x3d4] sm:$0xf0]  ;;  %v2709_v25 = vor.u32 %v2215_v19, %v1664_v16  ;;  %v2711_v26 = vor.u32 %v2211_v17, %v1666_v20  ;;  %258 = vst [vmem:[#allocation2 + $0x8] sm:$0xff] %v239_v21  ;;  %v2112_v28 = vld [vmem:[%s3441_s1 + $0x340] sm:$0xf]  ;;  %v252_v30 = vrot.slane %v250_v5, 4 }
  0x2f   : > { %1273 = vmatpush.bf16.msrb.mxu1 %v2073_v51  ;;  %v2324_v29 = vld [vmem:[%s3441_s1 + $0x344] sm:$0xf0]  ;;  %259 = vst [vmem:[#allocation2 + $0x28] sm:$0xff] %v249_v22  ;;  %v1984_v33 = vld [vmem:[%s3441_s1 + $0x240] sm:$0xf]  ;;  %v2185_v39 = vor.u32 %v2342_v24, %v2184_v18  ;;  %v2760_v55 = vrot.slane %v240_v46, 6 }
  0x30   : > { %1291 = vmatpush.bf16.msrb.mxu2 %v2137_v49  ;;  %v2292_v34 = vld [vmem:[%s3441_s1 + $0x244] sm:$0xf0]  ;;  %1191 = vmatmul.bf16.vlgmr.msra.gmra.mxu0 %v2709_v25  ;;  %v2048_v35 = vld [vmem:[%s3441_s1 + $0x2c0] sm:$0xf]  ;;  %v216_v37 = vld [vmem:[%s2622_s12 + $0x10] sm:$0x33]  ;;  %v253_v38 = vor.u32 %v252_v30, %v248_v2  ;;  %v2113_v43 = vor.u32 %v2324_v29, %v2112_v28 }
  0x31   : > { %1309 = vmatpush.bf16.msrb.mxu3 %v2201_v59  ;;  %1209 = vmatmul.bf16.vlgmr.msra.gmra.mxu1 %v2711_v26  ;;  %v2308_v36 = vld [vmem:[%s3441_s1 + $0x2c4] sm:$0xf0]  ;;  %v2176_v40 = vld [vmem:[%s3441_s1 + $0x3c0] sm:$0xf]  ;;  %219 = vst [vmem:[#allocation2 + $0x40] sm:$0x33] %v216_v37  ;;  %v1985_v49 = vor.u32 %v2292_v34, %v1984_v33 }
  0x32   : > { %1256 = vmatpush.bf16.msrb.mxu0 %v2001_v12  ;;  %v2340_v42 = vld [vmem:[%s3441_s1 + $0x3c4] sm:$0xf0]  ;;  %v254_v44 = vrot.slane %v253_v38, 4  ;;  %v2104_v47 = vld [vmem:[%s3441_s1 + $0x330] sm:$0xf]  ;;  %v2049_v50 = vor.u32 %v2308_v36, %v2048_v35  ;;  %s2347_s18 = smul.u32 24, %s3452_s16 }
  0x33   : > { %1274 = vmatpush.bf16.msrb.mxu1 %v2065_v13  ;;  %v2322_v48 = vld [vmem:[%s3441_s1 + $0x334] sm:$0xf0]  ;;  %v1976_v51 = vld [vmem:[%s3441_s1 + $0x230] sm:$0xf]  ;;  %v2096_v60 = vld [vmem:[%s3441_s1 + $0x320] sm:$0xf]  ;;  %v2177_v63 = vor.u32 %v2340_v42, %v2176_v40 }
  0x34   : > { %1292 = vmatpush.bf16.msrb.mxu2 %v2129_v6  ;;  %v2290_v52 = vld [vmem:[%s3441_s1 + $0x234] sm:$0xf0]  ;;  %v2040_v53 = vld [vmem:[%s3441_s1 + $0x2b0] sm:$0xf]  ;;  %260 = vst [vmem:[#allocation2 + $0x48] sm:$0x33] %v254_v44  ;;  %v2105_v0 = vor.u32 %v2322_v48, %v2104_v47  ;;  %s3414_s21 = scalar_lea.vmem %s3443_s3, %s2347_s18 }
  0x35   : > { %1310 = vmatpush.bf16.msrb.mxu3 %v2193_v23  ;;  %v2306_v54 = vld [vmem:[%s3441_s1 + $0x2b4] sm:$0xf0]  ;;  %v1672_v56 = vld [vmem:[#allocation2 + $0x8] sm:$0xf]  ;;  %v2212_v57 = vld [vmem:[#allocation2 + $0xc] sm:$0xf]  ;;  %v1977_v1 = vor.u32 %v2290_v52, %v1976_v51 }
  0x36   : > { %1257 = vmatpush.bf16.msrb.mxu0 %v1993_v31  ;;  %v2168_v58 = vld [vmem:[%s3441_s1 + $0x3b0] sm:$0xf]  ;;  %v2338_v59 = vld [vmem:[%s3441_s1 + $0x3b4] sm:$0xf0]  ;;  %v2320_v46 = vld [vmem:[%s3441_s1 + $0x324] sm:$0xf0]  ;;  %v2041_v6 = vor.u32 %v2306_v54, %v2040_v53 }
  0x37   : > { %1275 = vmatpush.bf16.msrb.mxu1 %v2057_v32  ;;  %v2216_v61 = vld [vmem:[#allocation2 + $0x24] sm:$0xf0]  ;;  %v1674_v62 = vld [vmem:[#allocation2 + $0x28] sm:$0xf0]  ;;  %v1968_v2 = vld [vmem:[%s3441_s1 + $0x220] sm:$0xf]  ;;  %v2169_v18 = vor.u32 %v2338_v59, %v2168_v58  ;;  %v2097_v19 = vor.u32 %v2320_v46, %v2096_v60 }
  0x38   : > { %1293 = vmatpush.bf16.msrb.mxu2 %v2121_v27  ;;  %v2288_v3 = vld [vmem:[%s3441_s1 + $0x224] sm:$0xf0]  ;;  %v2780_v4 = vor.u32 %v2216_v61, %v1672_v56  ;;  %v2782_v5 = vor.u32 %v2212_v57, %v1674_v62  ;;  %v2032_v7 = vld [vmem:[%s3441_s1 + $0x2a0] sm:$0xf]  ;;  %v2803_v12 = vld [vmem:[%s3441_s1 + $0x310] sm:$0xf] }
  0x39   : > { %1311 = vmatpush.bf16.msrb.mxu3 %v2185_v39  ;;  %v2304_v8 = vld [vmem:[%s3441_s1 + $0x2a4] sm:$0xf0]  ;;  %v2793_v9 = vld [vmem:[%s3441_s1 + $0x3a0] sm:$0xf]  ;;  %v2318_v15 = vld [vmem:[%s3441_s1 + $0x314] sm:$0xf0]  ;;  %v1969_v24 = vor.u32 %v2288_v3, %v1968_v2 }
  0x3a   : > { %1258 = vmatpush.bf16.msrb.mxu0 %v1985_v49  ;;  %v343_v10 = vld [vmem:[#allocation2 + $0x40] sm:$0x33]  ;;  %v2798_v11 = vld [vmem:[%s3441_s1 + $0x3a4] sm:$0xf0]  ;;  %1227 = vmatmul.bf16.vlgmr.msra.gmra.mxu2 %v2780_v4  ;;  %v2813_v16 = vld [vmem:[%s3441_s1 + $0x210] sm:$0xf]  ;;  %v2033_v27 = vor.u32 %v2304_v8, %v2032_v7  ;;  %v2089_v38 = vor.u32 %v2318_v15, %v2803_v12 }
  0x3b   : > { %1276 = vmatpush.bf16.msrb.mxu1 %v2049_v50  ;;  %1245 = vmatmul.bf16.vlgmr.msra.gmra.mxu3 %v2782_v5  ;;  %v503_v13 = vunpack.c.l.b16 %v343_v10  ;;  %v504_v14 = vunpack.c.h.b16 %v343_v10  ;;  %v2818_v17 = vld [vmem:[%s3441_s1 + $0x214] sm:$0xf0]  ;;  %v2024_v20 = vld [vmem:[%s3441_s1 + $0x290] sm:$0xf]  ;;  %v2831_v23 = vld [vmem:[#allocation2 + $0x48] sm:$0x33]  ;;  %v2161_v33 = vor.u32 %v2798_v11, %v2793_v9 }
  0x3c   : > { %1294 = vmatpush.bf16.msrb.mxu2 %v2113_v43  ;;  %v2302_v21 = vld [vmem:[%s3441_s1 + $0x294] sm:$0xf0]  ;;  %v2829_v22 = vld [vmem:[%s3441_s1 + $0x390] sm:$0xf]  ;;  %v2841_v29 = vld [vmem:[%s3441_s1 + $0x300] sm:$0xf]  ;;  %v505_v32 = vunpack.c.l.b16 %v2831_v23  ;;  %v506_v37 = vunpack.c.h.b16 %v2831_v23  ;;  %v1961_v39 = vor.u32 %v2818_v17, %v2813_v16 }
  0x3d   : > { %1312 = vmatpush.bf16.msrb.mxu3 %v2177_v63  ;;  %v2836_v28 = vld [vmem:[%s3441_s1 + $0x394] sm:$0xf0]  ;;  %v2843_v30 = vpack.c.b16 %v503_v13, %v503_v13  ;;  %v2845_v31 = vpack.c.b16 %v504_v14, %v504_v14  ;;  %v2853_v34 = vld [vmem:[%s3441_s1 + $0x304] sm:$0xf0]  ;;  %v2858_v35 = vld [vmem:[%s3441_s1 + $0x200] sm:$0xf]  ;;  %v2025_v40 = vor.u32 %v2302_v21, %v2024_v20 }
  0x3e   : > { %1259 = vmatpush.bf16.msrb.mxu0 %v1977_v1  ;;  %v2863_v36 = vld [vmem:[%s3441_s1 + $0x204] sm:$0xf0]  ;;  %v2870_v42 = vld [vmem:[%s2622_s12 + $0x10] sm:$0xff]  ;;  %v2153_v43 = vor.u32 %v2836_v28, %v2829_v22  ;;  %v2081_v44 = vor.u32 %v2853_v34, %v2841_v29  ;;  %v2881_v48 = vld [vmem:[%s3441_s1 + $0x280] sm:$0xf]  ;;  %v2889_v51 = vpack.c.b16 %v505_v32, %v505_v32  ;;  %v283_v58 = vrot.slane %v236_v45, 7 }
  0x3f   : > { %1277 = vmatpush.bf16.msrb.mxu1 %v2041_v6  ;;  %v1953_v47 = vor.u32 %v2863_v36, %v2858_v35  ;;  %v2886_v49 = vld [vmem:[%s3441_s1 + $0x284] sm:$0xf0]  ;;  %v261_v50 = vld [vmem:[%s2622_s12] sm:$0xcc]  ;;  %vm265_vm3 = vsmask.f32 1280 }
  0x40   : > { %1295 = vmatpush.bf16.msrb.mxu2 %v2105_v0  ;;  %vm266_vm4 = vsmask.f32 5392  ;;  %v269_v52 = vshrl.u32 %v261_v50, 16  ;;  %v272_v53 = vshll.u32 %v261_v50, 16  ;;  %v308_v54 = vld [vmem:[%s2622_s12] sm:$0x88]  ;;  %1196 = vmatmul.bf16.gmra.mxu0 %v2843_v30  ;;  %v284_v45 = vor.u32 %v283_v58, %v2760_v55 }
  0x41   : > { %1313 = vmatpush.bf16.msrb.mxu3 %v2169_v18  ;;  %1214 = vmatmul.bf16.gmra.mxu1 %v2845_v31  ;;  %v2897_v56 = vld [vmem:[%s3441_s1 + $0x380] sm:$0xf]  ;;  %v2902_v57 = vld [vmem:[%s3441_s1 + $0x384] sm:$0xf0]  ;;  %v288_v59 = vshrl.u32 %v2870_v42, 16  ;;  %v291_v60 = vshll.u32 %v2870_v42, 16  ;;  %v2017_v8 = vor.u32 %v2886_v49, %v2881_v48  ;;  %vm2928_vm8 = vmor %vm265_vm3, %vm266_vm4 }
  0x42   : > { %1260 = vmatpush.bf16.msrb.mxu0 %v1969_v24  ;;  %v2265_v46 = vld [vmem:[%s3441_s1 + $0x174] sm:$0xf]  ;;  %v271_v61 = vrot.slane %v269_v52, 6  ;;  %v274_v62 = vrot.slane %v272_v53, 7  ;;  %v1661_v63 = vrot.slane %v308_v54, 11  ;;  %v321_v6 = vrot.slane %v2637_v41, 7 }
  0x43   : > { %1278 = vmatpush.bf16.msrb.mxu1 %v2033_v27  ;;  %v1882_v0 = vld [vmem:[%s3441_s1 + $0x178] sm:$0xf0]  ;;  %v290_v1 = vrot.slane %v288_v59, 6  ;;  %v293_v2 = vrot.slane %v291_v60, 7  ;;  %v2233_v7 = vld [vmem:[%s3441_s1 + $0x74] sm:$0xf]  ;;  %v2145_v20 = vor.u32 %v2902_v57, %v2897_v56 }
  0x44   : > { %1296 = vmatpush.bf16.msrb.mxu2 %v2097_v19  ;;  %v275_v9 = vor.u32 %v274_v62, %v271_v61  ;;  %v324_v10 = vrot.slane %v2870_v42, 7  ;;  %v1885_v11 = vor.u32 %v2265_v46, %v1882_v0  ;;  %v1754_v41 = vld [vmem:[%s3441_s1 + $0x78] sm:$0xf0]  ;;  %v2249_v12 = vld [vmem:[%s3441_s1 + $0xf4] sm:$0xf]  ;;  %v286_v13 = vrot.slane %v284_v45, 4 }
  0x45   : > { %1314 = vmatpush.bf16.msrb.mxu3 %v2161_v33  ;;  %v2939_v14 = vor.u32 %v293_v2, %v290_v1  ;;  %v322_v15 = vsel %vm2916_vm7, %v1661_v63, %v321_v6  ;;  %v323_v16 = vrot.slane %v321_v6, 4  ;;  %v1818_v17 = vld [vmem:[%s3441_s1 + $0xf8] sm:$0xf0]  ;;  %v2281_v18 = vld [vmem:[%s3441_s1 + $0x1f4] sm:$0xf]  ;;  %v2949_v19 = vpack.c.b16 %v506_v37, %v506_v37  ;;  %s2210_s22 = sshll.u32 %s3452_s16, 2 }
  0x46   : > { %1261 = vmatpush.bf16.msrb.mxu0 %v1961_v39  ;;  %v276_v21 = vrot.slane %v275_v9, 4  ;;  %332 = vst [vmem:[#allocation2 + $0x18] sm:$0xff] %v322_v15  ;;  %v1757_v22 = vor.u32 %v2233_v7, %v1754_v41  ;;  %v1946_v23 = vld [vmem:[%s3441_s1 + $0x1f8] sm:$0xf0]  ;;  %v2263_v24 = vld [vmem:[%s3441_s1 + $0x164] sm:$0xf]  ;;  %v1821_v29 = vor.u32 %v2249_v12, %v1818_v17  ;;  %s210_s25 = scalar_lea.vmem %s3444_s4, %s2210_s22 }
  0x47   : > { %1279 = vmatpush.bf16.msrb.mxu1 %v2025_v40  ;;  %v295_v27 = vsel %vm2928_vm8, %v286_v13, %v2939_v14  ;;  %v325_v28 = vsel %vm2916_vm7, %v323_v16, %v324_v10  ;;  %v1874_v32 = vld [vmem:[%s3441_s1 + $0x168] sm:$0xf0]  ;;  %v2231_v33 = vld [vmem:[%s3441_s1 + $0x64] sm:$0xf]  ;;  %v2229_v49 = vld [vmem:[%s3441_s1 + $0x54] sm:$0xf] }
  0x48   : > { %1297 = vmatpush.bf16.msrb.mxu2 %v2089_v38  ;;  %v1746_v34 = vld [vmem:[%s3441_s1 + $0x68] sm:$0xf0]  ;;  %v285_v37 = vsel %vm2928_vm8, %v276_v21, %v284_v45  ;;  %306 = vst [vmem:[#allocation2 + $0x30] sm:$0xff] %v295_v27  ;;  %v1949_v38 = vor.u32 %v2281_v18, %v1946_v23  ;;  %v2247_v39 = vld [vmem:[%s3441_s1 + $0xe4] sm:$0xf]  ;;  %v1877_v42 = vor.u32 %v2263_v24, %v1874_v32  ;;  %v296_v56 = vrot.slane %v2939_v14, 4 }
  0x49   : > { %1315 = vmatpush.bf16.msrb.mxu3 %v2153_v43  ;;  %v1810_v40 = vld [vmem:[%s3441_s1 + $0xe8] sm:$0xf0]  ;;  %305 = vst [vmem:[#allocation2 + $0x10] sm:$0xff] %v285_v37  ;;  %v1749_v35 = vor.u32 %v2231_v33, %v1746_v34  ;;  %v2279_v36 = vld [vmem:[%s3441_s1 + $0x1e4] sm:$0xf]  ;;  %v326_v57 = vrot.slane %v324_v10, 4 }
  0x4a   : > { %1262 = vmatpush.bf16.msrb.mxu0 %v1953_v47  ;;  %v1938_v43 = vld [vmem:[%s3441_s1 + $0x1e8] sm:$0xf0]  ;;  %1232 = vmatmul.bf16.gmra.mxu2 %v2889_v51  ;;  %333 = vst [vmem:[#allocation2 + $0x38] sm:$0xff] %v325_v28  ;;  %v1866_v47 = vld [vmem:[%s3441_s1 + $0x158] sm:$0xf0]  ;;  %v1813_v48 = vor.u32 %v2247_v39, %v1810_v40  ;;  %v2367_v3 = vmov 0  }
  0x4b   : > { %1280 = vmatpush.bf16.msrb.mxu1 %v2017_v8  ;;  %1250 = vmatmul.bf16.gmra.mxu3 %v2949_v19  ;;  %v1738_v50 = vld [vmem:[%s3441_s1 + $0x58] sm:$0xf0]  ;;  %v1941_v52 = vor.u32 %v2279_v36, %v1938_v43  ;;  %v2245_v53 = vld [vmem:[%s3441_s1 + $0xd4] sm:$0xf]  ;;  %v2259_v61 = vld [vmem:[%s3441_s1 + $0x144] sm:$0xf] }
  0x4c   : > { %1298 = vmatpush.bf16.msrb.mxu2 %v2081_v44  ;;  %v2261_v44 = vld [vmem:[%s3441_s1 + $0x154] sm:$0xf]  ;;  %v1802_v54 = vld [vmem:[%s3441_s1 + $0xd8] sm:$0xf0]  ;;  %v1741_v59 = vor.u32 %v2229_v49, %v1738_v50  ;;  %v1858_v62 = vld [vmem:[%s3441_s1 + $0x148] sm:$0xf0]  ;;  %2357 = vset.pattern.permute.xlu0 %v2367_v3 }
  0x4d   : > { %1316 = vmatpush.bf16.msrb.mxu3 %v2145_v20  ;;  %v1869_v58 = vor.u32 %v2261_v44, %v1866_v47  ;;  %v2277_v60 = vld [vmem:[%s3441_s1 + $0x1d4] sm:$0xf]  ;;  %v1930_v46 = vld [vmem:[%s3441_s1 + $0x1d8] sm:$0xf0]  ;;  %v2227_v63 = vld [vmem:[%s3441_s1 + $0x44] sm:$0xf]  ;;  %v1805_v8 = vor.u32 %v2245_v53, %v1802_v54  ;;  %v1861_v10 = vor.u32 %v2259_v61, %v1858_v62  ;;  %2358 = vset.pattern.permute.xlu1 %v2367_v3 }
  0x4e   : > { %1327 = vmatpush.bf16.msra.mxu0 %v1757_v22  ;;  %v1730_v0 = vld [vmem:[%s3441_s1 + $0x48] sm:$0xf0]  ;;  %v2243_v2 = vld [vmem:[%s3441_s1 + $0xc4] sm:$0xf]  ;;  %v1933_v9 = vor.u32 %v2277_v60, %v1930_v46  ;;  %v1688_v13 = vld [vmem:[#allocation2 + $0x18] sm:$0xf] }
  0x4f   : > { %1345 = vmatpush.bf16.msra.mxu1 %v1821_v29  ;;  %v2217_v45 = vld [vmem:[#allocation2 + $0x2c] sm:$0xf0]  ;;  %v1682_v1 = vld [vmem:[#allocation2 + $0x30] sm:$0xf0]  ;;  %v2214_v16 = vld [vmem:[#allocation2 + $0x1c] sm:$0xf]  ;;  %v1733_v18 = vor.u32 %v2227_v63, %v1730_v0 }
  0x50   : > { %1363 = vmatpush.bf16.msra.mxu2 %v1885_v11  ;;  %v1680_v6 = vld [vmem:[#allocation2 + $0x10] sm:$0xf]  ;;  %v2213_v7 = vld [vmem:[#allocation2 + $0x14] sm:$0xf]  ;;  %v1794_v11 = vld [vmem:[%s3441_s1 + $0xc8] sm:$0xf0] }
  0x51   : > { %1381 = vmatpush.bf16.msra.mxu3 %v1949_v38  ;;  %v3035_v41 = vor.u32 %v2217_v45, %v1680_v6  ;;  %v3037_v12 = vor.u32 %v2213_v7, %v1682_v1  ;;  %v2218_v15 = vld [vmem:[#allocation2 + $0x34] sm:$0xf0]  ;;  %v1690_v17 = vld [vmem:[#allocation2 + $0x38] sm:$0xf0]  ;;  %v2275_v20 = vld [vmem:[%s3441_s1 + $0x1c4] sm:$0xf]  ;;  %v1797_v32 = vor.u32 %v2243_v2, %v1794_v11 }
  0x52   : > { %1328 = vmatpush.bf16.msra.mxu0 %v1749_v35  ;;  %v1922_v21 = vld [vmem:[%s3441_s1 + $0x1c8] sm:$0xf0]  ;;  %v264_v22 = vld [vmem:[%s2622_s12 + $0x18] sm:$0x11]  ;;  %v2257_v28 = vld [vmem:[%s3441_s1 + $0x134] sm:$0xf]  ;;  %v3072_v44 = vor.u32 %v2218_v15, %v1688_v13  ;;  %v3074_v47 = vor.u32 %v2214_v16, %v1690_v17 }
  0x53   : > { %1346 = vmatpush.bf16.msra.mxu1 %v1813_v48  ;;  %v311_v23 = vld [vmem:[%s2622_s12 + $0x18] sm:$0x11]  ;;  %1263 = vmatmul.bf16.vlgmr.msrb.gmra.mxu0 %v3035_v41  ;;  %v298_v24 = vshll.u32 %v264_v22, 16  ;;  %v1925_v33 = vor.u32 %v2275_v20, %v1922_v21  ;;  %v2225_v37 = vld [vmem:[%s3441_s1 + $0x34] sm:$0xf]  ;;  %v211_v53 = vld [vmem:[%s3442_s2] sm:$0xff] }
  0x54   : > { %1364 = vmatpush.bf16.msra.mxu2 %v1877_v42  ;;  %1281 = vmatmul.bf16.vlgmr.msrb.gmra.mxu1 %v3037_v12  ;;  %v327_v27 = vrot.slane %v311_v23, 7  ;;  %v1850_v29 = vld [vmem:[%s3441_s1 + $0x138] sm:$0xf0]  ;;  %v2241_v39 = vld [vmem:[%s3441_s1 + $0xb4] sm:$0xf]  ;;  %v212_v23 = vld [vmem:[%s3442_s2 + $0x8] sm:$0xff] }
  0x55   : > { %1382 = vmatpush.bf16.msra.mxu3 %v1941_v52  ;;  %v1853_v34 = vor.u32 %v2257_v28, %v1850_v29  ;;  %v1722_v38 = vld [vmem:[%s3441_s1 + $0x38] sm:$0xf0]  ;;  %v300_v40 = vrot.slane %v298_v24, 7  ;;  %v2273_v43 = vld [vmem:[%s3441_s1 + $0x1b4] sm:$0xf]  ;;  %1479 = vperm.xlu0 %2357, %v211_v53  }
  0x56   : > { %1329 = vmatpush.bf16.msra.mxu0 %v1741_v59  ;;  %v328_v42 = vsel %vm2916_vm7, %v326_v57, %v327_v27  ;;  %v1725_v35 = vor.u32 %v2225_v37, %v1722_v38  ;;  %v1786_v36 = vld [vmem:[%s3441_s1 + $0xb8] sm:$0xf0]  ;;  %v2255_v49 = vld [vmem:[%s3441_s1 + $0x124] sm:$0xf]  ;;  %v1842_v52 = vld [vmem:[%s3441_s1 + $0x128] sm:$0xf0] }
  0x57   : > { %1347 = vmatpush.bf16.msra.mxu1 %v1805_v8  ;;  %334 = vst [vmem:[#allocation2 + $0x58] sm:$0x33] %v328_v42  ;;  %v1914_v48 = vld [vmem:[%s3441_s1 + $0x1b8] sm:$0xf0]  ;;  %v301_v50 = vsel %vm2928_vm8, %v296_v56, %v300_v40  ;;  %v2223_v54 = vld [vmem:[%s3441_s1 + $0x24] sm:$0xf]  ;;  %v1789_v57 = vor.u32 %v2241_v39, %v1786_v36 }
  0x58   : > { %1365 = vmatpush.bf16.msra.mxu2 %v1869_v58  ;;  %307 = vst [vmem:[#allocation2 + $0x50] sm:$0x33] %v301_v50  ;;  %v1917_v14 = vor.u32 %v2273_v43, %v1914_v48  ;;  %v1714_v55 = vld [vmem:[%s3441_s1 + $0x28] sm:$0xf0]  ;;  %v2239_v56 = vld [vmem:[%s3441_s1 + $0xa4] sm:$0xf]  ;;  %v1845_v58 = vor.u32 %v2255_v49, %v1842_v52 }
  0x59   : > { %1383 = vmatpush.bf16.msra.mxu3 %v1933_v9  ;;  %v1717_v59 = vor.u32 %v2223_v54, %v1714_v55  ;;  %v1778_v60 = vld [vmem:[%s3441_s1 + $0xa8] sm:$0xf0]  ;;  %v2271_v46 = vld [vmem:[%s3441_s1 + $0x1a4] sm:$0xf]  ;;  %v2253_v62 = vld [vmem:[%s3441_s1 + $0x114] sm:$0xf] }
  0x5a   : > { %1330 = vmatpush.bf16.msra.mxu0 %v1733_v18  ;;  %v1906_v61 = vld [vmem:[%s3441_s1 + $0x1a8] sm:$0xf0]  ;;  %1299 = vmatmul.bf16.vlgmr.msrb.gmra.mxu2 %v3072_v44  ;;  %v1834_v63 = vld [vmem:[%s3441_s1 + $0x118] sm:$0xf0]  ;;  %v2221_v0 = vld [vmem:[%s3441_s1 + $0x14] sm:$0xf]  ;;  %v1781_v1 = vor.u32 %v2239_v56, %v1778_v60 }
  0x5b   : > { %1348 = vmatpush.bf16.msra.mxu1 %v1797_v32  ;;  %1317 = vmatmul.bf16.vlgmr.msrb.gmra.mxu3 %v3074_v47  ;;  %v1706_v45 = vld [vmem:[%s3441_s1 + $0x18] sm:$0xf0]  ;;  %v1909_v2 = vor.u32 %v2271_v46, %v1906_v61  ;;  %v2237_v6 = vld [vmem:[%s3441_s1 + $0x94] sm:$0xf]  ;;  %v1837_v7 = vor.u32 %v2253_v62, %v1834_v63  ;;  %v2251_v15 = vld [vmem:[%s3441_s1 + $0x104] sm:$0xf] }
  0x5c   : > { %1366 = vmatpush.bf16.msra.mxu2 %v1861_v10  ;;  %v1709_v8 = vor.u32 %v2221_v0, %v1706_v45  ;;  %v1770_v9 = vld [vmem:[%s3441_s1 + $0x98] sm:$0xf0]  ;;  %v2269_v10 = vld [vmem:[%s3441_s1 + $0x194] sm:$0xf]  ;;  %v1826_v16 = vld [vmem:[%s3441_s1 + $0x108] sm:$0xf0] }
  0x5d   : > { %1384 = vmatpush.bf16.msra.mxu3 %v1925_v33  ;;  %v1898_v11 = vld [vmem:[%s3441_s1 + $0x198] sm:$0xf0]  ;;  %v2219_v18 = vld [vmem:[%s3441_s1 + $0x4] sm:$0xf]  ;;  %v1698_v20 = vld [vmem:[%s3441_s1 + $0x8] sm:$0xf0]  ;;  %v1773_v32 = vor.u32 %v2237_v6, %v1770_v9  ;;  %v1829_v42 = vor.u32 %v2251_v15, %v1826_v16  ;;  %1484 = vperm.xlu0 %2357, %v212_v23  }
  0x5e   : > { %1331 = vmatpush.bf16.msra.mxu0 %v1725_v35  ;;  %v346_v13 = vld [vmem:[#allocation2 + $0x58] sm:$0x33]  ;;  %v2329_v24 = vld [vmem:[%s3441_s1 + $0x374] sm:$0xf]  ;;  %v1901_v33 = vor.u32 %v2269_v10, %v1898_v11  ;;  %v1701_v35 = vor.u32 %v2219_v18, %v1698_v20  ;;  %v1762_v36 = vld [vmem:[%s3441_s1 + $0x88] sm:$0xf0] }
  0x5f   : > { %1349 = vmatpush.bf16.msra.mxu1 %v1789_v57  ;;  %v345_v17 = vld [vmem:[#allocation2 + $0x50] sm:$0x33]  ;;  %v2138_v27 = vld [vmem:[%s3441_s1 + $0x378] sm:$0xf0]  ;;  %v509_v28 = vunpack.c.l.b16 %v346_v13  ;;  %v510_v29 = vunpack.c.h.b16 %v346_v13  ;;  %v2267_v43 = vld [vmem:[%s3441_s1 + $0x184] sm:$0xf] }
  0x60   : > { %1367 = vmatpush.bf16.msra.mxu2 %v1853_v34  ;;  %v507_v21 = vunpack.c.l.b16 %v345_v17  ;;  %v508_v22 = vunpack.c.h.b16 %v345_v17  ;;  %v2235_v34 = vld [vmem:[%s3441_s1 + $0x84] sm:$0xf]  ;;  %v2297_v37 = vld [vmem:[%s3441_s1 + $0x274] sm:$0xf]  ;;  %v2010_v38 = vld [vmem:[%s3441_s1 + $0x278] sm:$0xf0]  ;;  %v2141_v3 = vor.u32 %v2329_v24, %v2138_v27 }
  0x61   : > { %1385 = vmatpush.bf16.msra.mxu3 %v1917_v14  ;;  %v1890_v48 = vld [vmem:[%s3441_s1 + $0x188] sm:$0xf0]  ;;  %v2013_v49 = vor.u32 %v2297_v37, %v2010_v38  ;;  %v2313_v50 = vld [vmem:[%s3441_s1 + $0x2f4] sm:$0xf]  ;;  %v2074_v52 = vld [vmem:[%s3441_s1 + $0x2f8] sm:$0xf0]  ;;  %v1765_v55 = vor.u32 %v2235_v34, %v1762_v36  ;;  %v3208_v46 = vpack.c.b16 %v509_v28, %v509_v28  ;;  %v3210_v61 = vpack.c.b16 %v510_v29, %v510_v29 }
  0x62   : > { %1332 = vmatpush.bf16.msra.mxu0 %v1717_v59  ;;  %v3166_v39 = vpack.c.b16 %v507_v21, %v507_v21  ;;  %v3168_v40 = vpack.c.b16 %v508_v22, %v508_v22  ;;  %v2345_v53 = vld [vmem:[%s3441_s1 + $0x3f4] sm:$0xf]  ;;  %v2202_v54 = vld [vmem:[%s3441_s1 + $0x3f8] sm:$0xf0]  ;;  %v2327_v57 = vld [vmem:[%s3441_s1 + $0x364] sm:$0xf]  ;;  %v1893_v56 = vor.u32 %v2267_v43, %v1890_v48  ;;  %v2077_v62 = vor.u32 %v2313_v50, %v2074_v52 }
  0x63   : > { %1350 = vmatpush.bf16.msra.mxu1 %v1781_v1  ;;  %v2130_v14 = vld [vmem:[%s3441_s1 + $0x368] sm:$0xf0]  ;;  %v2295_v59 = vld [vmem:[%s3441_s1 + $0x264] sm:$0xf]  ;;  %v2205_v63 = vor.u32 %v2345_v53, %v2202_v54  ;;  %v2122_v9 = vld [vmem:[%s3441_s1 + $0x358] sm:$0xf0] }
  0x64   : > { %1368 = vmatpush.bf16.msra.mxu2 %v1845_v58  ;;  %1268 = vmatmul.bf16.gmra.mxu0 %v3166_v39  ;;  %v213_v58 = vld [vmem:[%s3442_s2 + $0x10] sm:$0xf]  ;;  %v2002_v60 = vld [vmem:[%s3441_s1 + $0x268] sm:$0xf0]  ;;  %v2311_v0 = vld [vmem:[%s3441_s1 + $0x2e4] sm:$0xf]  ;;  %v2133_v1 = vor.u32 %v2327_v57, %v2130_v14 }
  0x65   : > { %1386 = vmatpush.bf16.msra.mxu3 %v1909_v2  ;;  %1286 = vmatmul.bf16.gmra.mxu1 %v3168_v40  ;;  %v2066_v45 = vld [vmem:[%s3441_s1 + $0x2e8] sm:$0xf0]  ;;  %v2005_v2 = vor.u32 %v2295_v59, %v2002_v60  ;;  %v2343_v6 = vld [vmem:[%s3441_s1 + $0x3e4] sm:$0xf]  ;;  %v2293_v10 = vld [vmem:[%s3441_s1 + $0x254] sm:$0xf] }
  0x66   : > { %1333 = vmatpush.bf16.msra.mxu0 %v1709_v8  ;;  %1489 = vperm.xlu1 %2358, %v213_v58   ;;  %v2325_v8 = vld [vmem:[%s3441_s1 + $0x354] sm:$0xf]  ;;  %v1994_v11 = vld [vmem:[%s3441_s1 + $0x258] sm:$0xf0]  ;;  %v2069_v13 = vor.u32 %v2311_v0, %v2066_v45  ;;  %v2323_v23 = vld [vmem:[%s3441_s1 + $0x344] sm:$0xf] }
  0x67   : > { %1351 = vmatpush.bf16.msra.mxu1 %v1773_v32  ;;  %v2309_v16 = vld [vmem:[%s3441_s1 + $0x2d4] sm:$0xf]  ;;  %v2125_v17 = vor.u32 %v2325_v8, %v2122_v9  ;;  %v1997_v18 = vor.u32 %v2293_v10, %v1994_v11  ;;  %v2058_v20 = vld [vmem:[%s3441_s1 + $0x2d8] sm:$0xf0]  ;;  %v2114_v24 = vld [vmem:[%s3441_s1 + $0x348] sm:$0xf0] }
  0x68   : > { %1369 = vmatpush.bf16.msra.mxu2 %v1837_v7  ;;  %v2194_v7 = vld [vmem:[%s3441_s1 + $0x3e8] sm:$0xf0]  ;;  %v2341_v21 = vld [vmem:[%s3441_s1 + $0x3d4] sm:$0xf]  ;;  %v2186_v22 = vld [vmem:[%s3441_s1 + $0x3d8] sm:$0xf0]  ;;  %v2061_v29 = vor.u32 %v2309_v16, %v2058_v20 }
  0x69   : > { %1387 = vmatpush.bf16.msra.mxu3 %v1901_v33  ;;  %v2197_v15 = vor.u32 %v2343_v6, %v2194_v7  ;;  %v2291_v27 = vld [vmem:[%s3441_s1 + $0x244] sm:$0xf]  ;;  %v1986_v28 = vld [vmem:[%s3441_s1 + $0x248] sm:$0xf0]  ;;  %v2189_v32 = vor.u32 %v2341_v21, %v2186_v22  ;;  %v2321_v36 = vld [vmem:[%s3441_s1 + $0x334] sm:$0xf] }
  0x6a   : > { %1334 = vmatpush.bf16.msra.mxu0 %v1701_v35  ;;  %1304 = vmatmul.bf16.gmra.mxu2 %v3208_v46  ;;  %v2307_v33 = vld [vmem:[%s3441_s1 + $0x2c4] sm:$0xf]  ;;  %v2050_v34 = vld [vmem:[%s3441_s1 + $0x2c8] sm:$0xf0]  ;;  %v1989_v35 = vor.u32 %v2291_v27, %v1986_v28  ;;  %v2106_v43 = vld [vmem:[%s3441_s1 + $0x338] sm:$0xf0] }
  0x6b   : > { %1352 = vmatpush.bf16.msra.mxu1 %v1765_v55  ;;  %1322 = vmatmul.bf16.gmra.mxu3 %v3210_v61  ;;  %v2339_v37 = vld [vmem:[%s3441_s1 + $0x3c4] sm:$0xf]  ;;  %v2178_v38 = vld [vmem:[%s3441_s1 + $0x3c8] sm:$0xf0]  ;;  %v2289_v48 = vld [vmem:[%s3441_s1 + $0x234] sm:$0xf]  ;;  %v2109_v14 = vor.u32 %v2321_v36, %v2106_v43 }
  0x6c   : > { %1370 = vmatpush.bf16.msra.mxu2 %v1829_v42  ;;  %v2117_v42 = vor.u32 %v2323_v23, %v2114_v24  ;;  %v2181_v50 = vor.u32 %v2339_v37, %v2178_v38  ;;  %v2305_v52 = vld [vmem:[%s3441_s1 + $0x2b4] sm:$0xf]  ;;  %v2042_v53 = vld [vmem:[%s3441_s1 + $0x2b8] sm:$0xf0]  ;;  %v1970_v58 = vld [vmem:[%s3441_s1 + $0x228] sm:$0xf0] }
  0x6d   : > { %1388 = vmatpush.bf16.msra.mxu3 %v1893_v56  ;;  %v2337_v54 = vld [vmem:[%s3441_s1 + $0x3b4] sm:$0xf]  ;;  %v2170_v57 = vld [vmem:[%s3441_s1 + $0x3b8] sm:$0xf0]  ;;  %v2287_v56 = vld [vmem:[%s3441_s1 + $0x224] sm:$0xf]  ;;  %v2045_v59 = vor.u32 %v2305_v52, %v2042_v53 }
  0x6e   : > { %1399 = vmatpush.bf16.msrb.mxu0 %v2013_v49  ;;  %v2053_v49 = vor.u32 %v2307_v33, %v2050_v34  ;;  %v2173_v60 = vor.u32 %v2337_v54, %v2170_v57  ;;  %v2335_v0 = vld [vmem:[%s3441_s1 + $0x3a4] sm:$0xf]  ;;  %v2162_v45 = vld [vmem:[%s3441_s1 + $0x3a8] sm:$0xf0]  ;;  %v2317_v6 = vld [vmem:[%s3441_s1 + $0x314] sm:$0xf] }
  0x6f   : > { %1417 = vmatpush.bf16.msrb.mxu1 %v2077_v62  ;;  %v2303_v62 = vld [vmem:[%s3441_s1 + $0x2a4] sm:$0xf]  ;;  %v2090_v7 = vld [vmem:[%s3441_s1 + $0x318] sm:$0xf0]  ;;  %v2285_v8 = vld [vmem:[%s3441_s1 + $0x214] sm:$0xf]  ;;  %v2165_v11 = vor.u32 %v2335_v0, %v2162_v45 }
  0x70   : > { %1435 = vmatpush.bf16.msrb.mxu2 %v2141_v3  ;;  %v1978_v3 = vld [vmem:[%s3441_s1 + $0x238] sm:$0xf0]  ;;  %v2093_v16 = vor.u32 %v2317_v6, %v2090_v7  ;;  %v2082_v20 = vld [vmem:[%s3441_s1 + $0x308] sm:$0xf0]  ;;  %v2283_v21 = vld [vmem:[%s3441_s1 + $0x204] sm:$0xf] }
  0x71   : > { %1453 = vmatpush.bf16.msrb.mxu3 %v2205_v63  ;;  %v1981_v55 = vor.u32 %v2289_v48, %v1978_v3  ;;  %v2034_v63 = vld [vmem:[%s3441_s1 + $0x2a8] sm:$0xf0]  ;;  %v1962_v9 = vld [vmem:[%s3441_s1 + $0x218] sm:$0xf0]  ;;  %v2299_v27 = vld [vmem:[%s3441_s1 + $0x284] sm:$0xf] }
  0x72   : > { %1400 = vmatpush.bf16.msrb.mxu0 %v2005_v2  ;;  %v1973_v2 = vor.u32 %v2287_v56, %v1970_v58  ;;  %v2037_v10 = vor.u32 %v2303_v62, %v2034_v63  ;;  %v1954_v22 = vld [vmem:[%s3441_s1 + $0x208] sm:$0xf0] }
  0x73   : > { %1418 = vmatpush.bf16.msrb.mxu1 %v2069_v13  ;;  %v2333_v13 = vld [vmem:[%s3441_s1 + $0x394] sm:$0xf]  ;;  %v2018_v28 = vld [vmem:[%s3441_s1 + $0x288] sm:$0xf0]  ;;  %v1957_v34 = vor.u32 %v2283_v21, %v1954_v22 }
  0x74   : > { %1436 = vmatpush.bf16.msrb.mxu2 %v2133_v1  ;;  %1335 = vmatmul.bf16.vlgmr.msra.gmra.mxu0 %v2709_v25  ;;  %v2319_v25 = vld [vmem:[%s3441_s1 + $0x324] sm:$0xf]  ;;  %v2021_v37 = vor.u32 %v2299_v27, %v2018_v28 }
  0x75   : > { %1454 = vmatpush.bf16.msrb.mxu3 %v2197_v15  ;;  %1353 = vmatmul.bf16.vlgmr.msra.gmra.mxu1 %v2711_v26  ;;  %v2098_v26 = vld [vmem:[%s3441_s1 + $0x328] sm:$0xf0]  ;;  %v2154_v15 = vld [vmem:[%s3441_s1 + $0x398] sm:$0xf0] }
  0x76   : > { %1401 = vmatpush.bf16.msrb.mxu0 %v1997_v18  ;;  %v2101_v1 = vor.u32 %v2319_v25, %v2098_v26  ;;  %v2315_v18 = vld [vmem:[%s3441_s1 + $0x304] sm:$0xf]  ;;  %v2157_v24 = vor.u32 %v2333_v13, %v2154_v15 }
  0x77   : > { %1419 = vmatpush.bf16.msrb.mxu1 %v2061_v29  ;;  %v2331_v29 = vld [vmem:[%s3441_s1 + $0x384] sm:$0xf]  ;;  %v2085_v33 = vor.u32 %v2315_v18, %v2082_v20 }
  0x78   : > { %1437 = vmatpush.bf16.msrb.mxu2 %v2125_v17  ;;  %v1965_v17 = vor.u32 %v2285_v8, %v1962_v9 }
  0x79   : > { %1455 = vmatpush.bf16.msrb.mxu3 %v2189_v32  ;;  %v2146_v32 = vld [vmem:[%s3441_s1 + $0x388] sm:$0xf0] }
  0x7a   : > { %1402 = vmatpush.bf16.msrb.mxu0 %v1989_v35  ;;  %1371 = vmatmul.bf16.vlgmr.msra.gmra.mxu2 %v2780_v4  ;;  %v2301_v4 = vld [vmem:[%s3441_s1 + $0x294] sm:$0xf]  ;;  %v2149_v38 = vor.u32 %v2331_v29, %v2146_v32 }
  0x7b   : > { %1420 = vmatpush.bf16.msrb.mxu1 %v2053_v49  ;;  %1389 = vmatmul.bf16.vlgmr.msra.gmra.mxu3 %v2782_v5  ;;  %v2026_v5 = vld [vmem:[%s3441_s1 + $0x298] sm:$0xf0] }
  0x7c   : > { %1438 = vmatpush.bf16.msrb.mxu2 %v2117_v42  ;;  %v2029_v23 = vor.u32 %v2301_v4, %v2026_v5 }
  0x7d   : > { %1456 = vmatpush.bf16.msrb.mxu3 %v2181_v50 }
  0x7e   : > { %1403 = vmatpush.bf16.msrb.mxu0 %v1981_v55 }
  0x7f   : > { %1421 = vmatpush.bf16.msrb.mxu1 %v2045_v59 }
  0x80   : > { %1439 = vmatpush.bf16.msrb.mxu2 %v2109_v14 }
  0x81   : > { %1457 = vmatpush.bf16.msrb.mxu3 %v2173_v60 }
  0x82   : > { %1404 = vmatpush.bf16.msrb.mxu0 %v1973_v2 }
  0x83   : > { %1422 = vmatpush.bf16.msrb.mxu1 %v2037_v10 }
  0x84   : > { %1440 = vmatpush.bf16.msrb.mxu2 %v2101_v1  ;;  %1340 = vmatmul.bf16.gmra.mxu0 %v2843_v30 }
  0x85   : > { %1458 = vmatpush.bf16.msrb.mxu3 %v2165_v11  ;;  %1358 = vmatmul.bf16.gmra.mxu1 %v2845_v31 }
  0x86   : > { %1405 = vmatpush.bf16.msrb.mxu0 %v1965_v17 }
  0x87   : > { %1423 = vmatpush.bf16.msrb.mxu1 %v2029_v23 }
  0x88   : > { %1441 = vmatpush.bf16.msrb.mxu2 %v2093_v16 }
  0x89   : > { %1459 = vmatpush.bf16.msrb.mxu3 %v2157_v24 }
  0x8a   : > { %1406 = vmatpush.bf16.msrb.mxu0 %v1957_v34  ;;  %1376 = vmatmul.bf16.gmra.mxu2 %v2889_v51 }
  0x8b   : > { %1424 = vmatpush.bf16.msrb.mxu1 %v2021_v37  ;;  %1394 = vmatmul.bf16.gmra.mxu3 %v2949_v19 }
  0x8c   : > { %1442 = vmatpush.bf16.msrb.mxu2 %v2085_v33 }
  0x8d   : > { %1460 = vmatpush.bf16.msrb.mxu3 %v2149_v38 }
  0x94   : > { %1407 = vmatmul.bf16.vlgmr.msrb.gmra.mxu0 %v3035_v41 }
  0x95   : > { %1425 = vmatmul.bf16.vlgmr.msrb.gmra.mxu1 %v3037_v12 }
  0x9a   : > { %1443 = vmatmul.bf16.vlgmr.msrb.gmra.mxu2 %v3072_v44 }
  0x9b   : > { %1461 = vmatmul.bf16.vlgmr.msrb.gmra.mxu3 %v3074_v47 }
  0xa4   : > { %1412 = vmatmul.bf16.gmra.mxu0 %v3166_v39 }
  0xa5   : > { %1430 = vmatmul.bf16.gmra.mxu1 %v3168_v40 }
  0xaa   : > { %1448 = vmatmul.bf16.gmra.mxu2 %v3208_v46 }
  0xab   : > { %1466 = vmatmul.bf16.gmra.mxu3 %v3210_v61 }
  0xad   : > { %v1192_v30 = vpop.f32.mrf.mxu0 }
  0xae   : > { %v1210_v31 = vpop.f32.mrf.mxu1 }
  0xaf   : > { %v1211_v51 = vadd.f32 %v1210_v31, %v1192_v30 }
  0xb5   : > { %v1194_v19 = vpop.f32.mrf.mxu0 }
  0xb6   : > { %v1212_v42 = vpop.f32.mrf.mxu1 }
  0xb7   : > { %v1213_v41 = vadd.f32 %v1212_v42, %v1194_v19 }
  0xbd   : > { %v1228_v35 = vpop.f32.mrf.mxu2  ;;  %v1197_v44 = vpop.f32.mrf.mxu0 }
  0xbe   : > { %v1246_v12 = vpop.f32.mrf.mxu3  ;;  %v1229_v36 = vadd.f32 %v1228_v35, %v1211_v51  ;;  %v1215_v43 = vpop.f32.mrf.mxu1 }
  0xbf   : > { %v1216_v47 = vadd.f32 %v1215_v43, %v1197_v44 }
  0xc0   : > { %v1247_v48 = vadd.f32 %v1246_v12, %v1229_v36 }
  0xc5   : > { %v1230_v39 = vpop.f32.mrf.mxu2  ;;  %v1199_v49 = vpop.f32.mrf.mxu0 }
  0xc6   : > { %v1248_v3 = vpop.f32.mrf.mxu3  ;;  %v1231_v40 = vadd.f32 %v1230_v39, %v1213_v41  ;;  %v1217_v46 = vpop.f32.mrf.mxu1 }
  0xc7   : > { %v3386_v63 = vpop.permute.xlu0 %1479 }
  0xc8   : > { %v1249_v50 = vadd.f32 %v1248_v3, %v1231_v40 }
  0xcd   : > { %v1233_v61 = vpop.f32.mrf.mxu2 }
  0xce   : > { %v1251_v52 = vpop.f32.mrf.mxu3  ;;  %v1234_v53 = vadd.f32 %v1233_v61, %v1216_v47 }
  0xcf   : > { %v3390_v5 = vpop.permute.xlu0 %1484 }
  0xd0   : > { %v1252_v54 = vadd.f32 %v1251_v52, %v1234_v53  ;;  %v1264_v57 = vpop.f32.mrf.mxu0 }
  0xd1   : > { %v1282_v14 = vpop.f32.mrf.mxu1  ;;  %v1265_v55 = vadd.f32 %v1264_v57, %v1247_v48 }
  0xd3   : > { %v1283_v25 = vadd.f32 %v1282_v14, %v1265_v55 }
  0xd5   : > { %v1235_v26 = vpop.f32.mrf.mxu2 }
  0xd6   : > { %v1253_v56 = vpop.f32.mrf.mxu3 }
  0xd8   : > { %v1266_v58 = vpop.f32.mrf.mxu0  ;;  %v3398_v29 = vpop.permute.xlu1 %1489 }
  0xd9   : > { %v1284_v59 = vpop.f32.mrf.mxu1  ;;  %v1267_v60 = vadd.f32 %v1266_v58, %v1249_v50 }
  0xdb   : > { %v1285_v62 = vadd.f32 %v1284_v59, %v1267_v60 }
  0xdd   : > { %v1300_v0 = vpop.f32.mrf.mxu2 }
  0xde   : > { %v1318_v45 = vpop.f32.mrf.mxu3  ;;  %v1301_v1 = vadd.f32 %v1300_v0, %v1283_v25 }
  0xe0   : > { %v3388_v2 = vadd.f32 %v1318_v45, %v1301_v1 }
  0xe1   : > { %v1269_v6 = vpop.f32.mrf.mxu0 }
  0xe2   : > { %v1287_v7 = vpop.f32.mrf.mxu1  ;;  %v1270_v8 = vadd.f32 %v1269_v6, %v1252_v54  ;;  %v1492_v13 = vmul.f32 %v3386_v63, %v3388_v2 }
  0xe4   : > { %v1288_v9 = vadd.f32 %v1287_v7, %v1270_v8  ;;  %v1519_v20 = vmul.f32 %v1492_v13, %v1492_v13 }
  0xe5   : > { %v1302_v10 = vpop.f32.mrf.mxu2 }
  0xe6   : > { %v1320_v11 = vpop.f32.mrf.mxu3  ;;  %v1303_v4 = vadd.f32 %v1302_v10, %v1285_v62 }
  0xe8   : > { %v3394_v15 = vadd.f32 %v1320_v11, %v1303_v4 }
  0xe9   : > { %v1271_v16 = vpop.f32.mrf.mxu0 }
  0xea   : > { %v1289_v17 = vpop.f32.mrf.mxu1  ;;  %v1494_v18 = vmul.f32 %v3390_v5, %v3394_v15 }
  0xec   : > { %v1498_v21 = vadd.f32 %v1494_v18, %v1492_v13  ;;  %v1521_v22 = vmul.f32 %v1494_v18, %v1494_v18 }
  0xed   : > { %v1305_v23 = vpop.f32.mrf.mxu2 }
  0xee   : > { %v1323_v24 = vpop.f32.mrf.mxu3  ;;  %v1525_v27 = vadd.f32 %v1521_v22, %v1519_v20  ;;  %v1306_v28 = vadd.f32 %v1305_v23, %v1288_v9 }
  0xf0   : > { %v3400_v32 = vadd.f32 %v1323_v24, %v1306_v28 }
  0xf1   : > { %v1336_v33 = vpop.f32.mrf.mxu0 }
  0xf2   : > { %v1354_v34 = vpop.f32.mrf.mxu1  ;;  %v1496_v37 = vmul.f32 %v3398_v29, %v3400_v32 }
  0xf3   : > { %v1355_v50 = vadd.f32 %v1354_v34, %v1336_v33 }
  0xf4   : > { %v1500_v38 = vsel %vm1499_vm9, %v1496_v37, 0.0  ;;  %v1523_v30 = vmul.f32 %v1496_v37, %v1496_v37 }
  0xf5   : > { %v3405_v31 = vadd.f32 %v1500_v38, %v1498_v21  ;;  %v1307_v51 = vpop.f32.mrf.mxu2 }
  0xf6   : > { %v1325_v19 = vpop.f32.mrf.mxu3  ;;  %v1526_v42 = vsel %vm1499_vm9, %v1523_v30, 0.0 }
  0xf7   : > { %v3408_v41 = vadd.f32 %v1526_v42, %v1525_v27  ;;  %v1502_v37 = vrot.slane %v3405_v31, 4 }
  0xf9   : > { %v1338_v35 = vpop.f32.mrf.mxu0  ;;  %v1528_v51 = vrot.slane %v3408_v41, 4 }
  0xfa   : > { %v1356_v12 = vpop.f32.mrf.mxu1 }
  0xfb   : > { %v1357_v55 = vadd.f32 %v1356_v12, %v1338_v35  ;;  %v1503_v35 = vadd.f32 %v1502_v37, %v3405_v31 }
  0xfd   : > { %v1372_v36 = vpop.f32.mrf.mxu2 }
  0xfe   : > { %v1390_v44 = vpop.f32.mrf.mxu3  ;;  %v1373_v53 = vadd.f32 %v1372_v36, %v1355_v50 }
 0x100   : > { %v1391_v14 = vadd.f32 %v1390_v44, %v1373_v53 }
 0x101   : > { %v1341_v43 = vpop.f32.mrf.mxu0 }
 0x102   : > { %v1359_v47 = vpop.f32.mrf.mxu1 }
 0x103   : > { %v1360_v1 = vadd.f32 %v1359_v47, %v1341_v43  ;;  %v1529_v43 = vadd.f32 %v1528_v51, %v3408_v41 }
 0x105   : > { %v1374_v48 = vpop.f32.mrf.mxu2 }
 0x106   : > { %v1392_v39 = vpop.f32.mrf.mxu3  ;;  %v1375_v58 = vadd.f32 %v1374_v48, %v1357_v55 }
 0x108   : > { %v1393_v0 = vadd.f32 %v1392_v39, %v1375_v58 }
 0x109   : > { %v1343_v3 = vpop.f32.mrf.mxu0 }
 0x10a   : > { %v1361_v40 = vpop.f32.mrf.mxu1 }
 0x10b   : > { %v1504_v40 = vrot.slane %v1503_v35, 2 }
 0x10d   : > { %v1377_v49 = vpop.f32.mrf.mxu2  ;;  %v1505_v50 = vadd.f32 %v1504_v40, %v1503_v35 }
 0x10e   : > { %v1395_v46 = vpop.f32.mrf.mxu3  ;;  %v1378_v10 = vadd.f32 %v1377_v49, %v1360_v1  ;;  %v1530_v49 = vrot.slane %v1529_v43, 2 }
 0x10f   : > { %v1506_v41 = vrot.slane %v1505_v50, 1 }
 0x110   : > { %v1396_v17 = vadd.f32 %v1395_v46, %v1378_v10  ;;  %v1531_v53 = vadd.f32 %v1530_v49, %v1529_v43 }
 0x111   : > { %v1408_v61 = vpop.f32.mrf.mxu0 }
 0x112   : > { %v1426_v52 = vpop.f32.mrf.mxu1  ;;  %v1409_v25 = vadd.f32 %v1408_v61, %v1391_v14 }
 0x114   : > { %v1427_v59 = vadd.f32 %v1426_v52, %v1409_v25  ;;  %v1551_v25 = vlaneseq }
 0x115   : > { %v1379_v54 = vpop.f32.mrf.mxu2 }
 0x116   : > { %v1397_v57 = vpop.f32.mrf.mxu3  ;;  %vm1553_vm10 = vcmp.lt.s32.totalorder %v1551_v25, 256 }
 0x119   : > { %v1410_v26 = vpop.f32.mrf.mxu0 }
 0x11a   : > { %v1428_v56 = vpop.f32.mrf.mxu1  ;;  %v1411_v7 = vadd.f32 %v1410_v26, %v1393_v0  ;;  %v1532_v26 = vrot.slane %v1531_v53, 1 }
 0x11c   : > { %v1429_v4 = vadd.f32 %v1428_v56, %v1411_v7  ;;  %v1533_v0 = vadd.f32 %v1532_v26, %v1531_v53 }
 0x11d   : > { %v1444_v60 = vpop.f32.mrf.mxu2 }
 0x11e   : > { %v1462_v62 = vpop.f32.mrf.mxu3  ;;  %v1445_v45 = vadd.f32 %v1444_v60, %v1427_v59  ;;  %v1507_v59 = vadd.f32 %v1506_v41, %v1505_v50 }
 0x120   : > { %v1463_v6 = vadd.f32 %v1462_v62, %v1445_v45 }
 0x121   : > { %v1413_v8 = vpop.f32.mrf.mxu0 }
 0x122   : > { %v1431_v9 = vpop.f32.mrf.mxu1  ;;  %v1471_v11 = vpack.c.bf16 %v1463_v6, %v3388_v2  ;;  %v1414_v21 = vadd.f32 %v1413_v8, %v1396_v17  ;;  %v1493_v38 = vmul.f32 %v3386_v63, %v1463_v6 }
 0x124   : > { %1474 = vst [vmem:[%s3414_s21] sm:$0xff] %v1471_v11  ;;  %v1432_v27 = vadd.f32 %v1431_v9, %v1414_v21  ;;  %v1520_v12 = vmul.f32 %v1493_v38, %v1493_v38 }
 0x125   : > { %v1446_v13 = vpop.f32.mrf.mxu2 }
 0x126   : > { %v1464_v16 = vpop.f32.mrf.mxu3  ;;  %v1447_v18 = vadd.f32 %v1446_v13, %v1429_v4 }
 0x128   : > { %v1465_v20 = vadd.f32 %v1464_v16, %v1447_v18 }
 0x129   : > { %v1415_v22 = vpop.f32.mrf.mxu0 }
 0x12a   : > { %v1433_v23 = vpop.f32.mrf.mxu1  ;;  %v1472_v24 = vpack.c.bf16 %v1465_v20, %v3394_v15  ;;  %v1495_v28 = vmul.f32 %v3390_v5, %v1465_v20 }
 0x12c   : > { %1475 = vst [vmem:[%s3414_s21 + $0x8] sm:$0xff] %v1472_v24  ;;  %v1522_v19 = vmul.f32 %v1495_v28, %v1495_v28  ;;  %v1508_v36 = vadd.f32 %v1495_v28, %v1493_v38 }
 0x12d   : > { %v1449_v33 = vpop.f32.mrf.mxu2 }
 0x12e   : > { %v1467_v34 = vpop.f32.mrf.mxu3  ;;  %v1450_v2 = vadd.f32 %v1449_v33, %v1432_v27  ;;  %v1534_v47 = vadd.f32 %v1522_v19, %v1520_v12 }
 0x130   : > { %v1468_v30 = vadd.f32 %v1467_v34, %v1450_v2 }
 0x132   : > { %v1473_v42 = vpack.c.bf16 %v1468_v30, %v3400_v32  ;;  %v1497_v15 = vmul.f32 %v3398_v29, %v1468_v30 }
 0x134   : > { %1476 = vst [vmem:[%s3414_s21 + $0x10] sm:$0x33] %v1473_v42  ;;  %v1509_v5 = vsel %vm1499_vm9, %v1497_v15, 0.0  ;;  %v1524_v44 = vmul.f32 %v1497_v15, %v1497_v15 }
 0x135   : > { %v1510_v63 = vadd.f32 %v1509_v5, %v1508_v36  ;;  %v1451_v48 = vpop.f32.mrf.mxu2 }
 0x136   : > { %v1469_v39 = vpop.f32.mrf.mxu3  ;;  %v1535_v3 = vsel %vm1499_vm9, %v1524_v44, 0.0 }
 0x137   : > { %v1511_v32 = vrot.slane %v1510_v63, 4  ;;  %v1536_v29 = vadd.f32 %v1535_v3, %v1534_v47 }
 0x139   : > { %v1512_v31 = vadd.f32 %v1511_v32, %v1510_v63  ;;  %v1537_v46 = vrot.slane %v1536_v29, 4 }
 0x13b   : > { %v1513_v61 = vrot.slane %v1512_v31, 2  ;;  %v1538_v52 = vadd.f32 %v1537_v46, %v1536_v29 }
 0x13d   : > { %v1514_v54 = vadd.f32 %v1513_v61, %v1512_v31  ;;  %v1539_v57 = vrot.slane %v1538_v52, 2 }
 0x13f   : > { %v1515_v14 = vrot.slane %v1514_v54, 1  ;;  %v1540_v55 = vadd.f32 %v1539_v57, %v1538_v52 }
 0x141   : > { %v1516_v56 = vadd.f32 %v1515_v14, %v1514_v54  ;;  %v1541_v58 = vrot.slane %v1540_v55, 1 }
 0x143   : > { %v1542_v60 = vadd.f32 %v1541_v58, %v1540_v55  ;;  %v1547_v62 = vrot.slane %v1516_v56, 7 }
 0x145   : > { %v1549_v45 = vsel %vm316_vm5, %v1507_v59, %v1547_v62  ;;  %v1558_v1 = vrot.slane %v1542_v60, 7 }
 0x146   : > { %1555 = vst.msk [vmem:[%s210_s25] ss:$2 sm:$0x3] %vm1553_vm10, %v1549_v45 }
 0x147   : > { %v1559_v6 = vsel %vm316_vm5, %v1533_v0, %v1558_v1 }
 0x148   : > { %2206 = vst.msk [vmem:[%s210_s25 + $0x1] ss:$2 sm:$0x3] %vm1553_vm10, %v1559_v6 }
 0x149 PF: > { %s15_s15 = sadd.s32 1, %s2365_s15  }
 0x14a   : > { %p12_p4 = scmp.ge.s32.totalorder %s15_s15, 4  }
 0x14c   :  { %14 = sbr.rel (!%p12_p4) target bundleno = 1 (0x1), region = 75 }

// kernel: convnet_forward.13
= control target key start
LH: loop header
LB: loop body
LE: loop exit
PB: predicated region body
PF: predicated region fallthrough
CT: control target
= control target key end

     0   :  { %s314_s12 = smov 0   ;;  %s337_s0 = inlined_call_operand.vmem [shape: bf16[2,6,256], index: 0, kind: input, shape index: {}]   ;;  %s338_s1 = inlined_call_operand.vmem [shape: f32[1,64], index: 1, kind: input, shape index: {}]   ;;  %s339_s2 = inlined_call_operand.vmem [shape: f32[1,64], index: 2, kind: input, shape index: {}]   ;;  %s340_s3 = inlined_call_operand.vmem [shape: bf16[2,6,64], index: 3, kind: output, shape index: {}]  }
   0x1 LB: > { %s263_s13 = sadd.s32 4294967295, %s291_s12   ;;  %p267_p0 = scmp.ge.s32.totalorder %s291_s12, 1  ;;  %s291_s12 = sphi %s314_s12, %s13_s12  }
   0x2   : > { %p137_p1 = scmp.lt.s32.totalorder %s291_s12, 3 }
   0x4   : > { %p138_p2 = pnand %p267_p0, %p137_p1 }
   0x5   : > { %s293_s16 = smov (!%p138_p2), 64   ;;  %p160_p3 = scmp.lt.s32.totalorder (!%p138_p2), %s263_s13, 1 }
   0x6   : > { %141 = sbr.rel (%p138_p2) target bundleno = 267 (0x10b), region = 32 }
   0xb   : > { %v283_v0 = vld [vmem:[%s338_s1] ss:$0 sm:$0xff]  ;;  %s342_s13 = smov (!%p160_p3, %s263_s13), 1  ;;  %vm208_vm0 = vcmask 518144  }
   0xc   : > { %181 = vrot.lane.b32.xlu0 %v283_v0, %s293_s16  ;;  %v284_v1 = vld [vmem:[%s339_s2] ss:$0 sm:$0xff]  ;;  %s273_s19 = sshll.u32 %s342_s13, 3  ;;  %s270_s23 = sshll.u32 %s342_s13, 2 }
   0xd   : > { %s164_s22 = scalar_lea.vmem %s337_s0, %s273_s19  ;;  %s168_s26 = scalar_lea.vmem %s340_s3, %s270_s23 }
   0xe   : > { %v171_v3 = vld [vmem:[%s164_s22] sm:$0x7]  ;;  %v194_v6 = vld [vmem:[%s164_s22 + $0x4] sm:$0x7] }
   0xf   : > { %v172_v4 = vunpack.c.l.bf16 %v171_v3  ;;  %v195_v9 = vunpack.c.l.bf16 %v194_v6 }
  0x11   : > { %v176_v12 = vmul.f32 %v283_v0, %v172_v4  ;;  %v196_v13 = vmul.f32 %v283_v0, %v195_v9 }
  0x13   : > { %v180_v14 = vadd.f32 %v284_v1, %v176_v12  ;;  %v197_v17 = vadd.f32 %v284_v1, %v196_v13 }
  0x14   : > { %185 = vrot.lane.b32.xlu0 %v284_v1, %s293_s16 }
  0x7e   : > { %v182_v2 = vpop.permute.xlu0 %181 }
  0x7f   : > { %v184_v5 = vmul.f32 %v182_v2, %v172_v4  ;;  %v199_v10 = vmul.f32 %v195_v9, %v182_v2 }
  0x86   : > { %v186_v7 = vpop.permute.xlu0 %185 }
  0x87   : > { %v188_v8 = vadd.f32 %v186_v7, %v184_v5  ;;  %v200_v11 = vadd.f32 %v199_v10, %v186_v7 }
  0x89   : > { %190 = vrot.lane.b32.xlu1 %v188_v8, %s293_s16 }
  0x91   : > { %202 = vrot.lane.b32.xlu1 %v200_v11, %s293_s16 }
  0xfb   : > { %v191_v15 = vpop.permute.xlu1 %190 }
  0xfc   : > { %v193_v16 = vmax.f32 %v180_v14, %v191_v15 }
  0xfe   : > { %v198_v18 = vmax.f32 %v193_v16, %v197_v17 }
 0x103   : > { %v203_v19 = vpop.permute.xlu1 %202 }
 0x104   : > { %v205_v20 = vmax.f32 %v198_v18, %v203_v19 }
 0x106   : > { %v206_v21 = vmax.f32 %v205_v20, 0.0 }
 0x108   : > { %v207_v22 = vpack.c.bf16 %v206_v21, %v206_v21 }
 0x10a   : > { %209 = vst.msk [vmem:[%s168_s26] sm:$0x7] %vm208_vm0, %v207_v22 }
 0x10b PF: > { %s13_s12 = sadd.s32 1, %s291_s12  }
 0x10c   : > { %p10_p4 = scmp.ge.s32.totalorder %s13_s12, 4  }
 0x10e   :  { %12 = sbr.rel (!%p10_p4) target bundleno = 1 (0x1), region = 62 }

// kernel: convnet_forward.12
= control target key start
LH: loop header
LB: loop body
LE: loop exit
PB: predicated region body
PF: predicated region fallthrough
CT: control target
= control target key end

     0   :  { %s2120_s15 = smov 0   ;;  %s2983_s0 = inlined_call_operand.vmem [shape: bf16[2,16,256], index: 0, kind: input, shape index: {}]   ;;  %s2984_s1 = inlined_call_operand.vmem [shape: bf16[1024,256], index: 1, kind: input, shape index: {}]   ;;  %s2985_s2 = inlined_call_operand.vmem [shape: f32[6,1], index: 2, kind: input, shape index: {}]   ;;  %s2986_s3 = inlined_call_operand.vmem [shape: bf16[2,6,256], index: 3, kind: output, shape index: {0}]   ;;  %s2987_s4 = inlined_call_operand.vmem [shape: f32[2,2,256], index: 4, kind: output, shape index: {1}]  }
   0x1 LB: > { %s1418_s16 = sadd.s32 4294967295, %s2092_s15   ;;  %p1422_p0 = scmp.ge.s32.totalorder %s2092_s15, 1  ;;  %s2092_s15 = sphi %s2120_s15, %s15_s15  }
   0x2   : > { %p165_p1 = scmp.lt.s32.totalorder %s2092_s15, 3 }
   0x4   : > { %p166_p2 = pnand %p1422_p0, %p165_p1 }
   0x5   : > { %p196_p3 = scmp.lt.s32.totalorder (!%p166_p2), %s1418_s16, 1 }
   0x6   : > { %169 = sbr.rel (%p166_p2) target bundleno = 300 (0x12c), region = 32 }
   0xb   : > { %v1488_v0 = vld [vmem:[%s2984_s1 + $0x70] sm:$0xf]  ;;  %v1963_v1 = vld [vmem:[%s2984_s1 + $0x74] sm:$0xf0]  ;;  %v1480_v11 = vld [vmem:[%s2984_s1 + $0x60] sm:$0xf] }
   0xc   : > { %v1552_v2 = vld [vmem:[%s2984_s1 + $0xf0] sm:$0xf]  ;;  %v1489_v3 = vor.u32 %v1963_v1, %v1488_v0  ;;  %v1979_v4 = vld [vmem:[%s2984_s1 + $0xf4] sm:$0xf0]  ;;  %v1961_v13 = vld [vmem:[%s2984_s1 + $0x64] sm:$0xf0] }
   0xd   : > { %v1616_v5 = vld [vmem:[%s2984_s1 + $0x170] sm:$0xf]  ;;  %v1995_v6 = vld [vmem:[%s2984_s1 + $0x174] sm:$0xf0]  ;;  %v1553_v7 = vor.u32 %v1979_v4, %v1552_v2  ;;  %v1544_v14 = vld [vmem:[%s2984_s1 + $0xe0] sm:$0xf]  ;;  %v1481_v16 = vor.u32 %v1961_v13, %v1480_v11 }
   0xe   : > { %v1617_v8 = vor.u32 %v1995_v6, %v1616_v5  ;;  %v1680_v9 = vld [vmem:[%s2984_s1 + $0x1f0] sm:$0xf]  ;;  %v2011_v10 = vld [vmem:[%s2984_s1 + $0x1f4] sm:$0xf0]  ;;  %1060 = vmatpush.bf16.msra.mxu0 %v1489_v3  ;;  %v1977_v15 = vld [vmem:[%s2984_s1 + $0xe4] sm:$0xf0] }
   0xf   : > { %v1681_v12 = vor.u32 %v2011_v10, %v1680_v9  ;;  %1073 = vmatpush.bf16.msra.mxu1 %v1553_v7  ;;  %v1545_v17 = vor.u32 %v1977_v15, %v1544_v14  ;;  %v1608_v18 = vld [vmem:[%s2984_s1 + $0x160] sm:$0xf]  ;;  %v1993_v19 = vld [vmem:[%s2984_s1 + $0x164] sm:$0xf0]  ;;  %v1472_v23 = vld [vmem:[%s2984_s1 + $0x50] sm:$0xf] }
  0x10   : > { %1086 = vmatpush.bf16.msra.mxu2 %v1617_v8  ;;  %v1672_v20 = vld [vmem:[%s2984_s1 + $0x1e0] sm:$0xf]  ;;  %v1609_v21 = vor.u32 %v1993_v19, %v1608_v18  ;;  %v2009_v22 = vld [vmem:[%s2984_s1 + $0x1e4] sm:$0xf0]  ;;  %v1959_v24 = vld [vmem:[%s2984_s1 + $0x54] sm:$0xf0] }
  0x11   : > { %1099 = vmatpush.bf16.msra.mxu3 %v1681_v12  ;;  %v1673_v25 = vor.u32 %v2009_v22, %v1672_v20  ;;  %v1536_v26 = vld [vmem:[%s2984_s1 + $0xd0] sm:$0xf]  ;;  %v1975_v27 = vld [vmem:[%s2984_s1 + $0xd4] sm:$0xf0]  ;;  %v1473_v29 = vor.u32 %v1959_v24, %v1472_v23  ;;  %v1464_v35 = vld [vmem:[%s2984_s1 + $0x40] sm:$0xf] }
  0x12   : > { %v1600_v28 = vld [vmem:[%s2984_s1 + $0x150] sm:$0xf]  ;;  %1061 = vmatpush.bf16.msra.mxu0 %v1481_v16  ;;  %v1991_v30 = vld [vmem:[%s2984_s1 + $0x154] sm:$0xf0]  ;;  %v1537_v33 = vor.u32 %v1975_v27, %v1536_v26  ;;  %v1957_v36 = vld [vmem:[%s2984_s1 + $0x44] sm:$0xf0] }
  0x13   : > { %v1664_v31 = vld [vmem:[%s2984_s1 + $0x1d0] sm:$0xf]  ;;  %v2007_v32 = vld [vmem:[%s2984_s1 + $0x1d4] sm:$0xf0]  ;;  %1074 = vmatpush.bf16.msra.mxu1 %v1545_v17  ;;  %v1601_v34 = vor.u32 %v1991_v30, %v1600_v28  ;;  %v1528_v37 = vld [vmem:[%s2984_s1 + $0xc0] sm:$0xf]  ;;  %v1465_v44 = vor.u32 %v1957_v36, %v1464_v35 }
  0x14   : > { %1087 = vmatpush.bf16.msra.mxu2 %v1609_v21  ;;  %v1665_v38 = vor.u32 %v2007_v32, %v1664_v31  ;;  %v1973_v39 = vld [vmem:[%s2984_s1 + $0xc4] sm:$0xf0]  ;;  %v1592_v40 = vld [vmem:[%s2984_s1 + $0x140] sm:$0xf]  ;;  %v1456_v47 = vld [vmem:[%s2984_s1 + $0x30] sm:$0xf] }
  0x15   : > { %1100 = vmatpush.bf16.msra.mxu3 %v1673_v25  ;;  %v1989_v41 = vld [vmem:[%s2984_s1 + $0x144] sm:$0xf0]  ;;  %v1656_v42 = vld [vmem:[%s2984_s1 + $0x1c0] sm:$0xf]  ;;  %v1529_v45 = vor.u32 %v1973_v39, %v1528_v37  ;;  %v1955_v48 = vld [vmem:[%s2984_s1 + $0x34] sm:$0xf0] }
  0x16   : > { %v2005_v43 = vld [vmem:[%s2984_s1 + $0x1c4] sm:$0xf0]  ;;  %1062 = vmatpush.bf16.msra.mxu0 %v1473_v29  ;;  %v1593_v46 = vor.u32 %v1989_v41, %v1592_v40  ;;  %v1520_v49 = vld [vmem:[%s2984_s1 + $0xb0] sm:$0xf]  ;;  %v1971_v51 = vld [vmem:[%s2984_s1 + $0xb4] sm:$0xf0]  ;;  %v1457_v56 = vor.u32 %v1955_v48, %v1456_v47 }
  0x17   : > { %1075 = vmatpush.bf16.msra.mxu1 %v1537_v33  ;;  %v1657_v50 = vor.u32 %v2005_v43, %v1656_v42  ;;  %v1584_v52 = vld [vmem:[%s2984_s1 + $0x130] sm:$0xf]  ;;  %v1987_v53 = vld [vmem:[%s2984_s1 + $0x134] sm:$0xf0]  ;;  %v1521_v57 = vor.u32 %v1971_v51, %v1520_v49  ;;  %v1448_v59 = vld [vmem:[%s2984_s1 + $0x20] sm:$0xf] }
  0x18   : > { %1088 = vmatpush.bf16.msra.mxu2 %v1601_v34  ;;  %v1648_v54 = vld [vmem:[%s2984_s1 + $0x1b0] sm:$0xf]  ;;  %v2003_v55 = vld [vmem:[%s2984_s1 + $0x1b4] sm:$0xf0]  ;;  %v1585_v58 = vor.u32 %v1987_v53, %v1584_v52  ;;  %v1953_v60 = vld [vmem:[%s2984_s1 + $0x24] sm:$0xf0] }
  0x19   : > { %1101 = vmatpush.bf16.msra.mxu3 %v1665_v38  ;;  %v1512_v61 = vld [vmem:[%s2984_s1 + $0xa0] sm:$0xf]  ;;  %v1649_v62 = vor.u32 %v2003_v55, %v1648_v54  ;;  %v1969_v63 = vld [vmem:[%s2984_s1 + $0xa4] sm:$0xf0]  ;;  %v1449_v4 = vor.u32 %v1953_v60, %v1448_v59  ;;  %v1440_v7 = vld [vmem:[%s2984_s1 + $0x10] sm:$0xf] }
  0x1a   : > { %1063 = vmatpush.bf16.msra.mxu0 %v1465_v44  ;;  %v1576_v0 = vld [vmem:[%s2984_s1 + $0x120] sm:$0xf]  ;;  %v1985_v1 = vld [vmem:[%s2984_s1 + $0x124] sm:$0xf0]  ;;  %v1513_v5 = vor.u32 %v1969_v63, %v1512_v61  ;;  %v1951_v8 = vld [vmem:[%s2984_s1 + $0x14] sm:$0xf0] }
  0x1b   : > { %1076 = vmatpush.bf16.msra.mxu1 %v1529_v45  ;;  %v1640_v2 = vld [vmem:[%s2984_s1 + $0x1a0] sm:$0xf]  ;;  %v2001_v3 = vld [vmem:[%s2984_s1 + $0x1a4] sm:$0xf0]  ;;  %v1577_v6 = vor.u32 %v1985_v1, %v1576_v0  ;;  %v1504_v9 = vld [vmem:[%s2984_s1 + $0x90] sm:$0xf]  ;;  %v1441_v16 = vor.u32 %v1951_v8, %v1440_v7 }
  0x1c   : > { %1089 = vmatpush.bf16.msra.mxu2 %v1593_v46  ;;  %v1641_v10 = vor.u32 %v2001_v3, %v1640_v2  ;;  %v1967_v11 = vld [vmem:[%s2984_s1 + $0x94] sm:$0xf0]  ;;  %v1568_v12 = vld [vmem:[%s2984_s1 + $0x110] sm:$0xf]  ;;  %v1432_v17 = vld [vmem:[%s2984_s1] sm:$0xf] }
  0x1d   : > { %1102 = vmatpush.bf16.msra.mxu3 %v1657_v50  ;;  %v1983_v13 = vld [vmem:[%s2984_s1 + $0x114] sm:$0xf0]  ;;  %v1632_v14 = vld [vmem:[%s2984_s1 + $0x190] sm:$0xf]  ;;  %v1949_v18 = vld [vmem:[%s2984_s1 + $0x4] sm:$0xf0]  ;;  %v1505_v19 = vor.u32 %v1967_v11, %v1504_v9 }
  0x1e   : > { %1064 = vmatpush.bf16.msra.mxu0 %v1457_v56  ;;  %v1999_v15 = vld [vmem:[%s2984_s1 + $0x194] sm:$0xf0]  ;;  %v1569_v20 = vor.u32 %v1983_v13, %v1568_v12  ;;  %v1496_v21 = vld [vmem:[%s2984_s1 + $0x80] sm:$0xf]  ;;  %v1965_v22 = vld [vmem:[%s2984_s1 + $0x84] sm:$0xf0]  ;;  %v1433_v31 = vor.u32 %v1949_v18, %v1432_v17 }
  0x1f   : > { %1077 = vmatpush.bf16.msra.mxu1 %v1521_v57  ;;  %v1560_v23 = vld [vmem:[%s2984_s1 + $0x100] sm:$0xf]  ;;  %v1633_v24 = vor.u32 %v1999_v15, %v1632_v14  ;;  %v1981_v25 = vld [vmem:[%s2984_s1 + $0x104] sm:$0xf0]  ;;  %v1744_v28 = vld [vmem:[%s2984_s1 + $0x270] sm:$0xf]  ;;  %v1497_v35 = vor.u32 %v1965_v22, %v1496_v21 }
  0x20   : > { %1090 = vmatpush.bf16.msra.mxu2 %v1585_v58  ;;  %v1624_v26 = vld [vmem:[%s2984_s1 + $0x180] sm:$0xf]  ;;  %v1997_v27 = vld [vmem:[%s2984_s1 + $0x184] sm:$0xf0]  ;;  %v2027_v29 = vld [vmem:[%s2984_s1 + $0x274] sm:$0xf0]  ;;  %v1561_v36 = vor.u32 %v1981_v25, %v1560_v23 }
  0x21   : > { %1103 = vmatpush.bf16.msra.mxu3 %v1649_v62  ;;  %v1808_v30 = vld [vmem:[%s2984_s1 + $0x2f0] sm:$0xf]  ;;  %v2043_v32 = vld [vmem:[%s2984_s1 + $0x2f4] sm:$0xf0]  ;;  %v1625_v39 = vor.u32 %v1997_v27, %v1624_v26  ;;  %v1745_v40 = vor.u32 %v2027_v29, %v1744_v28  ;;  %v1736_v43 = vld [vmem:[%s2984_s1 + $0x260] sm:$0xf] }
  0x22   : > { %1065 = vmatpush.bf16.msra.mxu0 %v1449_v4  ;;  %v1872_v33 = vld [vmem:[%s2984_s1 + $0x370] sm:$0xf]  ;;  %v2059_v34 = vld [vmem:[%s2984_s1 + $0x374] sm:$0xf0]  ;;  %v1809_v41 = vor.u32 %v2043_v32, %v1808_v30  ;;  %v2025_v44 = vld [vmem:[%s2984_s1 + $0x264] sm:$0xf0] }
  0x23   : > { %1078 = vmatpush.bf16.msra.mxu1 %v1513_v5  ;;  %v1936_v37 = vld [vmem:[%s2984_s1 + $0x3f0] sm:$0xf]  ;;  %v2075_v38 = vld [vmem:[%s2984_s1 + $0x3f4] sm:$0xf0]  ;;  %v1873_v42 = vor.u32 %v2059_v34, %v1872_v33  ;;  %v1800_v45 = vld [vmem:[%s2984_s1 + $0x2e0] sm:$0xf]  ;;  %v1737_v52 = vor.u32 %v2025_v44, %v1736_v43 }
  0x24   : > { %1091 = vmatpush.bf16.msra.mxu2 %v1577_v6  ;;  %v1937_v46 = vor.u32 %v2075_v38, %v1936_v37  ;;  %v2041_v47 = vld [vmem:[%s2984_s1 + $0x2e4] sm:$0xf0]  ;;  %v1864_v48 = vld [vmem:[%s2984_s1 + $0x360] sm:$0xf]  ;;  %v1728_v53 = vld [vmem:[%s2984_s1 + $0x250] sm:$0xf] }
  0x25   : > { %1104 = vmatpush.bf16.msra.mxu3 %v1641_v10  ;;  %v2057_v49 = vld [vmem:[%s2984_s1 + $0x364] sm:$0xf0]  ;;  %v1928_v50 = vld [vmem:[%s2984_s1 + $0x3e0] sm:$0xf]  ;;  %v2023_v54 = vld [vmem:[%s2984_s1 + $0x254] sm:$0xf0]  ;;  %v1801_v55 = vor.u32 %v2041_v47, %v1800_v45 }
  0x26   : > { %1066 = vmatpush.bf16.msra.mxu0 %v1441_v16  ;;  %v2073_v51 = vld [vmem:[%s2984_s1 + $0x3e4] sm:$0xf0]  ;;  %v1865_v56 = vor.u32 %v2057_v49, %v1864_v48  ;;  %v1792_v57 = vld [vmem:[%s2984_s1 + $0x2d0] sm:$0xf]  ;;  %v2039_v58 = vld [vmem:[%s2984_s1 + $0x2d4] sm:$0xf0]  ;;  %v1729_v1 = vor.u32 %v2023_v54, %v1728_v53 }
  0x27   : > { %1079 = vmatpush.bf16.msra.mxu1 %v1505_v19  ;;  %s2993_s16 = smov (!%p196_p3, %s1418_s16), 1  ;;  %v1929_v59 = vor.u32 %v2073_v51, %v1928_v50  ;;  %v1856_v60 = vld [vmem:[%s2984_s1 + $0x350] sm:$0xf]  ;;  %v2055_v61 = vld [vmem:[%s2984_s1 + $0x354] sm:$0xf0]  ;;  %v1793_v5 = vor.u32 %v2039_v58, %v1792_v57  ;;  %vm251_vm0 = vcmask 1041408  }
  0x28   : > { %1092 = vmatpush.bf16.msra.mxu2 %v1569_v20  ;;  %v1920_v62 = vld [vmem:[%s2984_s1 + $0x3d0] sm:$0xf]  ;;  %v2071_v63 = vld [vmem:[%s2984_s1 + $0x3d4] sm:$0xf0]  ;;  %v1720_v0 = vld [vmem:[%s2984_s1 + $0x240] sm:$0xf]  ;;  %v1857_v6 = vor.u32 %v2055_v61, %v1856_v60 }
  0x29   : > { %1105 = vmatpush.bf16.msra.mxu3 %v1633_v24  ;;  %s1945_s27 = sshll.u32 %s2993_s16, 4  ;;  %v2021_v2 = vld [vmem:[%s2984_s1 + $0x244] sm:$0xf0]  ;;  %v1784_v3 = vld [vmem:[%s2984_s1 + $0x2c0] sm:$0xf]  ;;  %v1921_v10 = vor.u32 %v2071_v63, %v1920_v62  ;;  %vm252_vm1 = vcmask 1045508  }
  0x2a   : > { %1067 = vmatpush.bf16.msra.mxu0 %v1433_v31  ;;  %v2037_v4 = vld [vmem:[%s2984_s1 + $0x2c4] sm:$0xf0]  ;;  %s2414_s10 = scalar_lea.vmem %s2983_s0, %s1945_s27  ;;  %v1848_v7 = vld [vmem:[%s2984_s1 + $0x340] sm:$0xf]  ;;  %v1721_v16 = vor.u32 %v2021_v2, %v1720_v0  ;;  %v1712_v19 = vld [vmem:[%s2984_s1 + $0x230] sm:$0xf] }
  0x2b   : > { %1080 = vmatpush.bf16.msra.mxu1 %v1497_v35  ;;  %v214_v8 = vld [vmem:[%s2414_s10] sm:$0xff]  ;;  %v2053_v11 = vld [vmem:[%s2984_s1 + $0x344] sm:$0xf0]  ;;  %v1785_v20 = vor.u32 %v2037_v4, %v1784_v3  ;;  %v2019_v22 = vld [vmem:[%s2984_s1 + $0x234] sm:$0xf0]  ;;  %vm1277_vm6 = vcmask 1045504  }
  0x2c   : > { %1093 = vmatpush.bf16.msra.mxu2 %v1561_v36  ;;  %v212_v9 = vld [vmem:[%s2414_s10] sm:$0x77]  ;;  %v216_v12 = vshrl.u32 %v214_v8, 16  ;;  %v219_v13 = vshll.u32 %v214_v8, 16  ;;  %v2069_v15 = vld [vmem:[%s2984_s1 + $0x3c4] sm:$0xf0]  ;;  %v1849_v21 = vor.u32 %v2053_v11, %v1848_v7  ;;  %v1713_v33 = vor.u32 %v2019_v22, %v1712_v19  ;;  %vm2477_vm2 = vmor %vm251_vm0, %vm252_vm1 }
  0x2d   : > { %1106 = vmatpush.bf16.msra.mxu3 %v1625_v39  ;;  %213 = vst [vmem:[#allocation2 + $0x10] sm:$0x77] %v212_v9  ;;  %v1912_v14 = vld [vmem:[%s2984_s1 + $0x3c0] sm:$0xf]  ;;  %v1776_v23 = vld [vmem:[%s2984_s1 + $0x2b0] sm:$0xf] }
  0x2e   : > { %1112 = vmatpush.bf16.msrb.mxu0 %v1745_v40  ;;  %v218_v17 = vrot.slane %v216_v12, 4  ;;  %v221_v18 = vrot.slane %v219_v13, 5  ;;  %v2035_v24 = vld [vmem:[%s2984_s1 + $0x2b4] sm:$0xf0]  ;;  %v1913_v25 = vor.u32 %v2069_v15, %v1912_v14  ;;  %v1840_v27 = vld [vmem:[%s2984_s1 + $0x330] sm:$0xf] }
  0x2f   : > { %1125 = vmatpush.bf16.msrb.mxu1 %v1809_v41  ;;  %v2051_v28 = vld [vmem:[%s2984_s1 + $0x334] sm:$0xf0]  ;;  %v1904_v29 = vld [vmem:[%s2984_s1 + $0x3b0] sm:$0xf]  ;;  %v1704_v31 = vld [vmem:[%s2984_s1 + $0x220] sm:$0xf]  ;;  %v1777_v36 = vor.u32 %v2035_v24, %v1776_v23 }
  0x30   : > { %1138 = vmatpush.bf16.msrb.mxu2 %v1873_v42  ;;  %v222_v26 = vor.u32 %v221_v18, %v218_v17  ;;  %v2067_v30 = vld [vmem:[%s2984_s1 + $0x3b4] sm:$0xf0]  ;;  %v2017_v34 = vld [vmem:[%s2984_s1 + $0x224] sm:$0xf0]  ;;  %v1768_v35 = vld [vmem:[%s2984_s1 + $0x2a0] sm:$0xf]  ;;  %v1841_v37 = vor.u32 %v2051_v28, %v1840_v27 }
  0x31   : > { %1151 = vmatpush.bf16.msrb.mxu3 %v1937_v46  ;;  %v2033_v39 = vld [vmem:[%s2984_s1 + $0x2a4] sm:$0xf0]  ;;  %v1832_v40 = vld [vmem:[%s2984_s1 + $0x320] sm:$0xf]  ;;  %v1905_v41 = vor.u32 %v2067_v30, %v1904_v29  ;;  %v2487_v48 = vld [vmem:[%s2984_s1 + $0x210] sm:$0xf] }
  0x32   : > { %1113 = vmatpush.bf16.msrb.mxu0 %v1737_v52  ;;  %v223_v32 = vrot.slane %v222_v26, 4  ;;  %v2049_v44 = vld [vmem:[%s2984_s1 + $0x324] sm:$0xf0]  ;;  %v1896_v45 = vld [vmem:[%s2984_s1 + $0x3a0] sm:$0xf]  ;;  %v1705_v52 = vor.u32 %v2017_v34, %v1704_v31  ;;  %s1946_s6 = sshll.u32 %s2993_s16, 3 }
  0x33   : > { %1126 = vmatpush.bf16.msrb.mxu1 %v1801_v55  ;;  %v2065_v47 = vld [vmem:[%s2984_s1 + $0x3a4] sm:$0xf0]  ;;  %v2015_v49 = vld [vmem:[%s2984_s1 + $0x214] sm:$0xf0]  ;;  %v1760_v53 = vld [vmem:[%s2984_s1 + $0x290] sm:$0xf]  ;;  %v1833_v60 = vor.u32 %v2049_v44, %v1832_v40  ;;  %s205_s9 = scalar_lea.vmem %s2986_s3, %s1946_s6 }
  0x34   : > { %1139 = vmatpush.bf16.msrb.mxu2 %v1865_v56  ;;  %v260_v38 = vld [vmem:[#allocation2 + $0x10] sm:$0x77]  ;;  %225 = vst [vmem:[#allocation2] sm:$0x77] %v223_v32  ;;  %v2031_v54 = vld [vmem:[%s2984_s1 + $0x294] sm:$0xf0] }
  0x35   : > { %1152 = vmatpush.bf16.msrb.mxu3 %v1929_v59  ;;  %v396_v42 = vunpack.c.l.b16 %v260_v38  ;;  %v397_v43 = vunpack.c.h.b16 %v260_v38  ;;  %v1824_v55 = vld [vmem:[%s2984_s1 + $0x310] sm:$0xf]  ;;  %v247_v56 = vld [vmem:[%s2414_s10] sm:$0xcc]  ;;  %v248_v57 = vld [vmem:[%s2414_s10 + $0x8] sm:$0x11]  ;;  %v1769_v59 = vor.u32 %v2033_v39, %v1768_v35 }
  0x36   : > { %1114 = vmatpush.bf16.msrb.mxu0 %v1729_v1  ;;  %v226_v58 = vld [vmem:[%s2414_s10] sm:$0xee]  ;;  %v2047_v61 = vld [vmem:[%s2984_s1 + $0x314] sm:$0xf0]  ;;  %v1429_v62 = vrot.slane %v247_v56, 10  ;;  %v256_v63 = vrot.slane %v248_v57, 6  ;;  %v1897_v1 = vor.u32 %v2065_v47, %v1896_v45 }
  0x37   : > { %1127 = vmatpush.bf16.msrb.mxu1 %v1793_v5  ;;  %v2492_v50 = vpack.c.b16 %v396_v42, %v396_v42  ;;  %v2494_v51 = vpack.c.b16 %v397_v43, %v397_v43  ;;  %v227_v0 = vld [vmem:[%s2414_s10 + $0x8] sm:$0x11]  ;;  %v1888_v2 = vld [vmem:[%s2984_s1 + $0x390] sm:$0xf]  ;;  %v2063_v3 = vld [vmem:[%s2984_s1 + $0x394] sm:$0xf0]  ;;  %v1825_v17 = vor.u32 %v2047_v61, %v1824_v55 }
  0x38   : > { %1140 = vmatpush.bf16.msrb.mxu2 %v1857_v6  ;;  %v232_v4 = vshrl.u32 %v226_v58, 16  ;;  %v235_v5 = vshll.u32 %v226_v58, 16  ;;  %v241_v6 = vshll.u32 %v227_v0, 16  ;;  %v1688_v7 = vld [vmem:[%s2984_s1 + $0x200] sm:$0xf]  ;;  %v257_v9 = vsel %vm2477_vm2, %v1429_v62, %v256_v63  ;;  %s1947_s11 = sshll.u32 %s2993_s16, 2 }
  0x39   : > { %1153 = vmatpush.bf16.msrb.mxu3 %v1921_v10  ;;  %1068 = vmatmul.bf16.vlgmr.msra.gmra.mxu0 %v2492_v50  ;;  %v2013_v8 = vld [vmem:[%s2984_s1 + $0x204] sm:$0xf0]  ;;  %vm228_vm3 = vsmask.f32 2304  ;;  %v1697_v10 = vor.u32 %v2015_v49, %v2487_v48  ;;  %v1752_v11 = vld [vmem:[%s2984_s1 + $0x280] sm:$0xf]  ;;  %v1889_v28 = vor.u32 %v2063_v3, %v1888_v2  ;;  %s210_s14 = scalar_lea.vmem %s2987_s4, %s1947_s11 }
  0x3a   : > { %1115 = vmatpush.bf16.msrb.mxu0 %v1721_v16  ;;  %1081 = vmatmul.bf16.vlgmr.msra.gmra.mxu1 %v2494_v51  ;;  %v2029_v12 = vld [vmem:[%s2984_s1 + $0x284] sm:$0xf0]  ;;  %259 = vst [vmem:[#allocation2 + $0x8] sm:$0x77] %v257_v9  ;;  %vm229_vm4 = vsmask.f32 6416  ;;  %v1761_v16 = vor.u32 %v2031_v54, %v1760_v53  ;;  %v1689_v34 = vor.u32 %v2013_v8, %v1688_v7 }
  0x3b   : > { %1128 = vmatpush.bf16.msrb.mxu1 %v1785_v20  ;;  %v234_v13 = vrot.slane %v232_v4, 5  ;;  %v237_v14 = vrot.slane %v235_v5, 6  ;;  %v261_v15 = vld [vmem:[#allocation2] sm:$0x77]  ;;  %v2045_v19 = vld [vmem:[%s2984_s1 + $0x304] sm:$0xf0]  ;;  %vm2561_vm5 = vmor %vm228_vm3, %vm229_vm4  ;;  %v1753_v38 = vor.u32 %v2029_v12, %v1752_v11 }
  0x3c   : > { %1141 = vmatpush.bf16.msrb.mxu2 %v1849_v21  ;;  %v1816_v18 = vld [vmem:[%s2984_s1 + $0x300] sm:$0xf]  ;;  %v398_v20 = vunpack.c.l.b16 %v261_v15  ;;  %v399_v21 = vunpack.c.h.b16 %v261_v15  ;;  %v2061_v23 = vld [vmem:[%s2984_s1 + $0x384] sm:$0xf0]  ;;  %v1962_v24 = vld [vmem:[%s2984_s1 + $0x74] sm:$0xf] }
  0x3d   : > { %1154 = vmatpush.bf16.msrb.mxu3 %v1913_v25  ;;  %v1880_v22 = vld [vmem:[%s2984_s1 + $0x380] sm:$0xf]  ;;  %v1490_v25 = vld [vmem:[%s2984_s1 + $0x78] sm:$0xf0]  ;;  %v238_v26 = vor.u32 %v237_v14, %v234_v13  ;;  %v243_v27 = vrot.slane %v241_v6, 6  ;;  %v1817_v39 = vor.u32 %v2045_v19, %v1816_v18  ;;  %vm1315_vm7 = vcmask 1040384  }
  0x3e   : > { %1116 = vmatpush.bf16.msrb.mxu0 %v1713_v33  ;;  %v1978_v29 = vld [vmem:[%s2984_s1 + $0xf4] sm:$0xf]  ;;  %v1554_v30 = vld [vmem:[%s2984_s1 + $0xf8] sm:$0xf0]  ;;  %v2565_v32 = vpack.c.b16 %v398_v20, %v398_v20  ;;  %v2567_v33 = vpack.c.b16 %v399_v21, %v399_v21  ;;  %v1493_v42 = vor.u32 %v1962_v24, %v1490_v25  ;;  %v1960_v45 = vld [vmem:[%s2984_s1 + $0x64] sm:$0xf]  ;;  %v1881_v47 = vor.u32 %v2061_v23, %v1880_v22 }
  0x3f   : > { %1129 = vmatpush.bf16.msrb.mxu1 %v1777_v36  ;;  %v1994_v35 = vld [vmem:[%s2984_s1 + $0x174] sm:$0xf]  ;;  %v1618_v36 = vld [vmem:[%s2984_s1 + $0x178] sm:$0xf0]  ;;  %v1557_v43 = vor.u32 %v1978_v29, %v1554_v30  ;;  %v1482_v46 = vld [vmem:[%s2984_s1 + $0x68] sm:$0xf0] }
  0x40   : > { %1142 = vmatpush.bf16.msrb.mxu2 %v1841_v37  ;;  %v239_v37 = vrot.slane %v238_v26, 4  ;;  %v2010_v40 = vld [vmem:[%s2984_s1 + $0x1f4] sm:$0xf]  ;;  %1107 = vmatmul.bf16.vlgmr.msra.gmra.mxu3 %v2567_v33  ;;  %v1621_v48 = vor.u32 %v1994_v35, %v1618_v36  ;;  %v1976_v49 = vld [vmem:[%s2984_s1 + $0xe4] sm:$0xf]  ;;  %v1485_v58 = vor.u32 %v1960_v45, %v1482_v46  ;;  %v2094_v22 = vmov 0  }
  0x41   : > { %1155 = vmatpush.bf16.msrb.mxu3 %v1905_v41  ;;  %v1682_v41 = vld [vmem:[%s2984_s1 + $0x1f8] sm:$0xf0]  ;;  %1094 = vmatmul.bf16.vlgmr.msra.gmra.mxu2 %v2565_v32  ;;  %v1992_v54 = vld [vmem:[%s2984_s1 + $0x164] sm:$0xf]  ;;  %v1610_v55 = vld [vmem:[%s2984_s1 + $0x168] sm:$0xf0] }
  0x42   : > { %1117 = vmatpush.bf16.msrb.mxu0 %v1705_v52  ;;  %v244_v44 = vsel %vm2561_vm5, %v239_v37, %v243_v27  ;;  %v1546_v52 = vld [vmem:[%s2984_s1 + $0xe8] sm:$0xf0]  ;;  %v1685_v53 = vor.u32 %v2010_v40, %v1682_v41  ;;  %v2008_v56 = vld [vmem:[%s2984_s1 + $0x1e4] sm:$0xf]  ;;  %v1474_v61 = vld [vmem:[%s2984_s1 + $0x58] sm:$0xf0]  ;;  %v1613_v63 = vor.u32 %v1992_v54, %v1610_v55  ;;  %2085 = vset.pattern.permute.xlu0 %v2094_v22 }
  0x43   : > { %1130 = vmatpush.bf16.msrb.mxu1 %v1769_v59  ;;  %246 = vst [vmem:[#allocation2 + $0x18] sm:$0x77] %v244_v44  ;;  %v1674_v57 = vld [vmem:[%s2984_s1 + $0x1e8] sm:$0xf0]  ;;  %v1549_v59 = vor.u32 %v1976_v49, %v1546_v52  ;;  %v1974_v0 = vld [vmem:[%s2984_s1 + $0xd4] sm:$0xf] }
  0x44   : > { %1143 = vmatpush.bf16.msrb.mxu2 %v1833_v60  ;;  %v1958_v60 = vld [vmem:[%s2984_s1 + $0x54] sm:$0xf]  ;;  %v263_v62 = vld [vmem:[#allocation2 + $0x8] sm:$0x77]  ;;  %v1677_v2 = vor.u32 %v2008_v56, %v1674_v57  ;;  %v1602_v4 = vld [vmem:[%s2984_s1 + $0x158] sm:$0xf0] }
  0x45   : > { %1156 = vmatpush.bf16.msrb.mxu3 %v1897_v1  ;;  %v1538_v1 = vld [vmem:[%s2984_s1 + $0xd8] sm:$0xf0]  ;;  %v1990_v3 = vld [vmem:[%s2984_s1 + $0x154] sm:$0xf]  ;;  %v402_v7 = vunpack.c.l.b16 %v263_v62  ;;  %v403_v9 = vunpack.c.h.b16 %v263_v62  ;;  %v1956_v12 = vld [vmem:[%s2984_s1 + $0x44] sm:$0xf] }
  0x46   : > { %1118 = vmatpush.bf16.msrb.mxu0 %v1697_v10  ;;  %v2006_v5 = vld [vmem:[%s2984_s1 + $0x1d4] sm:$0xf]  ;;  %v1666_v6 = vld [vmem:[%s2984_s1 + $0x1d8] sm:$0xf0]  ;;  %v1477_v10 = vor.u32 %v1958_v60, %v1474_v61  ;;  %v1541_v11 = vor.u32 %v1974_v0, %v1538_v1  ;;  %v1466_v15 = vld [vmem:[%s2984_s1 + $0x48] sm:$0xf0] }
  0x47   : > { %1131 = vmatpush.bf16.msrb.mxu1 %v1761_v16  ;;  %v211_v16 = vld [vmem:[%s2985_s2] sm:$0x3f]  ;;  %v1669_v18 = vor.u32 %v2006_v5, %v1666_v6  ;;  %v1530_v20 = vld [vmem:[%s2984_s1 + $0xc8] sm:$0xf0]  ;;  %v2666_v29 = vpack.c.b16 %v403_v9, %v403_v9  ;;  %v1469_v30 = vor.u32 %v1956_v12, %v1466_v15  ;;  %v1458_v35 = vld [vmem:[%s2984_s1 + $0x38] sm:$0xf0] }
  0x48   : > { %1144 = vmatpush.bf16.msrb.mxu2 %v1825_v17  ;;  %v1605_v17 = vor.u32 %v1990_v3, %v1602_v4  ;;  %v1972_v19 = vld [vmem:[%s2984_s1 + $0xc4] sm:$0xf]  ;;  %v1594_v25 = vld [vmem:[%s2984_s1 + $0x148] sm:$0xf0]  ;;  %1272 = vperm.xlu0 %2085, %v211_v16   ;;  %v1986_v40 = vld [vmem:[%s2984_s1 + $0x134] sm:$0xf] }
  0x49   : > { %1157 = vmatpush.bf16.msrb.mxu3 %v1889_v28  ;;  %v1988_v21 = vld [vmem:[%s2984_s1 + $0x144] sm:$0xf]  ;;  %v1658_v27 = vld [vmem:[%s2984_s1 + $0x1c8] sm:$0xf0]  ;;  %v2664_v28 = vpack.c.b16 %v402_v7, %v402_v7  ;;  %v1533_v31 = vor.u32 %v1972_v19, %v1530_v20  ;;  %v1586_v41 = vld [vmem:[%s2984_s1 + $0x138] sm:$0xf0] }
  0x4a   : > { %1119 = vmatpush.bf16.msrb.mxu0 %v1689_v34  ;;  %v262_v8 = vld [vmem:[#allocation2 + $0x18] sm:$0x77]  ;;  %v2004_v26 = vld [vmem:[%s2984_s1 + $0x1c4] sm:$0xf]  ;;  %v1954_v34 = vld [vmem:[%s2984_s1 + $0x34] sm:$0xf]  ;;  %v1597_v36 = vor.u32 %v1988_v21, %v1594_v25 }
  0x4b   : > { %1132 = vmatpush.bf16.msrb.mxu1 %v1753_v38  ;;  %v400_v13 = vunpack.c.l.b16 %v262_v8  ;;  %v401_v14 = vunpack.c.h.b16 %v262_v8  ;;  %v1661_v37 = vor.u32 %v2004_v26, %v1658_v27  ;;  %v1970_v38 = vld [vmem:[%s2984_s1 + $0xb4] sm:$0xf]  ;;  %v1461_v44 = vor.u32 %v1954_v34, %v1458_v35  ;;  %v1952_v46 = vld [vmem:[%s2984_s1 + $0x24] sm:$0xf]  ;;  %v1578_v55 = vld [vmem:[%s2984_s1 + $0x128] sm:$0xf0] }
  0x4c   : > { %1145 = vmatpush.bf16.msrb.mxu2 %v1817_v39  ;;  %v1522_v39 = vld [vmem:[%s2984_s1 + $0xb8] sm:$0xf0]  ;;  %v1968_v52 = vld [vmem:[%s2984_s1 + $0xa4] sm:$0xf]  ;;  %v1642_v57 = vld [vmem:[%s2984_s1 + $0x1a8] sm:$0xf0] }
  0x4d   : > { %1158 = vmatpush.bf16.msrb.mxu3 %v1881_v47  ;;  %v2651_v23 = vpack.c.b16 %v400_v13, %v400_v13  ;;  %v2653_v24 = vpack.c.b16 %v401_v14, %v401_v14  ;;  %v1525_v45 = vor.u32 %v1970_v38, %v1522_v39  ;;  %v1450_v47 = vld [vmem:[%s2984_s1 + $0x28] sm:$0xf0]  ;;  %v1984_v54 = vld [vmem:[%s2984_s1 + $0x124] sm:$0xf]  ;;  %v1950_v60 = vld [vmem:[%s2984_s1 + $0x14] sm:$0xf] }
  0x4e   : > { %1164 = vmatpush.bf16.msra.mxu0 %v1493_v42  ;;  %v2002_v42 = vld [vmem:[%s2984_s1 + $0x1b4] sm:$0xf]  ;;  %v2000_v56 = vld [vmem:[%s2984_s1 + $0x1a4] sm:$0xf]  ;;  %v1442_v61 = vld [vmem:[%s2984_s1 + $0x18] sm:$0xf0]  ;;  %v1581_v62 = vor.u32 %v1984_v54, %v1578_v55 }
  0x4f   : > { %1177 = vmatpush.bf16.msra.mxu1 %v1557_v43  ;;  %1120 = vmatmul.bf16.vlgmr.msrb.gmra.mxu0 %v2651_v23  ;;  %v1650_v43 = vld [vmem:[%s2984_s1 + $0x1b8] sm:$0xf0]  ;;  %v1966_v0 = vld [vmem:[%s2984_s1 + $0x94] sm:$0xf]  ;;  %v1948_v6 = vld [vmem:[%s2984_s1 + $0x4] sm:$0xf]  ;;  %v1445_v7 = vor.u32 %v1950_v60, %v1442_v61 }
  0x50   : > { %1190 = vmatpush.bf16.msra.mxu2 %v1621_v48  ;;  %1133 = vmatmul.bf16.vlgmr.msrb.gmra.mxu1 %v2653_v24  ;;  %v1589_v48 = vor.u32 %v1986_v40, %v1586_v41  ;;  %v1653_v49 = vor.u32 %v2002_v42, %v1650_v43  ;;  %v1506_v1 = vld [vmem:[%s2984_s1 + $0x98] sm:$0xf0]  ;;  %v1998_v4 = vld [vmem:[%s2984_s1 + $0x194] sm:$0xf]  ;;  %v1434_v9 = vld [vmem:[%s2984_s1 + $0x8] sm:$0xf0] }
  0x51   : > { %1203 = vmatpush.bf16.msra.mxu3 %v1685_v53  ;;  %1146 = vmatmul.bf16.vlgmr.msrb.gmra.mxu2 %v2664_v28  ;;  %v1514_v53 = vld [vmem:[%s2984_s1 + $0xa8] sm:$0xf0]  ;;  %v1570_v3 = vld [vmem:[%s2984_s1 + $0x118] sm:$0xf0]  ;;  %v1509_v8 = vor.u32 %v1966_v0, %v1506_v1  ;;  %v1980_v14 = vld [vmem:[%s2984_s1 + $0x104] sm:$0xf]  ;;  %v1437_v25 = vor.u32 %v1948_v6, %v1434_v9 }
  0x52   : > { %1165 = vmatpush.bf16.msra.mxu0 %v1485_v58  ;;  %1159 = vmatmul.bf16.vlgmr.msrb.gmra.mxu3 %v2666_v29  ;;  %v1453_v58 = vor.u32 %v1952_v46, %v1450_v47  ;;  %v1634_v5 = vld [vmem:[%s2984_s1 + $0x198] sm:$0xf0]  ;;  %v1562_v15 = vld [vmem:[%s2984_s1 + $0x108] sm:$0xf0]  ;;  %v1996_v16 = vld [vmem:[%s2984_s1 + $0x184] sm:$0xf] }
  0x53   : > { %1178 = vmatpush.bf16.msra.mxu1 %v1549_v59  ;;  %v1517_v59 = vor.u32 %v1968_v52, %v1514_v53  ;;  %v1637_v13 = vor.u32 %v1998_v4, %v1634_v5  ;;  %v1746_v19 = vld [vmem:[%s2984_s1 + $0x278] sm:$0xf0]  ;;  %v2042_v20 = vld [vmem:[%s2984_s1 + $0x2f4] sm:$0xf]  ;;  %v1565_v34 = vor.u32 %v1980_v14, %v1562_v15  ;;  %v2024_v38 = vld [vmem:[%s2984_s1 + $0x264] sm:$0xf] }
  0x54   : > { %1191 = vmatpush.bf16.msra.mxu2 %v1613_v63  ;;  %v1645_v63 = vor.u32 %v2000_v56, %v1642_v57  ;;  %v1810_v21 = vld [vmem:[%s2984_s1 + $0x2f8] sm:$0xf0]  ;;  %v2058_v22 = vld [vmem:[%s2984_s1 + $0x374] sm:$0xf]  ;;  %v1738_v39 = vld [vmem:[%s2984_s1 + $0x268] sm:$0xf0] }
  0x55   : > { %1204 = vmatpush.bf16.msra.mxu3 %v1677_v2  ;;  %v1982_v2 = vld [vmem:[%s2984_s1 + $0x114] sm:$0xf]  ;;  %v1874_v27 = vld [vmem:[%s2984_s1 + $0x378] sm:$0xf0]  ;;  %v2040_v42 = vld [vmem:[%s2984_s1 + $0x2e4] sm:$0xf] }
  0x56   : > { %1166 = vmatpush.bf16.msra.mxu0 %v1477_v10  ;;  %v1964_v10 = vld [vmem:[%s2984_s1 + $0x84] sm:$0xf]  ;;  %v1573_v12 = vor.u32 %v1982_v2, %v1570_v3  ;;  %v1877_v40 = vor.u32 %v2058_v22, %v1874_v27  ;;  %v1802_v43 = vld [vmem:[%s2984_s1 + $0x2e8] sm:$0xf0]  ;;  %v2022_v52 = vld [vmem:[%s2984_s1 + $0x254] sm:$0xf] }
  0x57   : > { %1179 = vmatpush.bf16.msra.mxu1 %v1541_v11  ;;  %v1498_v11 = vld [vmem:[%s2984_s1 + $0x88] sm:$0xf0]  ;;  %v2072_v46 = vld [vmem:[%s2984_s1 + $0x3e4] sm:$0xf]  ;;  %v1730_v53 = vld [vmem:[%s2984_s1 + $0x258] sm:$0xf0] }
  0x58   : > { %1192 = vmatpush.bf16.msra.mxu2 %v1605_v17  ;;  %v1626_v17 = vld [vmem:[%s2984_s1 + $0x188] sm:$0xf0]  ;;  %v1501_v26 = vor.u32 %v1964_v10, %v1498_v11  ;;  %v2038_v56 = vld [vmem:[%s2984_s1 + $0x2d4] sm:$0xf]  ;;  %v1794_v57 = vld [vmem:[%s2984_s1 + $0x2d8] sm:$0xf0] }
  0x59   : > { %1205 = vmatpush.bf16.msra.mxu3 %v1669_v18  ;;  %v2026_v18 = vld [vmem:[%s2984_s1 + $0x274] sm:$0xf]  ;;  %v1629_v35 = vor.u32 %v1996_v16, %v1626_v17  ;;  %v1930_v47 = vld [vmem:[%s2984_s1 + $0x3e8] sm:$0xf0]  ;;  %v1922_v61 = vld [vmem:[%s2984_s1 + $0x3d8] sm:$0xf0] }
  0x5a   : > { %1167 = vmatpush.bf16.msra.mxu0 %v1469_v30  ;;  %v2074_v30 = vld [vmem:[%s2984_s1 + $0x3f4] sm:$0xf]  ;;  %v1933_v55 = vor.u32 %v2072_v46, %v1930_v47  ;;  %v1722_v0 = vld [vmem:[%s2984_s1 + $0x248] sm:$0xf0]  ;;  %v2052_v2 = vld [vmem:[%s2984_s1 + $0x344] sm:$0xf] }
  0x5b   : > { %1180 = vmatpush.bf16.msra.mxu1 %v1533_v31  ;;  %v1938_v31 = vld [vmem:[%s2984_s1 + $0x3f8] sm:$0xf0]  ;;  %v2070_v60 = vld [vmem:[%s2984_s1 + $0x3d4] sm:$0xf]  ;;  %v1850_v3 = vld [vmem:[%s2984_s1 + $0x348] sm:$0xf0] }
  0x5c   : > { %1193 = vmatpush.bf16.msra.mxu2 %v1597_v36  ;;  %v1749_v36 = vor.u32 %v2026_v18, %v1746_v19  ;;  %v1941_v41 = vor.u32 %v2074_v30, %v1938_v31  ;;  %v2068_v4 = vld [vmem:[%s2984_s1 + $0x3c4] sm:$0xf]  ;;  %v1914_v5 = vld [vmem:[%s2984_s1 + $0x3c8] sm:$0xf0]  ;;  %v1714_v9 = vld [vmem:[%s2984_s1 + $0x238] sm:$0xf0]  ;;  %v1853_v10 = vor.u32 %v2052_v2, %v1850_v3 }
  0x5d   : > { %1206 = vmatpush.bf16.msra.mxu3 %v1661_v37  ;;  %v1813_v37 = vor.u32 %v2042_v20, %v1810_v21  ;;  %v1917_v11 = vor.u32 %v2068_v4, %v1914_v5  ;;  %v2050_v14 = vld [vmem:[%s2984_s1 + $0x334] sm:$0xf]  ;;  %v1842_v15 = vld [vmem:[%s2984_s1 + $0x338] sm:$0xf0]  ;;  %v2016_v20 = vld [vmem:[%s2984_s1 + $0x224] sm:$0xf] }
  0x5e   : > { %1168 = vmatpush.bf16.msra.mxu0 %v1461_v44  ;;  %v2056_v44 = vld [vmem:[%s2984_s1 + $0x364] sm:$0xf]  ;;  %v2066_v16 = vld [vmem:[%s2984_s1 + $0x3b4] sm:$0xf]  ;;  %v1906_v17 = vld [vmem:[%s2984_s1 + $0x3b8] sm:$0xf0]  ;;  %v1845_v22 = vor.u32 %v2050_v14, %v1842_v15 }
  0x5f   : > { %1181 = vmatpush.bf16.msra.mxu1 %v1525_v45  ;;  %v1866_v45 = vld [vmem:[%s2984_s1 + $0x368] sm:$0xf0]  ;;  %v2048_v30 = vld [vmem:[%s2984_s1 + $0x324] sm:$0xf]  ;;  %v2062_v46 = vld [vmem:[%s2984_s1 + $0x394] sm:$0xf] }
  0x60   : > { %1194 = vmatpush.bf16.msra.mxu2 %v1589_v48  ;;  %v1741_v48 = vor.u32 %v2024_v38, %v1738_v39  ;;  %v1869_v54 = vor.u32 %v2056_v44, %v1866_v45  ;;  %v1706_v21 = vld [vmem:[%s2984_s1 + $0x228] sm:$0xf0]  ;;  %v2014_v38 = vld [vmem:[%s2984_s1 + $0x214] sm:$0xf]  ;;  %v1698_v39 = vld [vmem:[%s2984_s1 + $0x218] sm:$0xf0] }
  0x61   : > { %1207 = vmatpush.bf16.msra.mxu3 %v1653_v49  ;;  %v1805_v49 = vor.u32 %v2040_v42, %v1802_v43  ;;  %v1770_v27 = vld [vmem:[%s2984_s1 + $0x2a8] sm:$0xf0]  ;;  %v2030_v42 = vld [vmem:[%s2984_s1 + $0x294] sm:$0xf]  ;;  %v1762_v43 = vld [vmem:[%s2984_s1 + $0x298] sm:$0xf0] }
  0x62   : > { %1169 = vmatpush.bf16.msra.mxu0 %v1453_v58  ;;  %v2054_v58 = vld [vmem:[%s2984_s1 + $0x354] sm:$0xf]  ;;  %v1834_v31 = vld [vmem:[%s2984_s1 + $0x328] sm:$0xf0]  ;;  %v1826_v45 = vld [vmem:[%s2984_s1 + $0x318] sm:$0xf0] }
  0x63   : > { %1182 = vmatpush.bf16.msra.mxu1 %v1517_v59  ;;  %v1858_v59 = vld [vmem:[%s2984_s1 + $0x358] sm:$0xf0]  ;;  %v2046_v44 = vld [vmem:[%s2984_s1 + $0x314] sm:$0xf] }
  0x64   : > { %1195 = vmatpush.bf16.msra.mxu2 %v1581_v62  ;;  %v1797_v62 = vor.u32 %v2038_v56, %v1794_v57  ;;  %v1861_v1 = vor.u32 %v2054_v58, %v1858_v59  ;;  %v1890_v47 = vld [vmem:[%s2984_s1 + $0x398] sm:$0xf0]  ;;  %v2028_v56 = vld [vmem:[%s2984_s1 + $0x284] sm:$0xf]  ;;  %v1754_v57 = vld [vmem:[%s2984_s1 + $0x288] sm:$0xf0] }
  0x65   : > { %1208 = vmatpush.bf16.msra.mxu3 %v1645_v63  ;;  %v2020_v63 = vld [vmem:[%s2984_s1 + $0x244] sm:$0xf]  ;;  %v1818_v59 = vld [vmem:[%s2984_s1 + $0x308] sm:$0xf0] }
  0x66   : > { %1170 = vmatpush.bf16.msra.mxu0 %v1445_v7  ;;  %v1725_v6 = vor.u32 %v2020_v63, %v1722_v0  ;;  %v2044_v58 = vld [vmem:[%s2984_s1 + $0x304] sm:$0xf] }
  0x67   : > { %1183 = vmatpush.bf16.msra.mxu1 %v1509_v8  ;;  %v2018_v8 = vld [vmem:[%s2984_s1 + $0x234] sm:$0xf]  ;;  %v1821_v63 = vor.u32 %v2044_v58, %v1818_v59 }
  0x68   : > { %1196 = vmatpush.bf16.msra.mxu2 %v1573_v12  ;;  %v2034_v12 = vld [vmem:[%s2984_s1 + $0x2b4] sm:$0xf]  ;;  %v1717_v18 = vor.u32 %v2018_v8, %v1714_v9 }
  0x69   : > { %1209 = vmatpush.bf16.msra.mxu3 %v1637_v13  ;;  %v1778_v13 = vld [vmem:[%s2984_s1 + $0x2b8] sm:$0xf0] }
  0x6a   : > { %1171 = vmatpush.bf16.msra.mxu0 %v1437_v25  ;;  %v1781_v19 = vor.u32 %v2034_v12, %v1778_v13  ;;  %v1909_v25 = vor.u32 %v2066_v16, %v1906_v17 }
  0x6b   : > { %1184 = vmatpush.bf16.msra.mxu1 %v1501_v26  ;;  %v2032_v26 = vld [vmem:[%s2984_s1 + $0x2a4] sm:$0xf] }
  0x6c   : > { %1197 = vmatpush.bf16.msra.mxu2 %v1565_v34  ;;  %v2064_v34 = vld [vmem:[%s2984_s1 + $0x3a4] sm:$0xf] }
  0x6d   : > { %1210 = vmatpush.bf16.msra.mxu3 %v1629_v35  ;;  %1172 = vmatmul.bf16.vlgmr.msra.gmra.mxu0 %v2492_v50  ;;  %v1925_v50 = vor.u32 %v2070_v60, %v1922_v61  ;;  %v1898_v35 = vld [vmem:[%s2984_s1 + $0x3a8] sm:$0xf0]  ;;  %v2060_v60 = vld [vmem:[%s2984_s1 + $0x384] sm:$0xf] }
  0x6e   : > { %1216 = vmatpush.bf16.msrb.mxu0 %v1749_v36  ;;  %1185 = vmatmul.bf16.vlgmr.msra.gmra.mxu1 %v2494_v51  ;;  %v2036_v51 = vld [vmem:[%s2984_s1 + $0x2c4] sm:$0xf]  ;;  %v1709_v36 = vor.u32 %v2016_v20, %v1706_v21  ;;  %v1882_v61 = vld [vmem:[%s2984_s1 + $0x388] sm:$0xf0] }
  0x6f   : > { %1229 = vmatpush.bf16.msrb.mxu1 %v1813_v37  ;;  %1198 = vmatmul.bf16.vlgmr.msra.gmra.mxu2 %v2565_v32  ;;  %v1733_v32 = vor.u32 %v2022_v52, %v1730_v53  ;;  %v1773_v37 = vor.u32 %v2032_v26, %v1770_v27  ;;  %v2012_v52 = vld [vmem:[%s2984_s1 + $0x204] sm:$0xf]  ;;  %v1690_v53 = vld [vmem:[%s2984_s1 + $0x208] sm:$0xf0]  ;;  %v1885_v0 = vor.u32 %v2060_v60, %v1882_v61 }
  0x70   : > { %1242 = vmatpush.bf16.msrb.mxu2 %v1877_v40  ;;  %1211 = vmatmul.bf16.vlgmr.msra.gmra.mxu3 %v2567_v33  ;;  %v1786_v33 = vld [vmem:[%s2984_s1 + $0x2c8] sm:$0xf0]  ;;  %v1837_v40 = vor.u32 %v2048_v30, %v1834_v31 }
  0x71   : > { %1255 = vmatpush.bf16.msrb.mxu3 %v1941_v41  ;;  %v1789_v7 = vor.u32 %v2036_v51, %v1786_v33  ;;  %v1901_v41 = vor.u32 %v2064_v34, %v1898_v35 }
  0x72   : > { %1217 = vmatpush.bf16.msrb.mxu0 %v1741_v48  ;;  %v1701_v48 = vor.u32 %v2014_v38, %v1698_v39 }
  0x73   : > { %1230 = vmatpush.bf16.msrb.mxu1 %v1805_v49  ;;  %v1765_v49 = vor.u32 %v2030_v42, %v1762_v43 }
  0x74   : > { %1243 = vmatpush.bf16.msrb.mxu2 %v1869_v54  ;;  %v1829_v54 = vor.u32 %v2046_v44, %v1826_v45 }
  0x75   : > { %1256 = vmatpush.bf16.msrb.mxu3 %v1933_v55  ;;  %v1893_v55 = vor.u32 %v2062_v46, %v1890_v47 }
  0x76   : > { %1218 = vmatpush.bf16.msrb.mxu0 %v1733_v32  ;;  %v1693_v32 = vor.u32 %v2012_v52, %v1690_v53 }
  0x77   : > { %1231 = vmatpush.bf16.msrb.mxu1 %v1797_v62  ;;  %v1757_v62 = vor.u32 %v2028_v56, %v1754_v57 }
  0x78   : > { %1244 = vmatpush.bf16.msrb.mxu2 %v1861_v1 }
  0x79   : > { %1257 = vmatpush.bf16.msrb.mxu3 %v1925_v50 }
  0x7a   : > { %1219 = vmatpush.bf16.msrb.mxu0 %v1725_v6 }
  0x7b   : > { %1232 = vmatpush.bf16.msrb.mxu1 %v1789_v7 }
  0x7c   : > { %1245 = vmatpush.bf16.msrb.mxu2 %v1853_v10 }
  0x7d   : > { %1258 = vmatpush.bf16.msrb.mxu3 %v1917_v11 }
  0x7e   : > { %1220 = vmatpush.bf16.msrb.mxu0 %v1717_v18 }
  0x7f   : > { %1233 = vmatpush.bf16.msrb.mxu1 %v1781_v19 }
  0x80   : > { %1246 = vmatpush.bf16.msrb.mxu2 %v1845_v22 }
  0x81   : > { %1259 = vmatpush.bf16.msrb.mxu3 %v1909_v25 }
  0x82   : > { %1221 = vmatpush.bf16.msrb.mxu0 %v1709_v36 }
  0x83   : > { %1234 = vmatpush.bf16.msrb.mxu1 %v1773_v37 }
  0x84   : > { %1247 = vmatpush.bf16.msrb.mxu2 %v1837_v40 }
  0x85   : > { %1260 = vmatpush.bf16.msrb.mxu3 %v1901_v41 }
  0x86   : > { %1222 = vmatpush.bf16.msrb.mxu0 %v1701_v48 }
  0x87   : > { %1235 = vmatpush.bf16.msrb.mxu1 %v1765_v49 }
  0x88   : > { %1248 = vmatpush.bf16.msrb.mxu2 %v1829_v54 }
  0x89   : > { %1261 = vmatpush.bf16.msrb.mxu3 %v1893_v55 }
  0x8a   : > { %1223 = vmatpush.bf16.msrb.mxu0 %v1693_v32 }
  0x8b   : > { %1236 = vmatpush.bf16.msrb.mxu1 %v1757_v62 }
  0x8c   : > { %1249 = vmatpush.bf16.msrb.mxu2 %v1821_v63 }
  0x8d   : > { %1262 = vmatpush.bf16.msrb.mxu3 %v1885_v0  ;;  %1224 = vmatmul.bf16.vlgmr.msrb.gmra.mxu0 %v2651_v23 }
  0x8e   : > { %1237 = vmatmul.bf16.vlgmr.msrb.gmra.mxu1 %v2653_v24 }
  0x8f   : > { %1250 = vmatmul.bf16.vlgmr.msrb.gmra.mxu2 %v2664_v28 }
  0x90   : > { %1263 = vmatmul.bf16.vlgmr.msrb.gmra.mxu3 %v2666_v29 }
  0xb6   : > { %v1069_v1 = vpop.f32.mrf.mxu0 }
  0xb7   : > { %v1082_v50 = vpop.f32.mrf.mxu1 }
  0xb8   : > { %v1083_v51 = vadd.f32 %v1082_v50, %v1069_v1 }
  0xba   : > { %v1273_v30 = vpop.permute.xlu0 %1272 }
  0xbe   : > { %v1071_v33 = vpop.f32.mrf.mxu0 }
  0xbf   : > { %v1084_v2 = vpop.f32.mrf.mxu1 }
  0xc3   : > { %v1108_v4 = vpop.f32.mrf.mxu3 }
  0xc4   : > { %v1095_v3 = vpop.f32.mrf.mxu2 }
  0xc5   : > { %v1096_v29 = vadd.f32 %v1095_v3, %v1083_v51 }
  0xc7   : > { %v1109_v15 = vadd.f32 %v1108_v4, %v1096_v29 }
  0xcb   : > { %v1110_v8 = vpop.f32.mrf.mxu3 }
  0xcc   : > { %v1121_v5 = vpop.f32.mrf.mxu0  ;;  %v1097_v7 = vpop.f32.mrf.mxu2  ;;  %v1318_v8 = vlaneseq }
  0xcd   : > { %v1134_v6 = vpop.f32.mrf.mxu1  ;;  %v1122_v19 = vadd.f32 %v1121_v5, %v1109_v15 }
  0xce   : > { %vm1320_vm8 = vcmp.lt.s32.totalorder %v1318_v8, 256 }
  0xcf   : > { %v1135_v21 = vadd.f32 %v1134_v6, %v1122_v19 }
  0xd4   : > { %v1123_v9 = vpop.f32.mrf.mxu0  ;;  %v1147_v23 = vpop.f32.mrf.mxu2 }
  0xd5   : > { %v1136_v10 = vpop.f32.mrf.mxu1  ;;  %v1160_v11 = vpop.f32.mrf.mxu3  ;;  %v1148_v25 = vadd.f32 %v1147_v23, %v1135_v21 }
  0xd7   : > { %v1161_v27 = vadd.f32 %v1160_v11, %v1148_v25 }
  0xd9   : > { %v1275_v34 = vmul.f32 %v1273_v30, %v1161_v27 }
  0xdb   : > { %v1294_v38 = vmul.f32 %v1275_v34, %v1275_v34  ;;  %v1278_v40 = vsel %vm1277_vm6, %v1275_v34, 0.0 }
  0xdc   : > { %v1149_v24 = vpop.f32.mrf.mxu2  ;;  %v1279_v43 = vrot.slane %v1278_v40, 4 }
  0xdd   : > { %v1162_v12 = vpop.f32.mrf.mxu3  ;;  %v1296_v41 = vsel %vm1277_vm6, %v1294_v38, 0.0 }
  0xde   : > { %v1297_v49 = vrot.slane %v1296_v41, 4  ;;  %v1280_v53 = vadd.f32 %v1279_v43, %v1278_v40 }
  0xe0   : > { %v1298_v56 = vadd.f32 %v1297_v49, %v1296_v41  ;;  %v1281_v59 = vrot.slane %v1280_v53, 2 }
  0xe2   : > { %v1299_v63 = vrot.slane %v1298_v56, 2  ;;  %v1282_v50 = vadd.f32 %v1281_v59, %v1280_v53 }
  0xe4   : > { %v1300_v2 = vadd.f32 %v1299_v63, %v1298_v56  ;;  %v1283_v5 = vrot.slane %v1282_v50, 1 }
  0xe6   : > { %v1301_v9 = vrot.slane %v1300_v2, 1  ;;  %v1284_v11 = vadd.f32 %v1283_v5, %v1282_v50 }
  0xea   : > { %v1173_v28 = vpop.f32.mrf.mxu0 }
  0xeb   : > { %v1186_v13 = vpop.f32.mrf.mxu1 }
  0xec   : > { %v1187_v26 = vadd.f32 %v1186_v13, %v1173_v28  ;;  %v1302_v28 = vadd.f32 %v1301_v9, %v1300_v2 }
  0xf2   : > { %v1199_v14 = vpop.f32.mrf.mxu2  ;;  %v1175_v17 = vpop.f32.mrf.mxu0 }
  0xf3   : > { %v1212_v16 = vpop.f32.mrf.mxu3  ;;  %v1188_v18 = vpop.f32.mrf.mxu1  ;;  %v1200_v31 = vadd.f32 %v1199_v14, %v1187_v26 }
  0xf5   : > { %v1213_v35 = vadd.f32 %v1212_v16, %v1200_v31 }
  0xfa   : > { %v1201_v20 = vpop.f32.mrf.mxu2 }
  0xfb   : > { %v1214_v22 = vpop.f32.mrf.mxu3 }
 0x10a   : > { %v1225_v36 = vpop.f32.mrf.mxu0 }
 0x10b   : > { %v1238_v37 = vpop.f32.mrf.mxu1  ;;  %v1226_v39 = vadd.f32 %v1225_v36, %v1213_v35 }
 0x10d   : > { %v1239_v42 = vadd.f32 %v1238_v37, %v1226_v39 }
 0x112   : > { %v1251_v44 = vpop.f32.mrf.mxu2  ;;  %v1227_v47 = vpop.f32.mrf.mxu0 }
 0x113   : > { %v1264_v45 = vpop.f32.mrf.mxu3  ;;  %v1252_v46 = vadd.f32 %v1251_v44, %v1239_v42  ;;  %v1240_v48 = vpop.f32.mrf.mxu1 }
 0x115   : > { %v1265_v52 = vadd.f32 %v1264_v45, %v1252_v46 }
 0x117   : > { %v1268_v54 = vpack.c.bf16 %v1265_v52, %v1161_v27  ;;  %v1276_v55 = vmul.f32 %v1273_v30, %v1265_v52 }
 0x119   : > { %1269 = vst [vmem:[%s205_s9] sm:$0x77] %v1268_v54  ;;  %v1285_v57 = vsel %vm1277_vm6, %v1276_v55, 0.0  ;;  %v1295_v58 = vmul.f32 %v1276_v55, %v1276_v55 }
 0x11a   : > { %v1286_v60 = vrot.slane %v1285_v57, 4  ;;  %v1253_v61 = vpop.f32.mrf.mxu2 }
 0x11b   : > { %v1266_v32 = vpop.f32.mrf.mxu3  ;;  %v1303_v62 = vsel %vm1277_vm6, %v1295_v58, 0.0 }
 0x11c   : > { %v1287_v0 = vadd.f32 %v1286_v60, %v1285_v57  ;;  %v1304_v1 = vrot.slane %v1303_v62, 4 }
 0x11e   : > { %v1288_v51 = vrot.slane %v1287_v0, 2  ;;  %v1305_v33 = vadd.f32 %v1304_v1, %v1303_v62 }
 0x120   : > { %v1289_v3 = vadd.f32 %v1288_v51, %v1287_v0  ;;  %v1306_v4 = vrot.slane %v1305_v33, 2 }
 0x122   : > { %v1290_v6 = vrot.slane %v1289_v3, 1  ;;  %v1307_v7 = vadd.f32 %v1306_v4, %v1305_v33 }
 0x124   : > { %v1291_v10 = vadd.f32 %v1290_v6, %v1289_v3  ;;  %v1308_v23 = vrot.slane %v1307_v7, 1 }
 0x126   : > { %v1309_v24 = vadd.f32 %v1308_v23, %v1307_v7  ;;  %v1314_v12 = vrot.slane %v1291_v10, 7 }
 0x128   : > { %v1316_v13 = vsel %vm1315_vm7, %v1284_v11, %v1314_v12  ;;  %v1325_v29 = vrot.slane %v1309_v24, 7 }
 0x129   : > { %1322 = vst.msk [vmem:[%s210_s14] ss:$2 sm:$0x3] %vm1320_vm8, %v1316_v13 }
 0x12a   : > { %v1326_v14 = vsel %vm1315_vm7, %v1302_v28, %v1325_v29 }
 0x12b   : > { %1942 = vst.msk [vmem:[%s210_s14 + $0x1] ss:$2 sm:$0x3] %vm1320_vm8, %v1326_v14 }
 0x12c PF: > { %s15_s15 = sadd.s32 1, %s2092_s15  }
 0x12d   : > { %p12_p4 = scmp.ge.s32.totalorder %s15_s15, 4  }
 0x12f   :  { %14 = sbr.rel (!%p12_p4) target bundleno = 1 (0x1), region = 75 }

// kernel: convnet_forward.15
= control target key start
LH: loop header
LB: loop body
LE: loop exit
PB: predicated region body
PF: predicated region fallthrough
CT: control target
= control target key end

     0   :  { %s300_s12 = smov 0   ;;  %s323_s0 = inlined_call_operand.vmem [shape: bf16[2,2,256], index: 0, kind: input, shape index: {}]   ;;  %s324_s1 = inlined_call_operand.vmem [shape: f32[1,64], index: 1, kind: input, shape index: {}]   ;;  %s325_s2 = inlined_call_operand.vmem [shape: f32[1,64], index: 2, kind: input, shape index: {}]   ;;  %s326_s3 = inlined_call_operand.vmem [shape: bf16[2,2,64], index: 3, kind: output, shape index: {}]  }
   0x1 LB: > { %s252_s13 = sadd.s32 4294967295, %s277_s12   ;;  %p256_p0 = scmp.ge.s32.totalorder %s277_s12, 1  ;;  %s277_s12 = sphi %s300_s12, %s13_s12  }
   0x2   : > { %p136_p1 = scmp.lt.s32.totalorder %s277_s12, 3 }
   0x4   : > { %p137_p2 = pnand %p256_p0, %p136_p1 }
   0x5   : > { %s279_s16 = smov (!%p137_p2), 64   ;;  %p157_p3 = scmp.lt.s32.totalorder (!%p137_p2), %s252_s13, 1 }
   0x6   : > { %140 = sbr.rel (%p137_p2) target bundleno = 267 (0x10b), region = 32 }
   0xb   : > { %v269_v0 = vld [vmem:[%s324_s1] ss:$0 sm:$0xff]  ;;  %s328_s13 = smov (!%p157_p3, %s252_s13), 1  ;;  %vm203_vm0 = vcmask 516096  }
   0xc   : > { %176 = vrot.lane.b32.xlu0 %v269_v0, %s279_s16  ;;  %v270_v1 = vld [vmem:[%s325_s2] ss:$0 sm:$0xff]  ;;  %s257_s19 = sshll.u32 %s328_s13, 1  ;;  %s163_s25 = scalar_lea.vmem %s326_s3, %s328_s13 }
   0xd   : > { %s160_s22 = scalar_lea.vmem %s323_s0, %s257_s19 }
   0xe   : > { %v166_v3 = vld [vmem:[%s160_s22] sm:$0x1]  ;;  %v189_v6 = vld [vmem:[%s160_s22 + $0x1] sm:$0x1] }
   0xf   : > { %v167_v4 = vunpack.c.l.bf16 %v166_v3  ;;  %v190_v9 = vunpack.c.l.bf16 %v189_v6 }
  0x11   : > { %v171_v12 = vmul.f32 %v269_v0, %v167_v4  ;;  %v191_v13 = vmul.f32 %v269_v0, %v190_v9 }
  0x13   : > { %v175_v14 = vadd.f32 %v270_v1, %v171_v12  ;;  %v192_v17 = vadd.f32 %v270_v1, %v191_v13 }
  0x14   : > { %180 = vrot.lane.b32.xlu0 %v270_v1, %s279_s16 }
  0x7e   : > { %v177_v2 = vpop.permute.xlu0 %176 }
  0x7f   : > { %v179_v5 = vmul.f32 %v177_v2, %v167_v4  ;;  %v194_v10 = vmul.f32 %v190_v9, %v177_v2 }
  0x86   : > { %v181_v7 = vpop.permute.xlu0 %180 }
  0x87   : > { %v183_v8 = vadd.f32 %v181_v7, %v179_v5  ;;  %v195_v11 = vadd.f32 %v194_v10, %v181_v7 }
  0x89   : > { %185 = vrot.lane.b32.xlu1 %v183_v8, %s279_s16 }
  0x91   : > { %197 = vrot.lane.b32.xlu1 %v195_v11, %s279_s16 }
  0xfb   : > { %v186_v15 = vpop.permute.xlu1 %185 }
  0xfc   : > { %v188_v16 = vmax.f32 %v175_v14, %v186_v15 }
  0xfe   : > { %v193_v18 = vmax.f32 %v188_v16, %v192_v17 }
 0x103   : > { %v198_v19 = vpop.permute.xlu1 %197 }
 0x104   : > { %v200_v20 = vmax.f32 %v193_v18, %v198_v19 }
 0x106   : > { %v201_v21 = vmax.f32 %v200_v20, 0.0 }
 0x108   : > { %v202_v22 = vpack.c.bf16 %v201_v21, %v201_v21 }
 0x10a   : > { %204 = vst.msk [vmem:[%s163_s25] sm:$0x1] %vm203_vm0, %v202_v22 }
 0x10b PF: > { %s13_s12 = sadd.s32 1, %s277_s12  }
 0x10c   : > { %p10_p4 = scmp.ge.s32.totalorder %s13_s12, 4  }
 0x10e   :  { %12 = sbr.rel (!%p10_p4) target bundleno = 1 (0x1), region = 62 }

// kernel: convnet_forward.14
= control target key start
LH: loop header
LB: loop body
LE: loop exit
PB: predicated region body
PF: predicated region fallthrough
CT: control target
= control target key end

     0   :  { %s2126_s15 = smov 0   ;;  %s2998_s0 = inlined_call_operand.vmem [shape: bf16[2,8,256], index: 0, kind: input, shape index: {}]   ;;  %s2999_s1 = inlined_call_operand.vmem [shape: bf16[1024,256], index: 1, kind: input, shape index: {}]   ;;  %s3000_s2 = inlined_call_operand.vmem [shape: f32[2,1], index: 2, kind: input, shape index: {}]   ;;  %s3001_s3 = inlined_call_operand.vmem [shape: bf16[2,2,256], index: 3, kind: output, shape index: {0}]   ;;  %s3002_s4 = inlined_call_operand.vmem [shape: f32[2,2,256], index: 4, kind: output, shape index: {1}]  }
   0x1 LB: > { %s1425_s16 = sadd.s32 4294967295, %s2098_s15   ;;  %p1429_p0 = scmp.ge.s32.totalorder %s2098_s15, 1  ;;  %s2098_s15 = sphi %s2126_s15, %s15_s15  }
   0x2   : > { %p165_p1 = scmp.lt.s32.totalorder %s2098_s15, 3 }
   0x4   : > { %p166_p2 = pnand %p1429_p0, %p165_p1 }
   0x5   : > { %p2382_p3 = scmp.lt.s32.totalorder (!%p166_p2), %s1425_s16, 1 }
   0x6   : > { %169 = sbr.rel (%p166_p2) target bundleno = 307 (0x133), region = 32 }
   0xb   : > { %v1495_v0 = vld [vmem:[%s2999_s1 + $0x70] sm:$0xf]  ;;  %v1969_v1 = vld [vmem:[%s2999_s1 + $0x74] sm:$0xf0]  ;;  %v1487_v11 = vld [vmem:[%s2999_s1 + $0x60] sm:$0xf] }
   0xc   : > { %v1559_v2 = vld [vmem:[%s2999_s1 + $0xf0] sm:$0xf]  ;;  %v1496_v3 = vor.u32 %v1969_v1, %v1495_v0  ;;  %v1985_v4 = vld [vmem:[%s2999_s1 + $0xf4] sm:$0xf0]  ;;  %v1967_v13 = vld [vmem:[%s2999_s1 + $0x64] sm:$0xf0] }
   0xd   : > { %v1623_v5 = vld [vmem:[%s2999_s1 + $0x170] sm:$0xf]  ;;  %v2001_v6 = vld [vmem:[%s2999_s1 + $0x174] sm:$0xf0]  ;;  %v1560_v7 = vor.u32 %v1985_v4, %v1559_v2  ;;  %v1551_v14 = vld [vmem:[%s2999_s1 + $0xe0] sm:$0xf]  ;;  %v1488_v16 = vor.u32 %v1967_v13, %v1487_v11 }
   0xe   : > { %v1624_v8 = vor.u32 %v2001_v6, %v1623_v5  ;;  %v1687_v9 = vld [vmem:[%s2999_s1 + $0x1f0] sm:$0xf]  ;;  %v2017_v10 = vld [vmem:[%s2999_s1 + $0x1f4] sm:$0xf0]  ;;  %1064 = vmatpush.bf16.msra.mxu0 %v1496_v3  ;;  %v1983_v15 = vld [vmem:[%s2999_s1 + $0xe4] sm:$0xf0] }
   0xf   : > { %v1688_v12 = vor.u32 %v2017_v10, %v1687_v9  ;;  %1077 = vmatpush.bf16.msra.mxu1 %v1560_v7  ;;  %v1552_v17 = vor.u32 %v1983_v15, %v1551_v14  ;;  %v1615_v18 = vld [vmem:[%s2999_s1 + $0x160] sm:$0xf]  ;;  %v1999_v19 = vld [vmem:[%s2999_s1 + $0x164] sm:$0xf0]  ;;  %v1479_v23 = vld [vmem:[%s2999_s1 + $0x50] sm:$0xf] }
  0x10   : > { %1090 = vmatpush.bf16.msra.mxu2 %v1624_v8  ;;  %v1679_v20 = vld [vmem:[%s2999_s1 + $0x1e0] sm:$0xf]  ;;  %v1616_v21 = vor.u32 %v1999_v19, %v1615_v18  ;;  %v2015_v22 = vld [vmem:[%s2999_s1 + $0x1e4] sm:$0xf0]  ;;  %v1965_v24 = vld [vmem:[%s2999_s1 + $0x54] sm:$0xf0] }
  0x11   : > { %1103 = vmatpush.bf16.msra.mxu3 %v1688_v12  ;;  %v1680_v25 = vor.u32 %v2015_v22, %v1679_v20  ;;  %v1543_v26 = vld [vmem:[%s2999_s1 + $0xd0] sm:$0xf]  ;;  %v1981_v27 = vld [vmem:[%s2999_s1 + $0xd4] sm:$0xf0]  ;;  %v1480_v29 = vor.u32 %v1965_v24, %v1479_v23  ;;  %v1471_v35 = vld [vmem:[%s2999_s1 + $0x40] sm:$0xf] }
  0x12   : > { %v1607_v28 = vld [vmem:[%s2999_s1 + $0x150] sm:$0xf]  ;;  %1065 = vmatpush.bf16.msra.mxu0 %v1488_v16  ;;  %v1997_v30 = vld [vmem:[%s2999_s1 + $0x154] sm:$0xf0]  ;;  %v1544_v33 = vor.u32 %v1981_v27, %v1543_v26  ;;  %v1963_v36 = vld [vmem:[%s2999_s1 + $0x44] sm:$0xf0] }
  0x13   : > { %v1671_v31 = vld [vmem:[%s2999_s1 + $0x1d0] sm:$0xf]  ;;  %v2013_v32 = vld [vmem:[%s2999_s1 + $0x1d4] sm:$0xf0]  ;;  %1078 = vmatpush.bf16.msra.mxu1 %v1552_v17  ;;  %v1608_v34 = vor.u32 %v1997_v30, %v1607_v28  ;;  %v1535_v37 = vld [vmem:[%s2999_s1 + $0xc0] sm:$0xf]  ;;  %v1472_v44 = vor.u32 %v1963_v36, %v1471_v35 }
  0x14   : > { %1091 = vmatpush.bf16.msra.mxu2 %v1616_v21  ;;  %v1672_v38 = vor.u32 %v2013_v32, %v1671_v31  ;;  %v1979_v39 = vld [vmem:[%s2999_s1 + $0xc4] sm:$0xf0]  ;;  %v1599_v40 = vld [vmem:[%s2999_s1 + $0x140] sm:$0xf]  ;;  %v1463_v47 = vld [vmem:[%s2999_s1 + $0x30] sm:$0xf] }
  0x15   : > { %1104 = vmatpush.bf16.msra.mxu3 %v1680_v25  ;;  %v1995_v41 = vld [vmem:[%s2999_s1 + $0x144] sm:$0xf0]  ;;  %v1663_v42 = vld [vmem:[%s2999_s1 + $0x1c0] sm:$0xf]  ;;  %v1536_v45 = vor.u32 %v1979_v39, %v1535_v37  ;;  %v1961_v48 = vld [vmem:[%s2999_s1 + $0x34] sm:$0xf0] }
  0x16   : > { %v2011_v43 = vld [vmem:[%s2999_s1 + $0x1c4] sm:$0xf0]  ;;  %1066 = vmatpush.bf16.msra.mxu0 %v1480_v29  ;;  %v1600_v46 = vor.u32 %v1995_v41, %v1599_v40  ;;  %v1527_v49 = vld [vmem:[%s2999_s1 + $0xb0] sm:$0xf]  ;;  %v1977_v51 = vld [vmem:[%s2999_s1 + $0xb4] sm:$0xf0]  ;;  %v1464_v56 = vor.u32 %v1961_v48, %v1463_v47 }
  0x17   : > { %1079 = vmatpush.bf16.msra.mxu1 %v1544_v33  ;;  %v1664_v50 = vor.u32 %v2011_v43, %v1663_v42  ;;  %v1591_v52 = vld [vmem:[%s2999_s1 + $0x130] sm:$0xf]  ;;  %v1993_v53 = vld [vmem:[%s2999_s1 + $0x134] sm:$0xf0]  ;;  %v1528_v57 = vor.u32 %v1977_v51, %v1527_v49  ;;  %v1455_v59 = vld [vmem:[%s2999_s1 + $0x20] sm:$0xf] }
  0x18   : > { %1092 = vmatpush.bf16.msra.mxu2 %v1608_v34  ;;  %v1655_v54 = vld [vmem:[%s2999_s1 + $0x1b0] sm:$0xf]  ;;  %v2009_v55 = vld [vmem:[%s2999_s1 + $0x1b4] sm:$0xf0]  ;;  %v1592_v58 = vor.u32 %v1993_v53, %v1591_v52  ;;  %v1959_v60 = vld [vmem:[%s2999_s1 + $0x24] sm:$0xf0] }
  0x19   : > { %1105 = vmatpush.bf16.msra.mxu3 %v1672_v38  ;;  %v1519_v61 = vld [vmem:[%s2999_s1 + $0xa0] sm:$0xf]  ;;  %v1656_v62 = vor.u32 %v2009_v55, %v1655_v54  ;;  %v1975_v63 = vld [vmem:[%s2999_s1 + $0xa4] sm:$0xf0]  ;;  %v1456_v4 = vor.u32 %v1959_v60, %v1455_v59  ;;  %v1447_v7 = vld [vmem:[%s2999_s1 + $0x10] sm:$0xf] }
  0x1a   : > { %1067 = vmatpush.bf16.msra.mxu0 %v1472_v44  ;;  %v1583_v0 = vld [vmem:[%s2999_s1 + $0x120] sm:$0xf]  ;;  %v1991_v1 = vld [vmem:[%s2999_s1 + $0x124] sm:$0xf0]  ;;  %v1520_v5 = vor.u32 %v1975_v63, %v1519_v61  ;;  %v1957_v8 = vld [vmem:[%s2999_s1 + $0x14] sm:$0xf0] }
  0x1b   : > { %1080 = vmatpush.bf16.msra.mxu1 %v1536_v45  ;;  %v1647_v2 = vld [vmem:[%s2999_s1 + $0x1a0] sm:$0xf]  ;;  %v2007_v3 = vld [vmem:[%s2999_s1 + $0x1a4] sm:$0xf0]  ;;  %v1584_v6 = vor.u32 %v1991_v1, %v1583_v0  ;;  %v1511_v9 = vld [vmem:[%s2999_s1 + $0x90] sm:$0xf]  ;;  %v1448_v16 = vor.u32 %v1957_v8, %v1447_v7 }
  0x1c   : > { %1093 = vmatpush.bf16.msra.mxu2 %v1600_v46  ;;  %v1648_v10 = vor.u32 %v2007_v3, %v1647_v2  ;;  %v1973_v11 = vld [vmem:[%s2999_s1 + $0x94] sm:$0xf0]  ;;  %v1575_v12 = vld [vmem:[%s2999_s1 + $0x110] sm:$0xf]  ;;  %v1439_v17 = vld [vmem:[%s2999_s1] sm:$0xf] }
  0x1d   : > { %1106 = vmatpush.bf16.msra.mxu3 %v1664_v50  ;;  %v1989_v13 = vld [vmem:[%s2999_s1 + $0x114] sm:$0xf0]  ;;  %v1639_v14 = vld [vmem:[%s2999_s1 + $0x190] sm:$0xf]  ;;  %v1955_v18 = vld [vmem:[%s2999_s1 + $0x4] sm:$0xf0]  ;;  %v1512_v19 = vor.u32 %v1973_v11, %v1511_v9 }
  0x1e   : > { %1068 = vmatpush.bf16.msra.mxu0 %v1464_v56  ;;  %v2005_v15 = vld [vmem:[%s2999_s1 + $0x194] sm:$0xf0]  ;;  %v1576_v20 = vor.u32 %v1989_v13, %v1575_v12  ;;  %v1503_v21 = vld [vmem:[%s2999_s1 + $0x80] sm:$0xf]  ;;  %v1971_v22 = vld [vmem:[%s2999_s1 + $0x84] sm:$0xf0]  ;;  %v1440_v31 = vor.u32 %v1955_v18, %v1439_v17 }
  0x1f   : > { %1081 = vmatpush.bf16.msra.mxu1 %v1528_v57  ;;  %v1567_v23 = vld [vmem:[%s2999_s1 + $0x100] sm:$0xf]  ;;  %v1640_v24 = vor.u32 %v2005_v15, %v1639_v14  ;;  %v1987_v25 = vld [vmem:[%s2999_s1 + $0x104] sm:$0xf0]  ;;  %v1751_v28 = vld [vmem:[%s2999_s1 + $0x270] sm:$0xf]  ;;  %v1504_v35 = vor.u32 %v1971_v22, %v1503_v21 }
  0x20   : > { %1094 = vmatpush.bf16.msra.mxu2 %v1592_v58  ;;  %v1631_v26 = vld [vmem:[%s2999_s1 + $0x180] sm:$0xf]  ;;  %v2003_v27 = vld [vmem:[%s2999_s1 + $0x184] sm:$0xf0]  ;;  %v2033_v29 = vld [vmem:[%s2999_s1 + $0x274] sm:$0xf0]  ;;  %v1568_v36 = vor.u32 %v1987_v25, %v1567_v23 }
  0x21   : > { %1107 = vmatpush.bf16.msra.mxu3 %v1656_v62  ;;  %v1815_v30 = vld [vmem:[%s2999_s1 + $0x2f0] sm:$0xf]  ;;  %v2049_v32 = vld [vmem:[%s2999_s1 + $0x2f4] sm:$0xf0]  ;;  %v1632_v39 = vor.u32 %v2003_v27, %v1631_v26  ;;  %v1752_v40 = vor.u32 %v2033_v29, %v1751_v28  ;;  %v1743_v41 = vld [vmem:[%s2999_s1 + $0x260] sm:$0xf] }
  0x22   : > { %1069 = vmatpush.bf16.msra.mxu0 %v1456_v4  ;;  %v1879_v33 = vld [vmem:[%s2999_s1 + $0x370] sm:$0xf]  ;;  %v2065_v34 = vld [vmem:[%s2999_s1 + $0x374] sm:$0xf0]  ;;  %v2031_v42 = vld [vmem:[%s2999_s1 + $0x264] sm:$0xf0]  ;;  %v1816_v43 = vor.u32 %v2049_v32, %v1815_v30 }
  0x23   : > { %1082 = vmatpush.bf16.msra.mxu1 %v1520_v5  ;;  %v1943_v37 = vld [vmem:[%s2999_s1 + $0x3f0] sm:$0xf]  ;;  %v2081_v38 = vld [vmem:[%s2999_s1 + $0x3f4] sm:$0xf0]  ;;  %v1880_v44 = vor.u32 %v2065_v34, %v1879_v33  ;;  %v1807_v45 = vld [vmem:[%s2999_s1 + $0x2e0] sm:$0xf]  ;;  %v1744_v54 = vor.u32 %v2031_v42, %v1743_v41 }
  0x24   : > { %1095 = vmatpush.bf16.msra.mxu2 %v1584_v6  ;;  %v2047_v46 = vld [vmem:[%s2999_s1 + $0x2e4] sm:$0xf0]  ;;  %v1871_v47 = vld [vmem:[%s2999_s1 + $0x360] sm:$0xf]  ;;  %v1944_v48 = vor.u32 %v2081_v38, %v1943_v37  ;;  %v1735_v52 = vld [vmem:[%s2999_s1 + $0x250] sm:$0xf] }
  0x25   : > { %1108 = vmatpush.bf16.msra.mxu3 %v1648_v10  ;;  %v2063_v49 = vld [vmem:[%s2999_s1 + $0x364] sm:$0xf0]  ;;  %v1935_v50 = vld [vmem:[%s2999_s1 + $0x3e0] sm:$0xf]  ;;  %v2029_v53 = vld [vmem:[%s2999_s1 + $0x254] sm:$0xf0]  ;;  %v1808_v59 = vor.u32 %v2047_v46, %v1807_v45 }
  0x26   : > { %1070 = vmatpush.bf16.msra.mxu0 %v1448_v16  ;;  %v2079_v51 = vld [vmem:[%s2999_s1 + $0x3e4] sm:$0xf0]  ;;  %v1799_v55 = vld [vmem:[%s2999_s1 + $0x2d0] sm:$0xf]  ;;  %v2045_v56 = vld [vmem:[%s2999_s1 + $0x2d4] sm:$0xf0]  ;;  %v1872_v60 = vor.u32 %v2063_v49, %v1871_v47  ;;  %v1736_v2 = vor.u32 %v2029_v53, %v1735_v52 }
  0x27   : > { %1083 = vmatpush.bf16.msra.mxu1 %v1512_v19  ;;  %v1863_v57 = vld [vmem:[%s2999_s1 + $0x350] sm:$0xf]  ;;  %v2061_v58 = vld [vmem:[%s2999_s1 + $0x354] sm:$0xf0]  ;;  %vm229_vm0 = vsmask.f32 256  ;;  %v1936_v61 = vor.u32 %v2079_v51, %v1935_v50  ;;  %v1800_v7 = vor.u32 %v2045_v56, %v1799_v55 }
  0x28   : > { %1096 = vmatpush.bf16.msra.mxu2 %v1576_v20  ;;  %vm230_vm1 = vsmask.f32 1284  ;;  %vm232_vm2 = vsmask.f32 2312  ;;  %s3009_s16 = smov (!%p2382_p3, %s1425_s16), 1  ;;  %v1864_v8 = vor.u32 %v2061_v58, %v1863_v57  ;;  %vm213_vm11 = vcmask 1040384  }
  0x29   : > { %1109 = vmatpush.bf16.msra.mxu3 %v1640_v24  ;;  %vm231_vm3 = vmor %vm229_vm0, %vm230_vm1  ;;  %vm234_vm4 = vsmask.f32 3340  ;;  %vm236_vm5 = vsmask.f32 4368  ;;  %v1927_v62 = vld [vmem:[%s2999_s1 + $0x3d0] sm:$0xf] }
  0x2a   : > { %1071 = vmatpush.bf16.msra.mxu0 %v1440_v31  ;;  %v2077_v63 = vld [vmem:[%s2999_s1 + $0x3d4] sm:$0xf0]  ;;  %vm233_vm6 = vmor %vm231_vm3, %vm232_vm2  ;;  %vm238_vm7 = vsmask.f32 5396  ;;  %v1727_v0 = vld [vmem:[%s2999_s1 + $0x240] sm:$0xf] }
  0x2b   : > { %1084 = vmatpush.bf16.msra.mxu1 %v1504_v35  ;;  %v2027_v1 = vld [vmem:[%s2999_s1 + $0x244] sm:$0xf0]  ;;  %s1952_s30 = sshll.u32 %s3009_s16, 3  ;;  %vm235_vm8 = vmor %vm233_vm6, %vm234_vm4  ;;  %vm240_vm9 = vsmask.f32 6424  ;;  %vm225_vm12 = vcmask 1041409   ;;  %v1928_v11 = vor.u32 %v2077_v63, %v1927_v62 }
  0x2c   : > { %1097 = vmatpush.bf16.msra.mxu2 %v1568_v36  ;;  %v1791_v3 = vld [vmem:[%s2999_s1 + $0x2c0] sm:$0xf]  ;;  %v2043_v4 = vld [vmem:[%s2999_s1 + $0x2c4] sm:$0xf0]  ;;  %s2432_s17 = scalar_lea.vmem %s2998_s0, %s1952_s30  ;;  %vm237_vm10 = vmor %vm235_vm8, %vm236_vm5  ;;  %vm242_vm15 = vsmask.f32 7452  ;;  %v1728_v18 = vor.u32 %v2027_v1, %v1727_v0 }
  0x2d   : > { %1110 = vmatpush.bf16.msra.mxu3 %v1632_v39  ;;  %v1855_v5 = vld [vmem:[%s2999_s1 + $0x340] sm:$0xf]  ;;  %v2059_v6 = vld [vmem:[%s2999_s1 + $0x344] sm:$0xf0]  ;;  %vm239_vm13 = vmor %vm237_vm10, %vm238_vm7  ;;  %v1792_v22 = vor.u32 %v2043_v4, %v1791_v3  ;;  %vm1287_vm1 = vcmask 1041408   ;;  %s1432_s6 = sshll.u32 %s3009_s16, 1 }
  0x2e   : > { %1116 = vmatpush.bf16.msrb.mxu0 %v1752_v40  ;;  %v210_v9 = vld [vmem:[%s2432_s17] sm:$0x11]  ;;  %vm2439_vm14 = vmor %vm239_vm13, %vm240_vm9  ;;  %v254_v15 = vld [vmem:[%s2432_s17] sm:$0x22]  ;;  %v1856_v23 = vor.u32 %v2059_v6, %v1855_v5  ;;  %s203_s9 = scalar_lea.vmem %s3001_s3, %s1432_s6  ;;  %s1953_s10 = sshll.u32 %s3009_s16, 2 }
  0x2f   : > { %1129 = vmatpush.bf16.msrb.mxu1 %v1816_v43  ;;  %v219_v10 = vld [vmem:[%s2432_s17] sm:$0x33]  ;;  %v212_v12 = vrot.slane %v210_v9, 3  ;;  %v2075_v17 = vld [vmem:[%s2999_s1 + $0x3c4] sm:$0xf0]  ;;  %256 = vst [vmem:[#allocation1] sm:$0xff] %v254_v15  ;;  %vm2456_vm0 = vmor %vm2439_vm14, %vm242_vm15  ;;  %s208_s13 = scalar_lea.vmem %s3002_s4, %s1953_s10 }
  0x30   : > { %1142 = vmatpush.bf16.msrb.mxu2 %v1880_v44  ;;  %v221_v13 = vrot.slane %v219_v10, 3  ;;  %v1919_v16 = vld [vmem:[%s2999_s1 + $0x3c0] sm:$0xf]  ;;  %v1719_v27 = vld [vmem:[%s2999_s1 + $0x230] sm:$0xf] }
  0x31   : > { %1155 = vmatpush.bf16.msrb.mxu3 %v1944_v48  ;;  %v216_v19 = vsel %vm213_vm11, %v210_v9, %v212_v12  ;;  %v1920_v28 = vor.u32 %v2075_v17, %v1919_v16  ;;  %v2025_v29 = vld [vmem:[%s2999_s1 + $0x234] sm:$0xf0]  ;;  %v1783_v30 = vld [vmem:[%s2999_s1 + $0x2b0] sm:$0xf]  ;;  %v261_v33 = vld [vmem:[%s2432_s17] sm:$0x66] }
  0x32   : > { %1117 = vmatpush.bf16.msrb.mxu0 %v1744_v54  ;;  %v224_v20 = vsel %vm213_vm11, %v219_v10, %v221_v13  ;;  %v226_v21 = vsel %vm225_vm12, %v219_v10, %v221_v13  ;;  %218 = vst [vmem:[#allocation2] sm:$0x3] %v216_v19  ;;  %v2041_v31 = vld [vmem:[%s2999_s1 + $0x2b4] sm:$0xf0]  ;;  %v1847_v34 = vld [vmem:[%s2999_s1 + $0x330] sm:$0xf]  ;;  %v1720_v36 = vor.u32 %v2025_v29, %v1719_v27 }
  0x33   : > { %1130 = vmatpush.bf16.msrb.mxu1 %v1808_v59  ;;  %v228_v24 = vrot.slane %v226_v21, 1  ;;  %v244_v26 = vshrl.u32 %v224_v20, 16  ;;  %v2057_v35 = vld [vmem:[%s2999_s1 + $0x334] sm:$0xf0]  ;;  %v1911_v37 = vld [vmem:[%s2999_s1 + $0x3b0] sm:$0xf]  ;;  %v1784_v41 = vor.u32 %v2041_v31, %v1783_v30 }
  0x34   : > { %1143 = vmatpush.bf16.msrb.mxu2 %v1872_v60  ;;  %v2073_v38 = vld [vmem:[%s2999_s1 + $0x3b4] sm:$0xf0]  ;;  %v1711_v39 = vld [vmem:[%s2999_s1 + $0x220] sm:$0xf]  ;;  %v1848_v42 = vor.u32 %v2057_v35, %v1847_v34  ;;  %v2023_v43 = vld [vmem:[%s2999_s1 + $0x224] sm:$0xf0] }
  0x35   : > { %1156 = vmatpush.bf16.msrb.mxu3 %v1936_v61  ;;  %v249_v32 = vshll.u32 %v228_v24, 16  ;;  %v1775_v44 = vld [vmem:[%s2999_s1 + $0x2a0] sm:$0xf]  ;;  %v2039_v45 = vld [vmem:[%s2999_s1 + $0x2a4] sm:$0xf0]  ;;  %v1912_v47 = vor.u32 %v2073_v38, %v1911_v37  ;;  %v1712_v51 = vor.u32 %v2023_v43, %v1711_v39 }
  0x36   : > { %1118 = vmatpush.bf16.msrb.mxu0 %v1736_v2  ;;  %v258_v46 = vld [vmem:[#allocation1 + $0x1] ss:$4 sm:$0xff]  ;;  %v1776_v53 = vor.u32 %v2039_v45, %v1775_v44 }
  0x37   : > { %1131 = vmatpush.bf16.msrb.mxu1 %v1800_v7  ;;  %v251_v40 = vsel %vm2456_vm0, %v244_v26, %v249_v32  ;;  %v1839_v48 = vld [vmem:[%s2999_s1 + $0x320] sm:$0xf]  ;;  %260 = vst [vmem:[#allocation2 + $0x4] sm:$0x3] %v258_v46  ;;  %v2055_v49 = vld [vmem:[%s2999_s1 + $0x324] sm:$0xf0] }
  0x38   : > { %1144 = vmatpush.bf16.msrb.mxu2 %v1864_v8  ;;  %253 = vst [vmem:[#allocation2 + $0x2] sm:$0x3] %v251_v40  ;;  %v1903_v50 = vld [vmem:[%s2999_s1 + $0x3a0] sm:$0xf]  ;;  %v2071_v52 = vld [vmem:[%s2999_s1 + $0x3a4] sm:$0xf0]  ;;  %v1840_v54 = vor.u32 %v2055_v49, %v1839_v48 }
  0x39   : > { %1157 = vmatpush.bf16.msrb.mxu3 %v1928_v11  ;;  %263 = vst [vmem:[#allocation1] sm:$0xff] %v261_v33  ;;  %v1703_v55 = vld [vmem:[%s2999_s1 + $0x210] sm:$0xf]  ;;  %v2021_v56 = vld [vmem:[%s2999_s1 + $0x214] sm:$0xf0]  ;;  %v1904_v58 = vor.u32 %v2071_v52, %v1903_v50 }
  0x3a   : > { %1119 = vmatpush.bf16.msrb.mxu0 %v1728_v18  ;;  %v1767_v57 = vld [vmem:[%s2999_s1 + $0x290] sm:$0xf]  ;;  %v2037_v59 = vld [vmem:[%s2999_s1 + $0x294] sm:$0xf0]  ;;  %v1704_v0 = vor.u32 %v2021_v56, %v1703_v55  ;;  %v1695_v1 = vld [vmem:[%s2999_s1 + $0x200] sm:$0xf] }
  0x3b   : > { %1132 = vmatpush.bf16.msrb.mxu1 %v1792_v22  ;;  %v1831_v60 = vld [vmem:[%s2999_s1 + $0x310] sm:$0xf]  ;;  %v2053_v61 = vld [vmem:[%s2999_s1 + $0x314] sm:$0xf0]  ;;  %v1768_v2 = vor.u32 %v2037_v59, %v1767_v57  ;;  %v2019_v4 = vld [vmem:[%s2999_s1 + $0x204] sm:$0xf0] }
  0x3c   : > { %1145 = vmatpush.bf16.msrb.mxu2 %v1856_v23  ;;  %v1895_v62 = vld [vmem:[%s2999_s1 + $0x390] sm:$0xf]  ;;  %v2069_v63 = vld [vmem:[%s2999_s1 + $0x394] sm:$0xf0]  ;;  %v1832_v3 = vor.u32 %v2053_v61, %v1831_v60  ;;  %v1759_v5 = vld [vmem:[%s2999_s1 + $0x280] sm:$0xf]  ;;  %v1696_v16 = vor.u32 %v2019_v4, %v1695_v1 }
  0x3d   : > { %1158 = vmatpush.bf16.msrb.mxu3 %v1920_v28  ;;  %v2035_v6 = vld [vmem:[%s2999_s1 + $0x284] sm:$0xf0]  ;;  %v1896_v7 = vor.u32 %v2069_v63, %v1895_v62  ;;  %v1823_v8 = vld [vmem:[%s2999_s1 + $0x300] sm:$0xf]  ;;  %v2100_v22 = vmov 0  }
  0x3e   : > { %1120 = vmatpush.bf16.msrb.mxu0 %v1720_v36  ;;  %v2051_v9 = vld [vmem:[%s2999_s1 + $0x304] sm:$0xf0]  ;;  %v1887_v10 = vld [vmem:[%s2999_s1 + $0x380] sm:$0xf]  ;;  %v1760_v17 = vor.u32 %v2035_v6, %v1759_v5  ;;  %2091 = vset.pattern.permute.xlu0 %v2100_v22  ;;  %v1968_v23 = vld [vmem:[%s2999_s1 + $0x74] sm:$0xf] }
  0x3f   : > { %1133 = vmatpush.bf16.msrb.mxu1 %v1784_v41  ;;  %v2067_v13 = vld [vmem:[%s2999_s1 + $0x384] sm:$0xf0]  ;;  %v1824_v18 = vor.u32 %v2051_v9, %v1823_v8  ;;  %v1497_v24 = vld [vmem:[%s2999_s1 + $0x78] sm:$0xf0]  ;;  %v1984_v25 = vld [vmem:[%s2999_s1 + $0xf4] sm:$0xf] }
  0x40   : > { %1146 = vmatpush.bf16.msrb.mxu2 %v1848_v42  ;;  %v265_v11 = vld [vmem:[#allocation1 + $0x1] ss:$4 sm:$0xff]  ;;  %v267_v12 = vld [vmem:[#allocation1 + $0x2] ss:$4 sm:$0xff]  ;;  %v1888_v20 = vor.u32 %v2067_v13, %v1887_v10  ;;  %v1500_v35 = vor.u32 %v1968_v23, %v1497_v24 }
  0x41   : > { %1159 = vmatpush.bf16.msrb.mxu3 %v1912_v47  ;;  %v268_v14 = vshrl.u32 %v265_v11, 16  ;;  %v272_v15 = vshll.u32 %v267_v12, 16  ;;  %v1561_v26 = vld [vmem:[%s2999_s1 + $0xf8] sm:$0xf0]  ;;  %v2000_v27 = vld [vmem:[%s2999_s1 + $0x174] sm:$0xf] }
  0x42   : > { %1121 = vmatpush.bf16.msrb.mxu0 %v1712_v51  ;;  %v1625_v28 = vld [vmem:[%s2999_s1 + $0x178] sm:$0xf0]  ;;  %v2016_v29 = vld [vmem:[%s2999_s1 + $0x1f4] sm:$0xf]  ;;  %v1966_v31 = vld [vmem:[%s2999_s1 + $0x64] sm:$0xf]  ;;  %v1564_v36 = vor.u32 %v1984_v25, %v1561_v26 }
  0x43   : > { %1134 = vmatpush.bf16.msrb.mxu1 %v1776_v53  ;;  %v274_v19 = vsel %vm2456_vm0, %v268_v14, %v272_v15  ;;  %v1689_v30 = vld [vmem:[%s2999_s1 + $0x1f8] sm:$0xf0]  ;;  %v1489_v32 = vld [vmem:[%s2999_s1 + $0x68] sm:$0xf0]  ;;  %v1982_v33 = vld [vmem:[%s2999_s1 + $0xe4] sm:$0xf]  ;;  %v1628_v43 = vor.u32 %v2000_v27, %v1625_v28 }
  0x44   : > { %1147 = vmatpush.bf16.msrb.mxu2 %v1840_v54  ;;  %276 = vst [vmem:[#allocation2 + $0x6] sm:$0x3] %v274_v19  ;;  %v209_v34 = vld [vmem:[%s3000_s2] sm:$0x3]  ;;  %v1553_v37 = vld [vmem:[%s2999_s1 + $0xe8] sm:$0xf0]  ;;  %v1692_v44 = vor.u32 %v2016_v29, %v1689_v30  ;;  %v1492_v48 = vor.u32 %v1966_v31, %v1489_v32 }
  0x45   : > { %1160 = vmatpush.bf16.msrb.mxu3 %v1904_v58  ;;  %v1998_v38 = vld [vmem:[%s2999_s1 + $0x164] sm:$0xf]  ;;  %v1617_v39 = vld [vmem:[%s2999_s1 + $0x168] sm:$0xf0]  ;;  %1282 = vperm.xlu0 %2091, %v209_v34   ;;  %v1556_v49 = vor.u32 %v1982_v33, %v1553_v37  ;;  %v1964_v50 = vld [vmem:[%s2999_s1 + $0x54] sm:$0xf] }
  0x46   : > { %1122 = vmatpush.bf16.msrb.mxu0 %v1704_v0  ;;  %v2014_v46 = vld [vmem:[%s2999_s1 + $0x1e4] sm:$0xf]  ;;  %v1681_v47 = vld [vmem:[%s2999_s1 + $0x1e8] sm:$0xf0]  ;;  %v1481_v51 = vld [vmem:[%s2999_s1 + $0x58] sm:$0xf0]  ;;  %v1620_v52 = vor.u32 %v1998_v38, %v1617_v39 }
  0x47   : > { %1135 = vmatpush.bf16.msrb.mxu1 %v1768_v2  ;;  %v1684_v53 = vor.u32 %v2014_v46, %v1681_v47  ;;  %v1980_v54 = vld [vmem:[%s2999_s1 + $0xd4] sm:$0xf]  ;;  %v1545_v55 = vld [vmem:[%s2999_s1 + $0xd8] sm:$0xf0]  ;;  %v1484_v60 = vor.u32 %v1964_v50, %v1481_v51  ;;  %v1962_v62 = vld [vmem:[%s2999_s1 + $0x44] sm:$0xf] }
  0x48   : > { %1148 = vmatpush.bf16.msrb.mxu2 %v1832_v3  ;;  %v1996_v56 = vld [vmem:[%s2999_s1 + $0x154] sm:$0xf]  ;;  %v1609_v57 = vld [vmem:[%s2999_s1 + $0x158] sm:$0xf0]  ;;  %v1548_v61 = vor.u32 %v1980_v54, %v1545_v55  ;;  %v1473_v63 = vld [vmem:[%s2999_s1 + $0x48] sm:$0xf0] }
  0x49   : > { %1161 = vmatpush.bf16.msrb.mxu3 %v1896_v7  ;;  %v2012_v58 = vld [vmem:[%s2999_s1 + $0x1d4] sm:$0xf]  ;;  %v1673_v59 = vld [vmem:[%s2999_s1 + $0x1d8] sm:$0xf0]  ;;  %v1612_v0 = vor.u32 %v1996_v56, %v1609_v57  ;;  %v1978_v2 = vld [vmem:[%s2999_s1 + $0xc4] sm:$0xf]  ;;  %v1476_v8 = vor.u32 %v1962_v62, %v1473_v63 }
  0x4a   : > { %1123 = vmatpush.bf16.msrb.mxu0 %v1696_v16  ;;  %v1676_v1 = vor.u32 %v2012_v58, %v1673_v59  ;;  %v1537_v3 = vld [vmem:[%s2999_s1 + $0xc8] sm:$0xf0]  ;;  %v1994_v4 = vld [vmem:[%s2999_s1 + $0x144] sm:$0xf]  ;;  %v1960_v10 = vld [vmem:[%s2999_s1 + $0x34] sm:$0xf] }
  0x4b   : > { %1136 = vmatpush.bf16.msrb.mxu1 %v1760_v17  ;;  %v277_v21 = vld [vmem:[#allocation2] sm:$0xff]  ;;  %v2010_v6 = vld [vmem:[%s2999_s1 + $0x1c4] sm:$0xf]  ;;  %v1540_v9 = vor.u32 %v1978_v2, %v1537_v3  ;;  %v1465_v11 = vld [vmem:[%s2999_s1 + $0x38] sm:$0xf0] }
  0x4c   : > { %1149 = vmatpush.bf16.msrb.mxu2 %v1824_v18  ;;  %407 = vst [vmem:[#allocation1] ss:$9 sm:$0xff] %v277_v21  ;;  %v1601_v5 = vld [vmem:[%s2999_s1 + $0x148] sm:$0xf0]  ;;  %v1976_v14 = vld [vmem:[%s2999_s1 + $0xb4] sm:$0xf]  ;;  %v1468_v25 = vor.u32 %v1960_v10, %v1465_v11 }
  0x4d   : > { %1162 = vmatpush.bf16.msrb.mxu3 %v1888_v20  ;;  %v1665_v7 = vld [vmem:[%s2999_s1 + $0x1c8] sm:$0xf0]  ;;  %v1604_v12 = vor.u32 %v1994_v4, %v1601_v5  ;;  %v1529_v15 = vld [vmem:[%s2999_s1 + $0xb8] sm:$0xf0]  ;;  %v1992_v16 = vld [vmem:[%s2999_s1 + $0x134] sm:$0xf] }
  0x4e   : > { %v1668_v13 = vor.u32 %v2010_v6, %v1665_v7  ;;  %v1593_v17 = vld [vmem:[%s2999_s1 + $0x138] sm:$0xf0]  ;;  %v2008_v18 = vld [vmem:[%s2999_s1 + $0x1b4] sm:$0xf]  ;;  %v1958_v22 = vld [vmem:[%s2999_s1 + $0x24] sm:$0xf]  ;;  %v1532_v26 = vor.u32 %v1976_v14, %v1529_v15 }
  0x4f   : > { %v1657_v19 = vld [vmem:[%s2999_s1 + $0x1b8] sm:$0xf0]  ;;  %v1457_v27 = vld [vmem:[%s2999_s1 + $0x28] sm:$0xf0]  ;;  %v1596_v28 = vor.u32 %v1992_v16, %v1593_v17  ;;  %v1974_v30 = vld [vmem:[%s2999_s1 + $0xa4] sm:$0xf] }
  0x50   : > { %v1660_v29 = vor.u32 %v2008_v18, %v1657_v19  ;;  %v1521_v31 = vld [vmem:[%s2999_s1 + $0xa8] sm:$0xf0]  ;;  %v1990_v32 = vld [vmem:[%s2999_s1 + $0x124] sm:$0xf]  ;;  %v1956_v38 = vld [vmem:[%s2999_s1 + $0x14] sm:$0xf] }
  0x51   : > { %v1585_v33 = vld [vmem:[%s2999_s1 + $0x128] sm:$0xf0]  ;;  %v2006_v34 = vld [vmem:[%s2999_s1 + $0x1a4] sm:$0xf]  ;;  %v1524_v37 = vor.u32 %v1974_v30, %v1521_v31  ;;  %v1449_v39 = vld [vmem:[%s2999_s1 + $0x18] sm:$0xf0] }
  0x52   : > { %v1972_v46 = vld [vmem:[%s2999_s1 + $0x94] sm:$0xf]  ;;  %v1513_v47 = vld [vmem:[%s2999_s1 + $0x98] sm:$0xf0]  ;;  %v1441_v55 = vld [vmem:[%s2999_s1 + $0x8] sm:$0xf0] }
  0x53   : > { %v2606_v40 = vld [vmem:[#allocation1 + $0x12] sm:$0xff]  ;;  %v2608_v41 = vld [vmem:[#allocation1] sm:$0xff]  ;;  %v2614_v45 = vld [vmem:[#allocation1 + $0x9] sm:$0xff]  ;;  %v1516_v54 = vor.u32 %v1972_v46, %v1513_v47 }
  0x54   : > { %v2610_v42 = vld [vmem:[#allocation1 + $0x1b] sm:$0xff]  ;;  %1098 = vmatmul.bf16.vlgmr.msra.gmra.mxu2 %v2606_v40  ;;  %1072 = vmatmul.bf16.vlgmr.msra.gmra.mxu0 %v2608_v41  ;;  %v2698_v21 = vld [vmem:[#allocation1 + $0x24] sm:$0xff]  ;;  %v2705_v24 = vld [vmem:[#allocation1 + $0x2d] sm:$0xff] }
  0x55   : > { %1111 = vmatmul.bf16.vlgmr.msra.gmra.mxu3 %v2610_v42  ;;  %1085 = vmatmul.bf16.vlgmr.msra.gmra.mxu1 %v2614_v45  ;;  %v2696_v20 = vld [vmem:[#allocation1 + $0x36] sm:$0xff]  ;;  %v2703_v23 = vld [vmem:[#allocation1 + $0x3f] sm:$0xff]  ;;  %v1505_v57 = vld [vmem:[%s2999_s1 + $0x88] sm:$0xf0] }
  0x56   : > { %1168 = vmatpush.bf16.msra.mxu0 %v1500_v35  ;;  %1181 = vmatpush.bf16.msra.mxu1 %v1564_v36  ;;  %v1649_v35 = vld [vmem:[%s2999_s1 + $0x1a8] sm:$0xf0]  ;;  %v1460_v36 = vor.u32 %v1958_v22, %v1457_v27  ;;  %v2004_v50 = vld [vmem:[%s2999_s1 + $0x194] sm:$0xf]  ;;  %v1641_v51 = vld [vmem:[%s2999_s1 + $0x198] sm:$0xf0] }
  0x57   : > { %1194 = vmatpush.bf16.msra.mxu2 %v1628_v43  ;;  %1207 = vmatpush.bf16.msra.mxu3 %v1692_v44  ;;  %v1588_v43 = vor.u32 %v1990_v32, %v1585_v33  ;;  %v1652_v44 = vor.u32 %v2006_v34, %v1649_v35  ;;  %v1970_v56 = vld [vmem:[%s2999_s1 + $0x84] sm:$0xf]  ;;  %v1644_v59 = vor.u32 %v2004_v50, %v1641_v51  ;;  %v1633_v63 = vld [vmem:[%s2999_s1 + $0x188] sm:$0xf0]  ;;  %v2048_v2 = vld [vmem:[%s2999_s1 + $0x2f4] sm:$0xf] }
  0x58   : > { %v2002_v62 = vld [vmem:[%s2999_s1 + $0x184] sm:$0xf]  ;;  %v1817_v3 = vld [vmem:[%s2999_s1 + $0x2f8] sm:$0xf0]  ;;  %v2064_v4 = vld [vmem:[%s2999_s1 + $0x374] sm:$0xf]  ;;  %v1508_v6 = vor.u32 %v1970_v56, %v1505_v57 }
  0x59   : > { %v1881_v7 = vld [vmem:[%s2999_s1 + $0x378] sm:$0xf0]  ;;  %v1636_v11 = vor.u32 %v2002_v62, %v1633_v63  ;;  %v2030_v14 = vld [vmem:[%s2999_s1 + $0x264] sm:$0xf]  ;;  %v1745_v15 = vld [vmem:[%s2999_s1 + $0x268] sm:$0xf0] }
  0x5a   : > { %1169 = vmatpush.bf16.msra.mxu0 %v1492_v48  ;;  %1182 = vmatpush.bf16.msra.mxu1 %v1556_v49  ;;  %v1988_v48 = vld [vmem:[%s2999_s1 + $0x114] sm:$0xf]  ;;  %v1577_v49 = vld [vmem:[%s2999_s1 + $0x118] sm:$0xf0]  ;;  %v1884_v16 = vor.u32 %v2064_v4, %v1881_v7  ;;  %v2046_v18 = vld [vmem:[%s2999_s1 + $0x2e4] sm:$0xf] }
  0x5b   : > { %1195 = vmatpush.bf16.msra.mxu2 %v1620_v52  ;;  %1208 = vmatpush.bf16.msra.mxu3 %v1684_v53  ;;  %v1954_v52 = vld [vmem:[%s2999_s1 + $0x4] sm:$0xf]  ;;  %v1452_v53 = vor.u32 %v1956_v38, %v1449_v39  ;;  %v1580_v58 = vor.u32 %v1988_v48, %v1577_v49  ;;  %v1809_v19 = vld [vmem:[%s2999_s1 + $0x2e8] sm:$0xf0]  ;;  %v2028_v30 = vld [vmem:[%s2999_s1 + $0x254] sm:$0xf] }
  0x5c   : > { %v1444_v5 = vor.u32 %v1954_v52, %v1441_v55  ;;  %v2062_v22 = vld [vmem:[%s2999_s1 + $0x364] sm:$0xf]  ;;  %v1937_v27 = vld [vmem:[%s2999_s1 + $0x3e8] sm:$0xf0]  ;;  %v1737_v31 = vld [vmem:[%s2999_s1 + $0x258] sm:$0xf0] }
  0x5d   : > { %v2044_v34 = vld [vmem:[%s2999_s1 + $0x2d4] sm:$0xf]  ;;  %v1801_v35 = vld [vmem:[%s2999_s1 + $0x2d8] sm:$0xf0]  ;;  %v1729_v46 = vld [vmem:[%s2999_s1 + $0x248] sm:$0xf0] }
  0x5e   : > { %1170 = vmatpush.bf16.msra.mxu0 %v1484_v60  ;;  %1183 = vmatpush.bf16.msra.mxu1 %v1548_v61  ;;  %v1986_v60 = vld [vmem:[%s2999_s1 + $0x104] sm:$0xf]  ;;  %v1569_v61 = vld [vmem:[%s2999_s1 + $0x108] sm:$0xf0]  ;;  %v2076_v38 = vld [vmem:[%s2999_s1 + $0x3d4] sm:$0xf] }
  0x5f   : > { %1196 = vmatpush.bf16.msra.mxu2 %v1612_v0  ;;  %1209 = vmatpush.bf16.msra.mxu3 %v1676_v1  ;;  %v2032_v0 = vld [vmem:[%s2999_s1 + $0x274] sm:$0xf]  ;;  %v1753_v1 = vld [vmem:[%s2999_s1 + $0x278] sm:$0xf0]  ;;  %v1572_v10 = vor.u32 %v1986_v60, %v1569_v61  ;;  %v2058_v48 = vld [vmem:[%s2999_s1 + $0x344] sm:$0xf] }
  0x60   : > { %v1929_v39 = vld [vmem:[%s2999_s1 + $0x3d8] sm:$0xf0]  ;;  %v1857_v49 = vld [vmem:[%s2999_s1 + $0x348] sm:$0xf0]  ;;  %v2074_v50 = vld [vmem:[%s2999_s1 + $0x3c4] sm:$0xf] }
  0x61   : > { %v1921_v51 = vld [vmem:[%s2999_s1 + $0x3c8] sm:$0xf0]  ;;  %v1721_v55 = vld [vmem:[%s2999_s1 + $0x238] sm:$0xf0]  ;;  %v1860_v56 = vor.u32 %v2058_v48, %v1857_v49  ;;  %v2056_v60 = vld [vmem:[%s2999_s1 + $0x334] sm:$0xf] }
  0x62   : > { %1171 = vmatpush.bf16.msra.mxu0 %v1476_v8  ;;  %1184 = vmatpush.bf16.msra.mxu1 %v1540_v9  ;;  %v2080_v8 = vld [vmem:[%s2999_s1 + $0x3f4] sm:$0xf]  ;;  %v1945_v9 = vld [vmem:[%s2999_s1 + $0x3f8] sm:$0xf0]  ;;  %v1924_v57 = vor.u32 %v2074_v50, %v1921_v51  ;;  %v1777_v7 = vld [vmem:[%s2999_s1 + $0x2a8] sm:$0xf0] }
  0x63   : > { %1197 = vmatpush.bf16.msra.mxu2 %v1604_v12  ;;  %1210 = vmatpush.bf16.msra.mxu3 %v1668_v13  ;;  %v1756_v12 = vor.u32 %v2032_v0, %v1753_v1  ;;  %v1820_v13 = vor.u32 %v2048_v2, %v1817_v3  ;;  %v1948_v17 = vor.u32 %v2080_v8, %v1945_v9  ;;  %v1849_v61 = vld [vmem:[%s2999_s1 + $0x338] sm:$0xf0]  ;;  %v2072_v62 = vld [vmem:[%s2999_s1 + $0x3b4] sm:$0xf]  ;;  %v2022_v2 = vld [vmem:[%s2999_s1 + $0x224] sm:$0xf] }
  0x64   : > { %1150 = vmatmul.bf16.vlgmr.msrb.gmra.mxu2 %v2696_v20  ;;  %1124 = vmatmul.bf16.vlgmr.msrb.gmra.mxu0 %v2698_v21  ;;  %v1913_v63 = vld [vmem:[%s2999_s1 + $0x3b8] sm:$0xf0]  ;;  %v1713_v3 = vld [vmem:[%s2999_s1 + $0x228] sm:$0xf0]  ;;  %v1852_v4 = vor.u32 %v2056_v60, %v1849_v61  ;;  %v2054_v8 = vld [vmem:[%s2999_s1 + $0x324] sm:$0xf] }
  0x65   : > { %1163 = vmatmul.bf16.vlgmr.msrb.gmra.mxu3 %v2703_v23  ;;  %1137 = vmatmul.bf16.vlgmr.msrb.gmra.mxu1 %v2705_v24  ;;  %v1841_v9 = vld [vmem:[%s2999_s1 + $0x328] sm:$0xf0] }
  0x66   : > { %1172 = vmatpush.bf16.msra.mxu0 %v1468_v25  ;;  %1185 = vmatpush.bf16.msra.mxu1 %v1532_v26  ;;  %v1873_v25 = vld [vmem:[%s2999_s1 + $0x368] sm:$0xf0]  ;;  %v2078_v26 = vld [vmem:[%s2999_s1 + $0x3e4] sm:$0xf] }
  0x67   : > { %1198 = vmatpush.bf16.msra.mxu2 %v1596_v28  ;;  %1211 = vmatpush.bf16.msra.mxu3 %v1660_v29  ;;  %v1748_v28 = vor.u32 %v2030_v14, %v1745_v15  ;;  %v1812_v29 = vor.u32 %v2046_v18, %v1809_v19  ;;  %v1876_v32 = vor.u32 %v2062_v22, %v1873_v25  ;;  %v2020_v14 = vld [vmem:[%s2999_s1 + $0x214] sm:$0xf]  ;;  %v1705_v15 = vld [vmem:[%s2999_s1 + $0x218] sm:$0xf0] }
  0x68   : > { %v1940_v33 = vor.u32 %v2078_v26, %v1937_v27  ;;  %v2036_v18 = vld [vmem:[%s2999_s1 + $0x294] sm:$0xf]  ;;  %v1769_v19 = vld [vmem:[%s2999_s1 + $0x298] sm:$0xf0] }
  0x69   : > { %v2052_v22 = vld [vmem:[%s2999_s1 + $0x314] sm:$0xf]  ;;  %v1833_v25 = vld [vmem:[%s2999_s1 + $0x318] sm:$0xf0] }
  0x6a   : > { %1173 = vmatpush.bf16.msra.mxu0 %v1460_v36  ;;  %1186 = vmatpush.bf16.msra.mxu1 %v1524_v37  ;;  %v2060_v36 = vld [vmem:[%s2999_s1 + $0x354] sm:$0xf]  ;;  %v1865_v37 = vld [vmem:[%s2999_s1 + $0x358] sm:$0xf0] }
  0x6b   : > { %1199 = vmatpush.bf16.msra.mxu2 %v1588_v43  ;;  %1212 = vmatpush.bf16.msra.mxu3 %v1652_v44  ;;  %v1804_v43 = vor.u32 %v2044_v34, %v1801_v35  ;;  %v2026_v44 = vld [vmem:[%s2999_s1 + $0x244] sm:$0xf]  ;;  %v1868_v47 = vor.u32 %v2060_v36, %v1865_v37  ;;  %v2068_v26 = vld [vmem:[%s2999_s1 + $0x394] sm:$0xf]  ;;  %v1897_v27 = vld [vmem:[%s2999_s1 + $0x398] sm:$0xf0] }
  0x6c   : > { %v1732_v52 = vor.u32 %v2026_v44, %v1729_v46  ;;  %v2034_v34 = vld [vmem:[%s2999_s1 + $0x284] sm:$0xf]  ;;  %v1761_v35 = vld [vmem:[%s2999_s1 + $0x288] sm:$0xf0] }
  0x6d   : > { %v2050_v36 = vld [vmem:[%s2999_s1 + $0x304] sm:$0xf]  ;;  %v1825_v37 = vld [vmem:[%s2999_s1 + $0x308] sm:$0xf0] }
  0x6e   : > { %1174 = vmatpush.bf16.msra.mxu0 %v1452_v53  ;;  %1187 = vmatpush.bf16.msra.mxu1 %v1516_v54  ;;  %v2024_v54 = vld [vmem:[%s2999_s1 + $0x234] sm:$0xf]  ;;  %v1828_v44 = vor.u32 %v2050_v36, %v1825_v37 }
  0x6f   : > { %1200 = vmatpush.bf16.msra.mxu2 %v1580_v58  ;;  %1213 = vmatpush.bf16.msra.mxu3 %v1644_v59  ;;  %v2040_v58 = vld [vmem:[%s2999_s1 + $0x2b4] sm:$0xf]  ;;  %v1785_v59 = vld [vmem:[%s2999_s1 + $0x2b8] sm:$0xf0]  ;;  %v1724_v0 = vor.u32 %v2024_v54, %v1721_v55 }
  0x70   : > { %v1788_v1 = vor.u32 %v2040_v58, %v1785_v59 }
  0x72   : > { %1175 = vmatpush.bf16.msra.mxu0 %v1444_v5  ;;  %1188 = vmatpush.bf16.msra.mxu1 %v1508_v6  ;;  %v1916_v5 = vor.u32 %v2072_v62, %v1913_v63  ;;  %v2038_v6 = vld [vmem:[%s2999_s1 + $0x2a4] sm:$0xf] }
  0x73   : > { %1201 = vmatpush.bf16.msra.mxu2 %v1572_v10  ;;  %1214 = vmatpush.bf16.msra.mxu3 %v1636_v11  ;;  %v2070_v10 = vld [vmem:[%s2999_s1 + $0x3a4] sm:$0xf]  ;;  %v1905_v11 = vld [vmem:[%s2999_s1 + $0x3a8] sm:$0xf0] }
  0x75   : > { %1176 = vmatmul.bf16.vlgmr.msra.gmra.mxu0 %v2608_v41  ;;  %1189 = vmatmul.bf16.vlgmr.msra.gmra.mxu1 %v2614_v45  ;;  %v1932_v41 = vor.u32 %v2076_v38, %v1929_v39  ;;  %v1793_v45 = vld [vmem:[%s2999_s1 + $0x2c8] sm:$0xf0]  ;;  %v2066_v38 = vld [vmem:[%s2999_s1 + $0x384] sm:$0xf] }
  0x76   : > { %1220 = vmatpush.bf16.msrb.mxu0 %v1756_v12  ;;  %1233 = vmatpush.bf16.msrb.mxu1 %v1820_v13  ;;  %v1716_v12 = vor.u32 %v2022_v2, %v1713_v3  ;;  %v1780_v13 = vor.u32 %v2038_v6, %v1777_v7  ;;  %v1889_v39 = vld [vmem:[%s2999_s1 + $0x388] sm:$0xf0] }
  0x77   : > { %1246 = vmatpush.bf16.msrb.mxu2 %v1884_v16  ;;  %1259 = vmatpush.bf16.msrb.mxu3 %v1948_v17  ;;  %v1844_v16 = vor.u32 %v2054_v8, %v1841_v9  ;;  %v1908_v17 = vor.u32 %v2070_v10, %v1905_v11  ;;  %v1892_v46 = vor.u32 %v2066_v38, %v1889_v39 }
  0x78   : > { %1202 = vmatmul.bf16.vlgmr.msra.gmra.mxu2 %v2606_v40  ;;  %1215 = vmatmul.bf16.vlgmr.msra.gmra.mxu3 %v2610_v42  ;;  %v1740_v40 = vor.u32 %v2028_v30, %v1737_v31  ;;  %v2042_v42 = vld [vmem:[%s2999_s1 + $0x2c4] sm:$0xf]  ;;  %v1697_v31 = vld [vmem:[%s2999_s1 + $0x208] sm:$0xf0] }
  0x79   : > { %v1796_v53 = vor.u32 %v2042_v42, %v1793_v45  ;;  %v2018_v30 = vld [vmem:[%s2999_s1 + $0x204] sm:$0xf] }
  0x7a   : > { %1221 = vmatpush.bf16.msrb.mxu0 %v1748_v28  ;;  %1234 = vmatpush.bf16.msrb.mxu1 %v1812_v29  ;;  %v1708_v28 = vor.u32 %v2020_v14, %v1705_v15  ;;  %v1772_v29 = vor.u32 %v2036_v18, %v1769_v19 }
  0x7b   : > { %1247 = vmatpush.bf16.msrb.mxu2 %v1876_v32  ;;  %1260 = vmatpush.bf16.msrb.mxu3 %v1940_v33  ;;  %v1836_v32 = vor.u32 %v2052_v22, %v1833_v25  ;;  %v1900_v33 = vor.u32 %v2068_v26, %v1897_v27 }
  0x7e   : > { %1222 = vmatpush.bf16.msrb.mxu0 %v1740_v40  ;;  %1235 = vmatpush.bf16.msrb.mxu1 %v1804_v43  ;;  %v1700_v40 = vor.u32 %v2018_v30, %v1697_v31  ;;  %v1764_v43 = vor.u32 %v2034_v34, %v1761_v35 }
  0x7f   : > { %1248 = vmatpush.bf16.msrb.mxu2 %v1868_v47  ;;  %1261 = vmatpush.bf16.msrb.mxu3 %v1932_v41 }
  0x82   : > { %1223 = vmatpush.bf16.msrb.mxu0 %v1732_v52  ;;  %1236 = vmatpush.bf16.msrb.mxu1 %v1796_v53 }
  0x83   : > { %1249 = vmatpush.bf16.msrb.mxu2 %v1860_v56  ;;  %1262 = vmatpush.bf16.msrb.mxu3 %v1924_v57 }
  0x86   : > { %1224 = vmatpush.bf16.msrb.mxu0 %v1724_v0  ;;  %1237 = vmatpush.bf16.msrb.mxu1 %v1788_v1 }
  0x87   : > { %1250 = vmatpush.bf16.msrb.mxu2 %v1852_v4  ;;  %1263 = vmatpush.bf16.msrb.mxu3 %v1916_v5 }
  0x8a   : > { %1225 = vmatpush.bf16.msrb.mxu0 %v1716_v12  ;;  %1238 = vmatpush.bf16.msrb.mxu1 %v1780_v13 }
  0x8b   : > { %1251 = vmatpush.bf16.msrb.mxu2 %v1844_v16  ;;  %1264 = vmatpush.bf16.msrb.mxu3 %v1908_v17 }
  0x8e   : > { %1226 = vmatpush.bf16.msrb.mxu0 %v1708_v28  ;;  %1239 = vmatpush.bf16.msrb.mxu1 %v1772_v29 }
  0x8f   : > { %1252 = vmatpush.bf16.msrb.mxu2 %v1836_v32  ;;  %1265 = vmatpush.bf16.msrb.mxu3 %v1900_v33 }
  0x92   : > { %1227 = vmatpush.bf16.msrb.mxu0 %v1700_v40  ;;  %1240 = vmatpush.bf16.msrb.mxu1 %v1764_v43 }
  0x93   : > { %1253 = vmatpush.bf16.msrb.mxu2 %v1828_v44  ;;  %1266 = vmatpush.bf16.msrb.mxu3 %v1892_v46 }
  0x95   : > { %1228 = vmatmul.bf16.vlgmr.msrb.gmra.mxu0 %v2698_v21  ;;  %1241 = vmatmul.bf16.vlgmr.msrb.gmra.mxu1 %v2705_v24 }
  0x96   : > { %1254 = vmatmul.bf16.vlgmr.msrb.gmra.mxu2 %v2696_v20  ;;  %1267 = vmatmul.bf16.vlgmr.msrb.gmra.mxu3 %v2703_v23 }
  0xb7   : > { %v1283_v8 = vpop.permute.xlu0 %1282 }
  0xd1   : > { %v1073_v47 = vpop.f32.mrf.mxu0 }
  0xd2   : > { %v1086_v41 = vpop.f32.mrf.mxu1 }
  0xd3   : > { %v1087_v58 = vadd.f32 %v1086_v41, %v1073_v47 }
  0xd7   : > { %v1099_v42 = vpop.f32.mrf.mxu2 }
  0xd8   : > { %v1112_v45 = vpop.f32.mrf.mxu3  ;;  %v1100_v23 = vadd.f32 %v1099_v42, %v1087_v58 }
  0xd9   : > { %v1075_v48 = vpop.f32.mrf.mxu0 }
  0xda   : > { %v1088_v49 = vpop.f32.mrf.mxu1  ;;  %v1113_v61 = vadd.f32 %v1112_v45, %v1100_v23 }
  0xdf   : > { %v1101_v50 = vpop.f32.mrf.mxu2 }
  0xe0   : > { %v1114_v51 = vpop.f32.mrf.mxu3 }
  0xe1   : > { %v1125_v52 = vpop.f32.mrf.mxu0 }
  0xe2   : > { %v1138_v53 = vpop.f32.mrf.mxu1  ;;  %v1126_v1 = vadd.f32 %v1125_v52, %v1113_v61 }
  0xe4   : > { %v1139_v3 = vadd.f32 %v1138_v53, %v1126_v1 }
  0xe7   : > { %v1151_v54 = vpop.f32.mrf.mxu2 }
  0xe8   : > { %v1164_v55 = vpop.f32.mrf.mxu3  ;;  %v1152_v5 = vadd.f32 %v1151_v54, %v1139_v3 }
  0xe9   : > { %v1127_v56 = vpop.f32.mrf.mxu0 }
  0xea   : > { %v1140_v21 = vpop.f32.mrf.mxu1  ;;  %v1165_v7 = vadd.f32 %v1164_v55, %v1152_v5  ;;  %v1327_v56 = vlaneseq }
  0xec   : > { %v1285_v10 = vmul.f32 %v1283_v8, %v1165_v7  ;;  %vm1329_vm2 = vcmp.lt.s32.totalorder %v1327_v56, 256 }
  0xee   : > { %v1304_v14 = vmul.f32 %v1285_v10, %v1285_v10  ;;  %v1288_v16 = vsel %vm1287_vm1, %v1285_v10, 0.0 }
  0xef   : > { %v1153_v57 = vpop.f32.mrf.mxu2  ;;  %v1289_v19 = vrot.slane %v1288_v16, 4 }
  0xf0   : > { %v1166_v24 = vpop.f32.mrf.mxu3  ;;  %v1306_v17 = vsel %vm1287_vm1, %v1304_v14, 0.0 }
  0xf1   : > { %v1307_v29 = vrot.slane %v1306_v17, 4  ;;  %v1290_v31 = vadd.f32 %v1289_v19, %v1288_v16 }
  0xf2   : > { %v1177_v20 = vpop.f32.mrf.mxu0  ;;  %v1190_v59 = vpop.f32.mrf.mxu1 }
  0xf3   : > { %v1191_v6 = vadd.f32 %v1190_v59, %v1177_v20  ;;  %v1308_v34 = vadd.f32 %v1307_v29, %v1306_v17  ;;  %v1291_v38 = vrot.slane %v1290_v31, 2 }
  0xf5   : > { %v1309_v47 = vrot.slane %v1308_v34, 2  ;;  %v1292_v45 = vadd.f32 %v1291_v38, %v1290_v31 }
  0xf7   : > { %v1310_v50 = vadd.f32 %v1309_v47, %v1308_v34  ;;  %v1293_v53 = vrot.slane %v1292_v45, 1 }
  0xf9   : > { %v1311_v21 = vrot.slane %v1310_v50, 1  ;;  %v1294_v58 = vadd.f32 %v1293_v53, %v1292_v45 }
  0xfa   : > { %v1179_v63 = vpop.f32.mrf.mxu0  ;;  %v1192_v0 = vpop.f32.mrf.mxu1 }
  0xfb   : > { %v1203_v60 = vpop.f32.mrf.mxu2  ;;  %v1216_v62 = vpop.f32.mrf.mxu3  ;;  %v1312_v23 = vadd.f32 %v1311_v21, %v1310_v50 }
  0xfc   : > { %v1204_v9 = vadd.f32 %v1203_v60, %v1191_v6 }
  0xfe   : > { %v1217_v11 = vadd.f32 %v1216_v62, %v1204_v9 }
 0x103   : > { %v1205_v2 = vpop.f32.mrf.mxu2  ;;  %v1218_v4 = vpop.f32.mrf.mxu3 }
 0x112   : > { %v1229_v12 = vpop.f32.mrf.mxu0  ;;  %v1242_v13 = vpop.f32.mrf.mxu1 }
 0x113   : > { %v1230_v15 = vadd.f32 %v1229_v12, %v1217_v11 }
 0x115   : > { %v1243_v18 = vadd.f32 %v1242_v13, %v1230_v15 }
 0x119   : > { %v1255_v22 = vpop.f32.mrf.mxu2  ;;  %v1268_v25 = vpop.f32.mrf.mxu3 }
 0x11a   : > { %v1256_v26 = vadd.f32 %v1255_v22, %v1243_v18  ;;  %v1231_v27 = vpop.f32.mrf.mxu0  ;;  %v1244_v28 = vpop.f32.mrf.mxu1 }
 0x11c   : > { %v1269_v30 = vadd.f32 %v1268_v25, %v1256_v26 }
 0x11e   : > { %v1272_v32 = vpack.c.bf16 %v1269_v30, %v1165_v7  ;;  %v1286_v33 = vmul.f32 %v1283_v8, %v1269_v30 }
 0x120   : > { %v1274_v35 = vrot.slane %v1272_v32, 3  ;;  %v1295_v36 = vsel %vm1287_vm1, %v1286_v33, 0.0  ;;  %v1305_v37 = vmul.f32 %v1286_v33, %v1286_v33 }
 0x121   : > { %v1296_v39 = vrot.slane %v1295_v36, 4  ;;  %v1257_v40 = vpop.f32.mrf.mxu2  ;;  %v1270_v43 = vpop.f32.mrf.mxu3 }
 0x122   : > { %v1277_v44 = vsel %vm213_vm11, %v1272_v32, %v1274_v35  ;;  %v1313_v46 = vsel %vm1287_vm1, %v1305_v37, 0.0 }
 0x123   : > { %1279 = vst [vmem:[%s203_s9] sm:$0x3] %v1277_v44  ;;  %v1297_v41 = vadd.f32 %v1296_v39, %v1295_v36  ;;  %v1314_v42 = vrot.slane %v1313_v46, 4 }
 0x125   : > { %v1298_v48 = vrot.slane %v1297_v41, 2  ;;  %v1315_v49 = vadd.f32 %v1314_v42, %v1313_v46 }
 0x127   : > { %v1299_v51 = vadd.f32 %v1298_v48, %v1297_v41  ;;  %v1316_v52 = vrot.slane %v1315_v49, 2 }
 0x129   : > { %v1300_v54 = vrot.slane %v1299_v51, 1  ;;  %v1317_v55 = vadd.f32 %v1316_v52, %v1315_v49 }
 0x12b   : > { %v1301_v57 = vadd.f32 %v1300_v54, %v1299_v51  ;;  %v1318_v24 = vrot.slane %v1317_v55, 1 }
 0x12d   : > { %v1319_v20 = vadd.f32 %v1318_v24, %v1317_v55  ;;  %v1324_v59 = vrot.slane %v1301_v57, 7 }
 0x12f   : > { %v1325_v60 = vsel %vm213_vm11, %v1294_v58, %v1324_v59  ;;  %v1334_v61 = vrot.slane %v1319_v20, 7 }
 0x130   : > { %1331 = vst.msk [vmem:[%s208_s13] ss:$2 sm:$0x3] %vm1329_vm2, %v1325_v60 }
 0x131   : > { %v1335_v62 = vsel %vm213_vm11, %v1312_v23, %v1334_v61 }
 0x132   : > { %1949 = vst.msk [vmem:[%s208_s13 + $0x1] ss:$2 sm:$0x3] %vm1329_vm2, %v1335_v62 }
 0x133 PF: > { %s15_s15 = sadd.s32 1, %s2098_s15  }
 0x134   : > { %p12_p4 = scmp.ge.s32.totalorder %s15_s15, 4  }
 0x136   :  { %14 = sbr.rel (!%p12_p4) target bundleno = 1 (0x1), region = 78 }

</bundles_post_ra>
